<compile_context>
chip_gen: v7x
topology: tpu7x:2x2x1
jax: 0.10.0
libtpu: 0.0.40
codegen_flags: <defaults>
</compile_context>

<pallas_src>
import functools

import jax
import jax.numpy as jnp
from jax.experimental import pallas as pl
from jax.experimental.pallas import tpu as pltpu

EPS = 1e-5
_MAX_TB = 64  # cap on batch elements per block (bounds in-kernel unroll / trace size)


def _vmem_capacity_bytes():
    try:
        return int(pltpu.get_tpu_info().vmem_capacity_bytes)
    except Exception:
        return 64 * 1024 * 1024  # conservative fallback: v7x per-TensorCore VMEM


# --------------------------------------------------------------------------------------
# In-kernel helpers (pure 2-D (C, L) math; proven layouts: (C,1) columns, (1,L) rows)
# --------------------------------------------------------------------------------------
def _row_stats(x):
    """x: (C, L) f32 -> per-channel row mean over L and centered sum of squares."""
    L = x.shape[1]
    s1 = jnp.sum(x, axis=1, keepdims=True)            # (C, 1)
    rm = s1 * (1.0 / L)
    xc = x - rm
    q = jnp.sum(xc * xc, axis=1, keepdims=True)       # (C, 1)
    return rm, q


def _mix_one(x, rm, q, s_bn, t_bn, g1, b1, g2, groups):
    """GroupNorm + LayerNorm stats and the fused weighted apply for one (C, L) slice.

    s_bn/t_bn: per-channel scale/shift of the (softmax-weighted) BatchNorm term, (C, 1).
    g1/b1/g2:  w1*gn_gamma, w1*gn_beta, w2*ln_gamma, (C, 1).
    """
    C, L = x.shape
    G = groups
    cg = C // G

    # ---- GroupNorm stats from row partials (mean-centered -> no cancellation) -------
    n_g = float(cg * L)
    rm_g = rm.reshape(G, cg, 1)
    q_g = q.reshape(G, cg, 1)
    mean_g = jnp.sum(rm_g, axis=1, keepdims=True) * (1.0 / cg)          # (G, 1, 1)
    dev = rm_g - mean_g
    var_g = (jnp.sum(q_g, axis=1, keepdims=True)
             + float(L) * jnp.sum(dev * dev, axis=1, keepdims=True)) * (1.0 / n_g)
    inv_g = jax.lax.rsqrt(jnp.maximum(var_g, 0.0) + EPS)
    mean_g = jnp.broadcast_to(mean_g, (G, cg, 1)).reshape(C, 1)          # per-channel
    inv_g = jnp.broadcast_to(inv_g, (G, cg, 1)).reshape(C, 1)

    # ---- LayerNorm stats: reduce over channels per position (VPU/XLU, no MXU) -------
    # TODO(synk): switch to a centered form if channel activations have |mean| >> std.
    csum1 = jnp.sum(x, axis=0, keepdims=True)                            # (1, L)
    csum2 = jnp.sum(x * x, axis=0, keepdims=True)
    mean_l = csum1 * (1.0 / C)
    var_l = jnp.maximum(csum2 * (1.0 / C) - mean_l * mean_l, 0.0)
    inv_l = jax.lax.rsqrt(var_l + EPS)

    # ---- single fused per-element apply (no x_bn / x_gn / x_ln temporaries) ---------
    s_cg = s_bn + g1 * inv_g
    t_cg = t_bn + b1 - g1 * mean_g * inv_g
    return x * s_cg + t_cg + g2 * ((x - mean_l) * inv_l)


# --------------------------------------------------------------------------------------
# Fused single-pass kernel (x fully resident in VMEM -> no separate stats read of x)
# --------------------------------------------------------------------------------------
def _fused_kernel(x_ref, pk_ref, o_ref, *, groups):
    B = x_ref.shape[0]
    L = x_ref.shape[2]
    pk = pk_ref[...].astype(jnp.float32)               # (C, 8)
    wg, t0 = pk[:, 0:1], pk[:, 1:2]                    # w0*bn_gamma, w0*bn_beta + w2*ln_beta
    g1, b1, g2 = pk[:, 2:3], pk[:, 3:4], pk[:, 4:5]

    # phase A: per-(b, c) row stats + full-batch BatchNorm accumulation (all in VMEM)
    rms, qs = [], []
    r0 = r1 = r2 = None
    for b in range(B):                                 # static unroll (B <= _MAX_TB)
        x = x_ref[b].astype(jnp.float32)               # (C, L)
        rm, q = _row_stats(x)
        rms.append(rm)
        qs.append(q)
        r0 = rm if r0 is None else r0 + rm
        r1 = rm * rm if r1 is None else r1 + rm * rm
        r2 = q if r2 is None else r2 + q

    mean_bn = r0 * (1.0 / B)                                              # (C, 1)
    var_bn = (r2 + float(L) * jnp.maximum(r1 - B * mean_bn * mean_bn, 0.0)) * (1.0 / (B * L))
    inv_bn = jax.lax.rsqrt(var_bn + EPS)
    s_bn = wg * inv_bn
    t_bn = t0 - wg * mean_bn * inv_bn

    # phase B: per-batch GroupNorm / LayerNorm stats + fused apply
    for b in range(B):
        x = x_ref[b].astype(jnp.float32)
        out = _mix_one(x, rms[b], qs[b], s_bn, t_bn, g1, b1, g2, groups)
        o_ref[b] = out.astype(o_ref.dtype)


# --------------------------------------------------------------------------------------
# Two-pass fallback, pass 1: full-batch per-channel [sum rm, sum rm^2, sum q] over B
# --------------------------------------------------------------------------------------
def _bn_stats_kernel(x_ref, s_ref, *, acc_axis):
    # s_ref block: (1, C, 3) accumulator, resident across the `acc_axis` grid dimension.
    @pl.when(pl.program_id(acc_axis) == 0)
    def _():
        s_ref[...] = jnp.zeros_like(s_ref)

    for b in range(x_ref.shape[0]):                    # static unroll over batch tile
        x = x_ref[b].astype(jnp.float32)               # (C, L)
        rm, q = _row_stats(x)
        s_ref[0] += jnp.concatenate([rm, rm * rm, q], axis=1)   # (C, 3)


# --------------------------------------------------------------------------------------
# Two-pass fallback, pass 2: fused BN + GN + LN apply on a (TB, C, L) block
# --------------------------------------------------------------------------------------
def _apply_kernel(x_ref, pk_ref, o_ref, *, groups):
    pk = pk_ref[...].astype(jnp.float32)               # (C, 8)
    s_bn, t_bn = pk[:, 0:1], pk[:, 1:2]                # BN fully folded in the wrapper
    g1, b1, g2 = pk[:, 2:3], pk[:, 3:4], pk[:, 4:5]

    for b in range(x_ref.shape[0]):                    # static unroll over batch tile
        x = x_ref[b].astype(jnp.float32)               # (C, L)
        rm, q = _row_stats(x)
        out = _mix_one(x, rm, q, s_bn, t_bn, g1, b1, g2, groups)
        o_ref[b] = out.astype(o_ref.dtype)


# --------------------------------------------------------------------------------------
# Wrapper
# --------------------------------------------------------------------------------------
def dynamic_normalization(x, params, *, groups=8, force_two_pass=False,
                          max_batch_tile=None, donate_x=False):
    """x: (B, C, L).  params: per-channel affine params + 3 mix weights."""
    B, C, L = x.shape
    assert C % groups == 0
    f32 = jnp.float32

    # -------- parameter glue on tiny (C,) tensors: fold softmax weights + affines ----
    w = jax.nn.softmax(params["mix_weights"].astype(f32))
    w0, w1, w2 = w[0], w[1], w[2]

    def col(p):
        return p.astype(f32).reshape(C, 1)

    bn_g, bn_b = col(params["bn_gamma"]), col(params["bn_beta"])
    gn_g, gn_b = col(params["gn_gamma"]), col(params["gn_beta"])
    ln_g, ln_b = col(params["ln_gamma"]), col(params["ln_beta"])
    zpad = jnp.zeros((C, 3), f32)

    # -------- generation-aware VMEM budget and batch-tile sizing ---------------------
    phys = _vmem_capacity_bytes()                     # 128 MiB v5e/v6e, 64 MiB v7x (per TC)
    vmem_limit = min(phys // 2, 100 * 1024 * 1024)    # explicit scoped limit for Mosaic
    sizing_budget = int(vmem_limit * 0.8)
    xb = jnp.dtype(x.dtype).itemsize
    # per batch element: 2x double-buffered input + output blocks + ~3 f32 temporaries
    per_b_bytes = C * L * (4 * xb + 3 * 4)
    tb_cap = sizing_budget // max(per_b_bytes, 1)
    if max_batch_tile is not None:
        tb_cap = min(tb_cap, int(max_batch_tile))
    tb_cap = max(1, min(tb_cap, B, _MAX_TB))

    io_alias = {0: 0} if donate_x else {}

    # ================================ fused path ======================================
    if tb_cap >= B and not force_two_pass:
        pk = jnp.concatenate(
            [w0 * bn_g, w0 * bn_b + w2 * ln_b, w1 * gn_g, w1 * gn_b, w2 * ln_g, zpad],
            axis=1)                                                      # (C, 8)
        return pl.pallas_call(
            functools.partial(_fused_kernel, groups=groups),
            grid=(1,),
            in_specs=[pl.BlockSpec((B, C, L), lambda i: (0, 0, 0)),
                      pl.BlockSpec((C, 8), lambda i: (0, 0))],
            out_specs=pl.BlockSpec((B, C, L), lambda i: (0, 0, 0)),
            out_shape=jax.ShapeDtypeStruct((B, C, L), x.dtype),
            compiler_params=pltpu.CompilerParams(
                dimension_semantics=("arbitrary",), vmem_limit_bytes=vmem_limit),
            input_output_aliases=io_alias,
        )(x, pk)

    # ================================ two-pass path ====================================
    # largest batch tile that divides B and fits the budget (avoids ragged blocks)
    tb = 1
    for d in range(tb_cap, 0, -1):
        if B % d == 0:
            tb = d
            break
    n_tiles = B // tb

    # ---- pass 1: full-batch stats [sum_b rm, sum_b rm^2, sum_b q] per channel --------
    if n_tiles >= 2 and n_tiles % 2 == 0:
        # v7x: split the (serial) accumulation across both TensorCores via a leading
        # "parallel" axis; partials are summed in the wrapper.  On 1-TC chips the
        # leading axis is simply looped.
        half = n_tiles // 2
        stats_raw = pl.pallas_call(
            functools.partial(_bn_stats_kernel, acc_axis=1),
            grid=(2, half),
            in_specs=[pl.BlockSpec((tb, C, L), lambda p, t: (p * half + t, 0, 0))],
            out_specs=pl.BlockSpec((1, C, 3), lambda p, t: (p, 0, 0)),
            out_shape=jax.ShapeDtypeStruct((2, C, 3), f32),
            compiler_params=pltpu.CompilerParams(
                dimension_semantics=("parallel", "arbitrary"),
                vmem_limit_bytes=vmem_limit),
        )(x)
    else:
        stats_raw = pl.pallas_call(
            functools.partial(_bn_stats_kernel, acc_axis=0),
            grid=(n_tiles,),
            in_specs=[pl.BlockSpec((tb, C, L), lambda t: (t, 0, 0))],
            out_specs=pl.BlockSpec((1, C, 3), lambda t: (0, 0, 0)),
            out_shape=jax.ShapeDtypeStruct((1, C, 3), f32),
            compiler_params=pltpu.CompilerParams(
                dimension_semantics=("arbitrary",), vmem_limit_bytes=vmem_limit),
        )(x)

    stats = jnp.sum(stats_raw, axis=0)                                   # (C, 3)
    r0, r1, r2 = stats[:, 0:1], stats[:, 1:2], stats[:, 2:3]
    mean_bn = r0 / B
    var_bn = (r2 + L * jnp.maximum(r1 - B * mean_bn * mean_bn, 0.0)) / (B * L)
    inv_bn = jax.lax.rsqrt(var_bn + EPS)

    s_bn = w0 * bn_g * inv_bn
    t0 = w0 * (bn_b - bn_g * mean_bn * inv_bn) + w2 * ln_b
    pk = jnp.concatenate([s_bn, t0, w1 * gn_g, w1 * gn_b, w2 * ln_g, zpad], axis=1)

    # NOTE: if an xprof trace shows exposed DMA, sweep pipeline_mode=pl.Buffered(3) on
    #       the x spec below (costs one extra (tb, C, L) VMEM buffer).
    return pl.pallas_call(
        functools.partial(_apply_kernel, groups=groups),
        grid=(n_tiles,),
        in_specs=[pl.BlockSpec((tb, C, L), lambda t: (t, 0, 0)),
                  pl.BlockSpec((C, 8), lambda t: (0, 0))],
        out_specs=pl.BlockSpec((tb, C, L), lambda t: (t, 0, 0)),
        out_shape=jax.ShapeDtypeStruct((B, C, L), x.dtype),
        compiler_params=pltpu.CompilerParams(
            dimension_semantics=("parallel",), vmem_limit_bytes=vmem_limit),
        input_output_aliases=io_alias,
    )(x, pk)


# --------------------------------------------------------------------------------------
# Pure-JAX reference mirroring the PyTorch forward (training-mode BatchNorm)
# --------------------------------------------------------------------------------------
def _reference(x, params, *, groups=8):
    w = jax.nn.softmax(params["mix_weights"].astype(jnp.float32))
    B, C, L = x.shape
    mean_bn = jnp.mean(x, axis=(0, 2), keepdims=True)
    var_bn = jnp.var(x, axis=(0, 2), keepdims=True)
    x_bn = (x - mean_bn) / jnp.sqrt(var_bn + EPS)
    x_bn = x_bn * params["bn_gamma"][None, :, None] + params["bn_beta"][None, :, None]

    xg = x.reshape(B, groups, C // groups, L)
    mean_gn = jnp.mean(xg, axis=(2, 3), keepdims=True)
    var_gn = jnp.var(xg, axis=(2, 3), keepdims=True)
    x_gn = ((xg - mean_gn) / jnp.sqrt(var_gn + EPS)).reshape(B, C, L)
    x_gn = x_gn * params["gn_gamma"][None, :, None] + params["gn_beta"][None, :, None]

    mean_ln = jnp.mean(x, axis=1, keepdims=True)
    var_ln = jnp.var(x, axis=1, keepdims=True)
    x_ln = (x - mean_ln) / jnp.sqrt(var_ln + EPS)
    x_ln = x_ln * params["ln_gamma"][None, :, None] + params["ln_beta"][None, :, None]

    return w[0] * x_bn + w[1] * x_gn + w[2] * x_ln


if __name__ == "__main__":
    B, C, L = 4, 32, 256     # batch, num_features (channels), sequence length
    groups = 8

    key = jax.random.PRNGKey(0)
    kx, kg = jax.random.split(key)
    # Channel-dependent offsets so the centered (cancellation-safe) BN/GN statistics
    # path is actually exercised (|mean| >> 0 per channel).
    x = (jax.random.normal(kx, (B, C, L), dtype=jnp.float32)
         + 3.0 + 0.5 * jnp.arange(C, dtype=jnp.float32)[None, :, None])

    params = {
        "bn_gamma": jnp.ones((C,), jnp.float32) + 0.1 * jax.random.normal(kg, (C,)),
        "bn_beta": jnp.full((C,), 0.05, jnp.float32),
        "gn_gamma": jnp.ones((C,), jnp.float32),
        "gn_beta": jnp.full((C,), -0.02, jnp.float32),
        "ln_gamma": jnp.ones((C,), jnp.float32) * 0.9,
        "ln_beta": jnp.zeros((C,), jnp.float32),
        "mix_weights": jnp.array([0.4, 0.35, 0.25], jnp.float32),
    }

    ref = _reference(x, params, groups=groups)

    # 1) fused single-pass path (x fits comfortably in VMEM at this size)
    out = jax.block_until_ready(dynamic_normalization(x, params, groups=groups))
    assert out.shape == (B, C, L)
    err = float(jnp.max(jnp.abs(out - ref)))
    assert err < 1e-4, f"fused path mismatch vs reference: {err}"

    # 2) two-pass fallback: batch-tiled apply + 2-TensorCore-split stats pass
    out2 = jax.block_until_ready(
        dynamic_normalization(x, params, groups=groups,
                              force_two_pass=True, max_batch_tile=1))
    err2 = float(jnp.max(jnp.abs(out2 - ref)))
    assert err2 < 1e-4, f"two-pass (split stats) mismatch vs reference: {err2}"

    # 3) two-pass fallback: single serial stats grid (odd tile-count code path)
    out3 = jax.block_until_ready(
        dynamic_normalization(x, params, groups=groups,
                              force_two_pass=True, max_batch_tile=4))
    err3 = float(jnp.max(jnp.abs(out3 - ref)))
    assert err3 < 1e-4, f"two-pass (serial stats) mismatch vs reference: {err3}"

    print("KERNEL_OK")
</pallas_src>

<mosaic_0001>
module attributes {stable_mosaic.version = 11 : i64} {
  func.func @_fused_kernel(%arg0: i32, %arg1: memref<4x32x256xf32, #tpu.memory_space<vmem>>, %arg2: memref<32x8xf32, #tpu.memory_space<vmem>>, %arg3: memref<4x32x256xf32, #tpu.memory_space<vmem>>) attributes {dimension_semantics = [#tpu.dimension_semantics<arbitrary>], iteration_bounds = array<i64: 1>, scalar_prefetch = 0 : i64, scratch_operands = 0 : i64, tpu.core_type = #tpu.core_type<tc>, window_params = [{pipeline_mode = #tpu.pipeline_mode<synchronous>, transform_indices = @transform_0, window_bounds = array<i64: 4, 32, 256>}, {pipeline_mode = #tpu.pipeline_mode<synchronous>, transform_indices = @transform_1, window_bounds = array<i64: 32, 8>}, {pipeline_mode = #tpu.pipeline_mode<synchronous>, transform_indices = @transform_2, window_bounds = array<i64: 4, 32, 256>}]} {
    %c0 = arith.constant 0 : index
    %c0_0 = arith.constant 0 : index
    %0 = vector.load %arg2[%c0, %c0_0] : memref<32x8xf32, #tpu.memory_space<vmem>>, vector<32x8xf32>
    %1 = vector.extract_strided_slice %0 {offsets = [0, 0], sizes = [32, 1], strides = [1, 1]} : vector<32x8xf32> to vector<32x1xf32>
    %2 = vector.extract_strided_slice %0 {offsets = [0, 1], sizes = [32, 1], strides = [1, 1]} : vector<32x8xf32> to vector<32x1xf32>
    %3 = vector.extract_strided_slice %0 {offsets = [0, 2], sizes = [32, 1], strides = [1, 1]} : vector<32x8xf32> to vector<32x1xf32>
    %4 = vector.extract_strided_slice %0 {offsets = [0, 3], sizes = [32, 1], strides = [1, 1]} : vector<32x8xf32> to vector<32x1xf32>
    %5 = vector.extract_strided_slice %0 {offsets = [0, 4], sizes = [32, 1], strides = [1, 1]} : vector<32x8xf32> to vector<32x1xf32>
    %c0_1 = arith.constant 0 : index
    %c0_2 = arith.constant 0 : index
    %c0_3 = arith.constant 0 : index
    %6 = vector.load %arg1[%c0_1, %c0_2, %c0_3] : memref<4x32x256xf32, #tpu.memory_space<vmem>>, vector<1x32x256xf32>
    %7 = vector.shape_cast %6 : vector<1x32x256xf32> to vector<32x256xf32>
    %cst = arith.constant dense<0.000000e+00> : vector<32xf32>
    %8 = vector.multi_reduction <add>, %7, %cst [1] : vector<32x256xf32> to vector<32xf32>
    %9 = vector.shape_cast %8 : vector<32xf32> to vector<32x1xf32>
    %cst_4 = arith.constant 3.906250e-03 : f32
    %10 = vector.broadcast %cst_4 : f32 to vector<32x1xf32>
    %11 = arith.mulf %9, %10 : vector<32x1xf32>
    %12 = vector.broadcast %11 : vector<32x1xf32> to vector<32x256xf32>
    %13 = arith.subf %7, %12 : vector<32x256xf32>
    %14 = arith.mulf %13, %13 : vector<32x256xf32>
    %cst_5 = arith.constant dense<0.000000e+00> : vector<32xf32>
    %15 = vector.multi_reduction <add>, %14, %cst_5 [1] : vector<32x256xf32> to vector<32xf32>
    %16 = vector.shape_cast %15 : vector<32xf32> to vector<32x1xf32>
    %17 = arith.mulf %11, %11 : vector<32x1xf32>
    %c1 = arith.constant 1 : index
    %c0_6 = arith.constant 0 : index
    %c0_7 = arith.constant 0 : index
    %18 = vector.load %arg1[%c1, %c0_6, %c0_7] : memref<4x32x256xf32, #tpu.memory_space<vmem>>, vector<1x32x256xf32>
    %19 = vector.shape_cast %18 : vector<1x32x256xf32> to vector<32x256xf32>
    %cst_8 = arith.constant dense<0.000000e+00> : vector<32xf32>
    %20 = vector.multi_reduction <add>, %19, %cst_8 [1] : vector<32x256xf32> to vector<32xf32>
    %21 = vector.shape_cast %20 : vector<32xf32> to vector<32x1xf32>
    %cst_9 = arith.constant 3.906250e-03 : f32
    %22 = vector.broadcast %cst_9 : f32 to vector<32x1xf32>
    %23 = arith.mulf %21, %22 : vector<32x1xf32>
    %24 = vector.broadcast %23 : vector<32x1xf32> to vector<32x256xf32>
    %25 = arith.subf %19, %24 : vector<32x256xf32>
    %26 = arith.mulf %25, %25 : vector<32x256xf32>
    %cst_10 = arith.constant dense<0.000000e+00> : vector<32xf32>
    %27 = vector.multi_reduction <add>, %26, %cst_10 [1] : vector<32x256xf32> to vector<32xf32>
    %28 = vector.shape_cast %27 : vector<32xf32> to vector<32x1xf32>
    %29 = arith.addf %11, %23 : vector<32x1xf32>
    %30 = arith.mulf %23, %23 : vector<32x1xf32>
    %31 = arith.addf %17, %30 : vector<32x1xf32>
    %32 = arith.addf %16, %28 : vector<32x1xf32>
    %c2 = arith.constant 2 : index
    %c0_11 = arith.constant 0 : index
    %c0_12 = arith.constant 0 : index
    %33 = vector.load %arg1[%c2, %c0_11, %c0_12] : memref<4x32x256xf32, #tpu.memory_space<vmem>>, vector<1x32x256xf32>
    %34 = vector.shape_cast %33 : vector<1x32x256xf32> to vector<32x256xf32>
    %cst_13 = arith.constant dense<0.000000e+00> : vector<32xf32>
    %35 = vector.multi_reduction <add>, %34, %cst_13 [1] : vector<32x256xf32> to vector<32xf32>
    %36 = vector.shape_cast %35 : vector<32xf32> to vector<32x1xf32>
    %cst_14 = arith.constant 3.906250e-03 : f32
    %37 = vector.broadcast %cst_14 : f32 to vector<32x1xf32>
    %38 = arith.mulf %36, %37 : vector<32x1xf32>
    %39 = vector.broadcast %38 : vector<32x1xf32> to vector<32x256xf32>
    %40 = arith.subf %34, %39 : vector<32x256xf32>
    %41 = arith.mulf %40, %40 : vector<32x256xf32>
    %cst_15 = arith.constant dense<0.000000e+00> : vector<32xf32>
    %42 = vector.multi_reduction <add>, %41, %cst_15 [1] : vector<32x256xf32> to vector<32xf32>
    %43 = vector.shape_cast %42 : vector<32xf32> to vector<32x1xf32>
    %44 = arith.addf %29, %38 : vector<32x1xf32>
    %45 = arith.mulf %38, %38 : vector<32x1xf32>
    %46 = arith.addf %31, %45 : vector<32x1xf32>
    %47 = arith.addf %32, %43 : vector<32x1xf32>
    %c3 = arith.constant 3 : index
    %c0_16 = arith.constant 0 : index
    %c0_17 = arith.constant 0 : index
    %48 = vector.load %arg1[%c3, %c0_16, %c0_17] : memref<4x32x256xf32, #tpu.memory_space<vmem>>, vector<1x32x256xf32>
    %49 = vector.shape_cast %48 : vector<1x32x256xf32> to vector<32x256xf32>
    %cst_18 = arith.constant dense<0.000000e+00> : vector<32xf32>
    %50 = vector.multi_reduction <add>, %49, %cst_18 [1] : vector<32x256xf32> to vector<32xf32>
    %51 = vector.shape_cast %50 : vector<32xf32> to vector<32x1xf32>
    %cst_19 = arith.constant 3.906250e-03 : f32
    %52 = vector.broadcast %cst_19 : f32 to vector<32x1xf32>
    %53 = arith.mulf %51, %52 : vector<32x1xf32>
    %54 = vector.broadcast %53 : vector<32x1xf32> to vector<32x256xf32>
    %55 = arith.subf %49, %54 : vector<32x256xf32>
    %56 = arith.mulf %55, %55 : vector<32x256xf32>
    %cst_20 = arith.constant dense<0.000000e+00> : vector<32xf32>
    %57 = vector.multi_reduction <add>, %56, %cst_20 [1] : vector<32x256xf32> to vector<32xf32>
    %58 = vector.shape_cast %57 : vector<32xf32> to vector<32x1xf32>
    %59 = arith.addf %44, %53 : vector<32x1xf32>
    %60 = arith.mulf %53, %53 : vector<32x1xf32>
    %61 = arith.addf %46, %60 : vector<32x1xf32>
    %62 = arith.addf %47, %58 : vector<32x1xf32>
    %cst_21 = arith.constant 2.500000e-01 : f32
    %63 = vector.broadcast %cst_21 : f32 to vector<32x1xf32>
    %64 = arith.mulf %59, %63 : vector<32x1xf32>
    %cst_22 = arith.constant 4.000000e+00 : f32
    %65 = vector.broadcast %cst_22 : f32 to vector<32x1xf32>
    %66 = arith.mulf %65, %64 : vector<32x1xf32>
    %67 = arith.mulf %66, %64 : vector<32x1xf32>
    %68 = arith.subf %61, %67 : vector<32x1xf32>
    %cst_23 = arith.constant 0.000000e+00 : f32
    %69 = vector.broadcast %cst_23 : f32 to vector<32x1xf32>
    %70 = arith.maximumf %68, %69 : vector<32x1xf32>
    %cst_24 = arith.constant 2.560000e+02 : f32
    %71 = vector.broadcast %cst_24 : f32 to vector<32x1xf32>
    %72 = arith.mulf %71, %70 : vector<32x1xf32>
    %73 = arith.addf %62, %72 : vector<32x1xf32>
    %cst_25 = arith.constant 9.765625E-4 : f32
    %74 = vector.broadcast %cst_25 : f32 to vector<32x1xf32>
    %75 = arith.mulf %73, %74 : vector<32x1xf32>
    %cst_26 = arith.constant 9.99999974E-6 : f32
    %76 = vector.broadcast %cst_26 : f32 to vector<32x1xf32>
    %77 = arith.addf %75, %76 : vector<32x1xf32>
    %78 = math.rsqrt %77 : vector<32x1xf32>
    %79 = arith.mulf %1, %78 : vector<32x1xf32>
    %80 = arith.mulf %1, %64 : vector<32x1xf32>
    %81 = arith.mulf %80, %78 : vector<32x1xf32>
    %82 = arith.subf %2, %81 : vector<32x1xf32>
    %c0_27 = arith.constant 0 : index
    %c0_28 = arith.constant 0 : index
    %c0_29 = arith.constant 0 : index
    %83 = vector.load %arg1[%c0_27, %c0_28, %c0_29] : memref<4x32x256xf32, #tpu.memory_space<vmem>>, vector<1x32x256xf32>
    %84 = vector.shape_cast %83 : vector<1x32x256xf32> to vector<32x256xf32>
    %85 = vector.shape_cast %11 : vector<32x1xf32> to vector<8x4x1xf32>
    %86 = vector.shape_cast %16 : vector<32x1xf32> to vector<8x4x1xf32>
    %cst_30 = arith.constant dense<0.000000e+00> : vector<8x1xf32>
    %87 = vector.multi_reduction <add>, %85, %cst_30 [1] : vector<8x4x1xf32> to vector<8x1xf32>
    %88 = vector.shape_cast %87 : vector<8x1xf32> to vector<8x1x1xf32>
    %cst_31 = arith.constant 2.500000e-01 : f32
    %89 = vector.broadcast %cst_31 : f32 to vector<8x1x1xf32>
    %90 = arith.mulf %88, %89 : vector<8x1x1xf32>
    %91 = vector.broadcast %90 : vector<8x1x1xf32> to vector<8x4x1xf32>
    %92 = arith.subf %85, %91 : vector<8x4x1xf32>
    %cst_32 = arith.constant dense<0.000000e+00> : vector<8x1xf32>
    %93 = vector.multi_reduction <add>, %86, %cst_32 [1] : vector<8x4x1xf32> to vector<8x1xf32>
    %94 = vector.shape_cast %93 : vector<8x1xf32> to vector<8x1x1xf32>
    %95 = arith.mulf %92, %92 : vector<8x4x1xf32>
    %cst_33 = arith.constant dense<0.000000e+00> : vector<8x1xf32>
    %96 = vector.multi_reduction <add>, %95, %cst_33 [1] : vector<8x4x1xf32> to vector<8x1xf32>
    %97 = vector.shape_cast %96 : vector<8x1xf32> to vector<8x1x1xf32>
    %cst_34 = arith.constant 2.560000e+02 : f32
    %98 = vector.broadcast %cst_34 : f32 to vector<8x1x1xf32>
    %99 = arith.mulf %98, %97 : vector<8x1x1xf32>
    %100 = arith.addf %94, %99 : vector<8x1x1xf32>
    %cst_35 = arith.constant 9.765625E-4 : f32
    %101 = vector.broadcast %cst_35 : f32 to vector<8x1x1xf32>
    %102 = arith.mulf %100, %101 : vector<8x1x1xf32>
    %cst_36 = arith.constant 0.000000e+00 : f32
    %103 = vector.broadcast %cst_36 : f32 to vector<8x1x1xf32>
    %104 = arith.maximumf %102, %103 : vector<8x1x1xf32>
    %cst_37 = arith.constant 9.99999974E-6 : f32
    %105 = vector.broadcast %cst_37 : f32 to vector<8x1x1xf32>
    %106 = arith.addf %104, %105 : vector<8x1x1xf32>
    %107 = math.rsqrt %106 : vector<8x1x1xf32>
    %108 = vector.shape_cast %90 : vector<8x1x1xf32> to vector<8x1x1xf32>
    %109 = vector.broadcast %108 : vector<8x1x1xf32> to vector<8x4x1xf32>
    %110 = vector.shape_cast %109 : vector<8x4x1xf32> to vector<32x1xf32>
    %111 = vector.shape_cast %107 : vector<8x1x1xf32> to vector<8x1x1xf32>
    %112 = vector.broadcast %111 : vector<8x1x1xf32> to vector<8x4x1xf32>
    %113 = vector.shape_cast %112 : vector<8x4x1xf32> to vector<32x1xf32>
    %cst_38 = arith.constant dense<0.000000e+00> : vector<256xf32>
    %114 = vector.multi_reduction <add>, %84, %cst_38 [0] : vector<32x256xf32> to vector<256xf32>
    %115 = vector.shape_cast %114 : vector<256xf32> to vector<1x256xf32>
    %116 = arith.mulf %84, %84 : vector<32x256xf32>
    %cst_39 = arith.constant dense<0.000000e+00> : vector<256xf32>
    %117 = vector.multi_reduction <add>, %116, %cst_39 [0] : vector<32x256xf32> to vector<256xf32>
    %118 = vector.shape_cast %117 : vector<256xf32> to vector<1x256xf32>
    %cst_40 = arith.constant 3.125000e-02 : f32
    %119 = vector.broadcast %cst_40 : f32 to vector<1x256xf32>
    %120 = arith.mulf %115, %119 : vector<1x256xf32>
    %cst_41 = arith.constant 3.125000e-02 : f32
    %121 = vector.broadcast %cst_41 : f32 to vector<1x256xf32>
    %122 = arith.mulf %118, %121 : vector<1x256xf32>
    %123 = arith.mulf %120, %120 : vector<1x256xf32>
    %124 = arith.subf %122, %123 : vector<1x256xf32>
    %cst_42 = arith.constant 0.000000e+00 : f32
    %125 = vector.broadcast %cst_42 : f32 to vector<1x256xf32>
    %126 = arith.maximumf %124, %125 : vector<1x256xf32>
    %cst_43 = arith.constant 9.99999974E-6 : f32
    %127 = vector.broadcast %cst_43 : f32 to vector<1x256xf32>
    %128 = arith.addf %126, %127 : vector<1x256xf32>
    %129 = math.rsqrt %128 : vector<1x256xf32>
    %130 = arith.mulf %3, %113 : vector<32x1xf32>
    %131 = arith.addf %79, %130 : vector<32x1xf32>
    %132 = arith.addf %82, %4 : vector<32x1xf32>
    %133 = arith.mulf %3, %110 : vector<32x1xf32>
    %134 = arith.mulf %133, %113 : vector<32x1xf32>
    %135 = arith.subf %132, %134 : vector<32x1xf32>
    %136 = vector.broadcast %131 : vector<32x1xf32> to vector<32x256xf32>
    %137 = arith.mulf %84, %136 : vector<32x256xf32>
    %138 = vector.broadcast %135 : vector<32x1xf32> to vector<32x256xf32>
    %139 = arith.addf %137, %138 : vector<32x256xf32>
    %140 = vector.broadcast %120 : vector<1x256xf32> to vector<32x256xf32>
    %141 = arith.subf %84, %140 : vector<32x256xf32>
    %142 = vector.broadcast %129 : vector<1x256xf32> to vector<32x256xf32>
    %143 = arith.mulf %141, %142 : vector<32x256xf32>
    %144 = vector.broadcast %5 : vector<32x1xf32> to vector<32x256xf32>
    %145 = arith.mulf %144, %143 : vector<32x256xf32>
    %146 = arith.addf %139, %145 : vector<32x256xf32>
    %c0_44 = arith.constant 0 : index
    %c0_45 = arith.constant 0 : index
    %c0_46 = arith.constant 0 : index
    %147 = vector.load %arg3[%c0_44, %c0_45, %c0_46] : memref<4x32x256xf32, #tpu.memory_space<vmem>>, vector<1x32x256xf32>
    %148 = vector.shape_cast %147 : vector<1x32x256xf32> to vector<32x256xf32>
    %149 = vector.shape_cast %146 : vector<32x256xf32> to vector<1x32x256xf32>
    tpu.vector_store %arg3[%c0_44, %c0_45, %c0_46], %149 {strides = array<i32>} : memref<4x32x256xf32, #tpu.memory_space<vmem>>, vector<1x32x256xf32>,
    %c1_47 = arith.constant 1 : index
    %c0_48 = arith.constant 0 : index
    %c0_49 = arith.constant 0 : index
    %150 = vector.load %arg1[%c1_47, %c0_48, %c0_49] : memref<4x32x256xf32, #tpu.memory_space<vmem>>, vector<1x32x256xf32>
    %151 = vector.shape_cast %150 : vector<1x32x256xf32> to vector<32x256xf32>
    %152 = vector.shape_cast %23 : vector<32x1xf32> to vector<8x4x1xf32>
    %153 = vector.shape_cast %28 : vector<32x1xf32> to vector<8x4x1xf32>
    %cst_50 = arith.constant dense<0.000000e+00> : vector<8x1xf32>
    %154 = vector.multi_reduction <add>, %152, %cst_50 [1] : vector<8x4x1xf32> to vector<8x1xf32>
    %155 = vector.shape_cast %154 : vector<8x1xf32> to vector<8x1x1xf32>
    %cst_51 = arith.constant 2.500000e-01 : f32
    %156 = vector.broadcast %cst_51 : f32 to vector<8x1x1xf32>
    %157 = arith.mulf %155, %156 : vector<8x1x1xf32>
    %158 = vector.broadcast %157 : vector<8x1x1xf32> to vector<8x4x1xf32>
    %159 = arith.subf %152, %158 : vector<8x4x1xf32>
    %cst_52 = arith.constant dense<0.000000e+00> : vector<8x1xf32>
    %160 = vector.multi_reduction <add>, %153, %cst_52 [1] : vector<8x4x1xf32> to vector<8x1xf32>
    %161 = vector.shape_cast %160 : vector<8x1xf32> to vector<8x1x1xf32>
    %162 = arith.mulf %159, %159 : vector<8x4x1xf32>
    %cst_53 = arith.constant dense<0.000000e+00> : vector<8x1xf32>
    %163 = vector.multi_reduction <add>, %162, %cst_53 [1] : vector<8x4x1xf32> to vector<8x1xf32>
    %164 = vector.shape_cast %163 : vector<8x1xf32> to vector<8x1x1xf32>
    %cst_54 = arith.constant 2.560000e+02 : f32
    %165 = vector.broadcast %cst_54 : f32 to vector<8x1x1xf32>
    %166 = arith.mulf %165, %164 : vector<8x1x1xf32>
    %167 = arith.addf %161, %166 : vector<8x1x1xf32>
    %cst_55 = arith.constant 9.765625E-4 : f32
    %168 = vector.broadcast %cst_55 : f32 to vector<8x1x1xf32>
    %169 = arith.mulf %167, %168 : vector<8x1x1xf32>
    %cst_56 = arith.constant 0.000000e+00 : f32
    %170 = vector.broadcast %cst_56 : f32 to vector<8x1x1xf32>
    %171 = arith.maximumf %169, %170 : vector<8x1x1xf32>
    %cst_57 = arith.constant 9.99999974E-6 : f32
    %172 = vector.broadcast %cst_57 : f32 to vector<8x1x1xf32>
    %173 = arith.addf %171, %172 : vector<8x1x1xf32>
    %174 = math.rsqrt %173 : vector<8x1x1xf32>
    %175 = vector.shape_cast %157 : vector<8x1x1xf32> to vector<8x1x1xf32>
    %176 = vector.broadcast %175 : vector<8x1x1xf32> to vector<8x4x1xf32>
    %177 = vector.shape_cast %176 : vector<8x4x1xf32> to vector<32x1xf32>
    %178 = vector.shape_cast %174 : vector<8x1x1xf32> to vector<8x1x1xf32>
    %179 = vector.broadcast %178 : vector<8x1x1xf32> to vector<8x4x1xf32>
    %180 = vector.shape_cast %179 : vector<8x4x1xf32> to vector<32x1xf32>
    %cst_58 = arith.constant dense<0.000000e+00> : vector<256xf32>
    %181 = vector.multi_reduction <add>, %151, %cst_58 [0] : vector<32x256xf32> to vector<256xf32>
    %182 = vector.shape_cast %181 : vector<256xf32> to vector<1x256xf32>
    %183 = arith.mulf %151, %151 : vector<32x256xf32>
    %cst_59 = arith.constant dense<0.000000e+00> : vector<256xf32>
    %184 = vector.multi_reduction <add>, %183, %cst_59 [0] : vector<32x256xf32> to vector<256xf32>
    %185 = vector.shape_cast %184 : vector<256xf32> to vector<1x256xf32>
    %cst_60 = arith.constant 3.125000e-02 : f32
    %186 = vector.broadcast %cst_60 : f32 to vector<1x256xf32>
    %187 = arith.mulf %182, %186 : vector<1x256xf32>
    %cst_61 = arith.constant 3.125000e-02 : f32
    %188 = vector.broadcast %cst_61 : f32 to vector<1x256xf32>
    %189 = arith.mulf %185, %188 : vector<1x256xf32>
    %190 = arith.mulf %187, %187 : vector<1x256xf32>
    %191 = arith.subf %189, %190 : vector<1x256xf32>
    %cst_62 = arith.constant 0.000000e+00 : f32
    %192 = vector.broadcast %cst_62 : f32 to vector<1x256xf32>
    %193 = arith.maximumf %191, %192 : vector<1x256xf32>
    %cst_63 = arith.constant 9.99999974E-6 : f32
    %194 = vector.broadcast %cst_63 : f32 to vector<1x256xf32>
    %195 = arith.addf %193, %194 : vector<1x256xf32>
    %196 = math.rsqrt %195 : vector<1x256xf32>
    %197 = arith.mulf %3, %180 : vector<32x1xf32>
    %198 = arith.addf %79, %197 : vector<32x1xf32>
    %199 = arith.addf %82, %4 : vector<32x1xf32>
    %200 = arith.mulf %3, %177 : vector<32x1xf32>
    %201 = arith.mulf %200, %180 : vector<32x1xf32>
    %202 = arith.subf %199, %201 : vector<32x1xf32>
    %203 = vector.broadcast %198 : vector<32x1xf32> to vector<32x256xf32>
    %204 = arith.mulf %151, %203 : vector<32x256xf32>
    %205 = vector.broadcast %202 : vector<32x1xf32> to vector<32x256xf32>
    %206 = arith.addf %204, %205 : vector<32x256xf32>
    %207 = vector.broadcast %187 : vector<1x256xf32> to vector<32x256xf32>
    %208 = arith.subf %151, %207 : vector<32x256xf32>
    %209 = vector.broadcast %196 : vector<1x256xf32> to vector<32x256xf32>
    %210 = arith.mulf %208, %209 : vector<32x256xf32>
    %211 = vector.broadcast %5 : vector<32x1xf32> to vector<32x256xf32>
    %212 = arith.mulf %211, %210 : vector<32x256xf32>
    %213 = arith.addf %206, %212 : vector<32x256xf32>
    %c1_64 = arith.constant 1 : index
    %c0_65 = arith.constant 0 : index
    %c0_66 = arith.constant 0 : index
    %214 = vector.load %arg3[%c1_64, %c0_65, %c0_66] : memref<4x32x256xf32, #tpu.memory_space<vmem>>, vector<1x32x256xf32>
    %215 = vector.shape_cast %214 : vector<1x32x256xf32> to vector<32x256xf32>
    %216 = vector.shape_cast %213 : vector<32x256xf32> to vector<1x32x256xf32>
    tpu.vector_store %arg3[%c1_64, %c0_65, %c0_66], %216 {strides = array<i32>} : memref<4x32x256xf32, #tpu.memory_space<vmem>>, vector<1x32x256xf32>,
    %c2_67 = arith.constant 2 : index
    %c0_68 = arith.constant 0 : index
    %c0_69 = arith.constant 0 : index
    %217 = vector.load %arg1[%c2_67, %c0_68, %c0_69] : memref<4x32x256xf32, #tpu.memory_space<vmem>>, vector<1x32x256xf32>
    %218 = vector.shape_cast %217 : vector<1x32x256xf32> to vector<32x256xf32>
    %219 = vector.shape_cast %38 : vector<32x1xf32> to vector<8x4x1xf32>
    %220 = vector.shape_cast %43 : vector<32x1xf32> to vector<8x4x1xf32>
    %cst_70 = arith.constant dense<0.000000e+00> : vector<8x1xf32>
    %221 = vector.multi_reduction <add>, %219, %cst_70 [1] : vector<8x4x1xf32> to vector<8x1xf32>
    %222 = vector.shape_cast %221 : vector<8x1xf32> to vector<8x1x1xf32>
    %cst_71 = arith.constant 2.500000e-01 : f32
    %223 = vector.broadcast %cst_71 : f32 to vector<8x1x1xf32>
    %224 = arith.mulf %222, %223 : vector<8x1x1xf32>
    %225 = vector.broadcast %224 : vector<8x1x1xf32> to vector<8x4x1xf32>
    %226 = arith.subf %219, %225 : vector<8x4x1xf32>
    %cst_72 = arith.constant dense<0.000000e+00> : vector<8x1xf32>
    %227 = vector.multi_reduction <add>, %220, %cst_72 [1] : vector<8x4x1xf32> to vector<8x1xf32>
    %228 = vector.shape_cast %227 : vector<8x1xf32> to vector<8x1x1xf32>
    %229 = arith.mulf %226, %226 : vector<8x4x1xf32>
    %cst_73 = arith.constant dense<0.000000e+00> : vector<8x1xf32>
    %230 = vector.multi_reduction <add>, %229, %cst_73 [1] : vector<8x4x1xf32> to vector<8x1xf32>
    %231 = vector.shape_cast %230 : vector<8x1xf32> to vector<8x1x1xf32>
    %cst_74 = arith.constant 2.560000e+02 : f32
    %232 = vector.broadcast %cst_74 : f32 to vector<8x1x1xf32>
    %233 = arith.mulf %232, %231 : vector<8x1x1xf32>
    %234 = arith.addf %228, %233 : vector<8x1x1xf32>
    %cst_75 = arith.constant 9.765625E-4 : f32
    %235 = vector.broadcast %cst_75 : f32 to vector<8x1x1xf32>
    %236 = arith.mulf %234, %235 : vector<8x1x1xf32>
    %cst_76 = arith.constant 0.000000e+00 : f32
    %237 = vector.broadcast %cst_76 : f32 to vector<8x1x1xf32>
    %238 = arith.maximumf %236, %237 : vector<8x1x1xf32>
    %cst_77 = arith.constant 9.99999974E-6 : f32
    %239 = vector.broadcast %cst_77 : f32 to vector<8x1x1xf32>
    %240 = arith.addf %238, %239 : vector<8x1x1xf32>
    %241 = math.rsqrt %240 : vector<8x1x1xf32>
    %242 = vector.shape_cast %224 : vector<8x1x1xf32> to vector<8x1x1xf32>
    %243 = vector.broadcast %242 : vector<8x1x1xf32> to vector<8x4x1xf32>
    %244 = vector.shape_cast %243 : vector<8x4x1xf32> to vector<32x1xf32>
    %245 = vector.shape_cast %241 : vector<8x1x1xf32> to vector<8x1x1xf32>
    %246 = vector.broadcast %245 : vector<8x1x1xf32> to vector<8x4x1xf32>
    %247 = vector.shape_cast %246 : vector<8x4x1xf32> to vector<32x1xf32>
    %cst_78 = arith.constant dense<0.000000e+00> : vector<256xf32>
    %248 = vector.multi_reduction <add>, %218, %cst_78 [0] : vector<32x256xf32> to vector<256xf32>
    %249 = vector.shape_cast %248 : vector<256xf32> to vector<1x256xf32>
    %250 = arith.mulf %218, %218 : vector<32x256xf32>
    %cst_79 = arith.constant dense<0.000000e+00> : vector<256xf32>
    %251 = vector.multi_reduction <add>, %250, %cst_79 [0] : vector<32x256xf32> to vector<256xf32>
    %252 = vector.shape_cast %251 : vector<256xf32> to vector<1x256xf32>
    %cst_80 = arith.constant 3.125000e-02 : f32
    %253 = vector.broadcast %cst_80 : f32 to vector<1x256xf32>
    %254 = arith.mulf %249, %253 : vector<1x256xf32>
    %cst_81 = arith.constant 3.125000e-02 : f32
    %255 = vector.broadcast %cst_81 : f32 to vector<1x256xf32>
    %256 = arith.mulf %252, %255 : vector<1x256xf32>
    %257 = arith.mulf %254, %254 : vector<1x256xf32>
    %258 = arith.subf %256, %257 : vector<1x256xf32>
    %cst_82 = arith.constant 0.000000e+00 : f32
    %259 = vector.broadcast %cst_82 : f32 to vector<1x256xf32>
    %260 = arith.maximumf %258, %259 : vector<1x256xf32>
    %cst_83 = arith.constant 9.99999974E-6 : f32
    %261 = vector.broadcast %cst_83 : f32 to vector<1x256xf32>
    %262 = arith.addf %260, %261 : vector<1x256xf32>
    %263 = math.rsqrt %262 : vector<1x256xf32>
    %264 = arith.mulf %3, %247 : vector<32x1xf32>
    %265 = arith.addf %79, %264 : vector<32x1xf32>
    %266 = arith.addf %82, %4 : vector<32x1xf32>
    %267 = arith.mulf %3, %244 : vector<32x1xf32>
    %268 = arith.mulf %267, %247 : vector<32x1xf32>
    %269 = arith.subf %266, %268 : vector<32x1xf32>
    %270 = vector.broadcast %265 : vector<32x1xf32> to vector<32x256xf32>
    %271 = arith.mulf %218, %270 : vector<32x256xf32>
    %272 = vector.broadcast %269 : vector<32x1xf32> to vector<32x256xf32>
    %273 = arith.addf %271, %272 : vector<32x256xf32>
    %274 = vector.broadcast %254 : vector<1x256xf32> to vector<32x256xf32>
    %275 = arith.subf %218, %274 : vector<32x256xf32>
    %276 = vector.broadcast %263 : vector<1x256xf32> to vector<32x256xf32>
    %277 = arith.mulf %275, %276 : vector<32x256xf32>
    %278 = vector.broadcast %5 : vector<32x1xf32> to vector<32x256xf32>
    %279 = arith.mulf %278, %277 : vector<32x256xf32>
    %280 = arith.addf %273, %279 : vector<32x256xf32>
    %c2_84 = arith.constant 2 : index
    %c0_85 = arith.constant 0 : index
    %c0_86 = arith.constant 0 : index
    %281 = vector.load %arg3[%c2_84, %c0_85, %c0_86] : memref<4x32x256xf32, #tpu.memory_space<vmem>>, vector<1x32x256xf32>
    %282 = vector.shape_cast %281 : vector<1x32x256xf32> to vector<32x256xf32>
    %283 = vector.shape_cast %280 : vector<32x256xf32> to vector<1x32x256xf32>
    tpu.vector_store %arg3[%c2_84, %c0_85, %c0_86], %283 {strides = array<i32>} : memref<4x32x256xf32, #tpu.memory_space<vmem>>, vector<1x32x256xf32>,
    %c3_87 = arith.constant 3 : index
    %c0_88 = arith.constant 0 : index
    %c0_89 = arith.constant 0 : index
    %284 = vector.load %arg1[%c3_87, %c0_88, %c0_89] : memref<4x32x256xf32, #tpu.memory_space<vmem>>, vector<1x32x256xf32>
    %285 = vector.shape_cast %284 : vector<1x32x256xf32> to vector<32x256xf32>
    %286 = vector.shape_cast %53 : vector<32x1xf32> to vector<8x4x1xf32>
    %287 = vector.shape_cast %58 : vector<32x1xf32> to vector<8x4x1xf32>
    %cst_90 = arith.constant dense<0.000000e+00> : vector<8x1xf32>
    %288 = vector.multi_reduction <add>, %286, %cst_90 [1] : vector<8x4x1xf32> to vector<8x1xf32>
    %289 = vector.shape_cast %288 : vector<8x1xf32> to vector<8x1x1xf32>
    %cst_91 = arith.constant 2.500000e-01 : f32
    %290 = vector.broadcast %cst_91 : f32 to vector<8x1x1xf32>
    %291 = arith.mulf %289, %290 : vector<8x1x1xf32>
    %292 = vector.broadcast %291 : vector<8x1x1xf32> to vector<8x4x1xf32>
    %293 = arith.subf %286, %292 : vector<8x4x1xf32>
    %cst_92 = arith.constant dense<0.000000e+00> : vector<8x1xf32>
    %294 = vector.multi_reduction <add>, %287, %cst_92 [1] : vector<8x4x1xf32> to vector<8x1xf32>
    %295 = vector.shape_cast %294 : vector<8x1xf32> to vector<8x1x1xf32>
    %296 = arith.mulf %293, %293 : vector<8x4x1xf32>
    %cst_93 = arith.constant dense<0.000000e+00> : vector<8x1xf32>
    %297 = vector.multi_reduction <add>, %296, %cst_93 [1] : vector<8x4x1xf32> to vector<8x1xf32>
    %298 = vector.shape_cast %297 : vector<8x1xf32> to vector<8x1x1xf32>
    %cst_94 = arith.constant 2.560000e+02 : f32
    %299 = vector.broadcast %cst_94 : f32 to vector<8x1x1xf32>
    %300 = arith.mulf %299, %298 : vector<8x1x1xf32>
    %301 = arith.addf %295, %300 : vector<8x1x1xf32>
    %cst_95 = arith.constant 9.765625E-4 : f32
    %302 = vector.broadcast %cst_95 : f32 to vector<8x1x1xf32>
    %303 = arith.mulf %301, %302 : vector<8x1x1xf32>
    %cst_96 = arith.constant 0.000000e+00 : f32
    %304 = vector.broadcast %cst_96 : f32 to vector<8x1x1xf32>
    %305 = arith.maximumf %303, %304 : vector<8x1x1xf32>
    %cst_97 = arith.constant 9.99999974E-6 : f32
    %306 = vector.broadcast %cst_97 : f32 to vector<8x1x1xf32>
    %307 = arith.addf %305, %306 : vector<8x1x1xf32>
    %308 = math.rsqrt %307 : vector<8x1x1xf32>
    %309 = vector.shape_cast %291 : vector<8x1x1xf32> to vector<8x1x1xf32>
    %310 = vector.broadcast %309 : vector<8x1x1xf32> to vector<8x4x1xf32>
    %311 = vector.shape_cast %310 : vector<8x4x1xf32> to vector<32x1xf32>
    %312 = vector.shape_cast %308 : vector<8x1x1xf32> to vector<8x1x1xf32>
    %313 = vector.broadcast %312 : vector<8x1x1xf32> to vector<8x4x1xf32>
    %314 = vector.shape_cast %313 : vector<8x4x1xf32> to vector<32x1xf32>
    %cst_98 = arith.constant dense<0.000000e+00> : vector<256xf32>
    %315 = vector.multi_reduction <add>, %285, %cst_98 [0] : vector<32x256xf32> to vector<256xf32>
    %316 = vector.shape_cast %315 : vector<256xf32> to vector<1x256xf32>
    %317 = arith.mulf %285, %285 : vector<32x256xf32>
    %cst_99 = arith.constant dense<0.000000e+00> : vector<256xf32>
    %318 = vector.multi_reduction <add>, %317, %cst_99 [0] : vector<32x256xf32> to vector<256xf32>
    %319 = vector.shape_cast %318 : vector<256xf32> to vector<1x256xf32>
    %cst_100 = arith.constant 3.125000e-02 : f32
    %320 = vector.broadcast %cst_100 : f32 to vector<1x256xf32>
    %321 = arith.mulf %316, %320 : vector<1x256xf32>
    %cst_101 = arith.constant 3.125000e-02 : f32
    %322 = vector.broadcast %cst_101 : f32 to vector<1x256xf32>
    %323 = arith.mulf %319, %322 : vector<1x256xf32>
    %324 = arith.mulf %321, %321 : vector<1x256xf32>
    %325 = arith.subf %323, %324 : vector<1x256xf32>
    %cst_102 = arith.constant 0.000000e+00 : f32
    %326 = vector.broadcast %cst_102 : f32 to vector<1x256xf32>
    %327 = arith.maximumf %325, %326 : vector<1x256xf32>
    %cst_103 = arith.constant 9.99999974E-6 : f32
    %328 = vector.broadcast %cst_103 : f32 to vector<1x256xf32>
    %329 = arith.addf %327, %328 : vector<1x256xf32>
    %330 = math.rsqrt %329 : vector<1x256xf32>
    %331 = arith.mulf %3, %314 : vector<32x1xf32>
    %332 = arith.addf %79, %331 : vector<32x1xf32>
    %333 = arith.addf %82, %4 : vector<32x1xf32>
    %334 = arith.mulf %3, %311 : vector<32x1xf32>
    %335 = arith.mulf %334, %314 : vector<32x1xf32>
    %336 = arith.subf %333, %335 : vector<32x1xf32>
    %337 = vector.broadcast %332 : vector<32x1xf32> to vector<32x256xf32>
    %338 = arith.mulf %285, %337 : vector<32x256xf32>
    %339 = vector.broadcast %336 : vector<32x1xf32> to vector<32x256xf32>
    %340 = arith.addf %338, %339 : vector<32x256xf32>
    %341 = vector.broadcast %321 : vector<1x256xf32> to vector<32x256xf32>
    %342 = arith.subf %285, %341 : vector<32x256xf32>
    %343 = vector.broadcast %330 : vector<1x256xf32> to vector<32x256xf32>
    %344 = arith.mulf %342, %343 : vector<32x256xf32>
    %345 = vector.broadcast %5 : vector<32x1xf32> to vector<32x256xf32>
    %346 = arith.mulf %345, %344 : vector<32x256xf32>
    %347 = arith.addf %340, %346 : vector<32x256xf32>
    %c3_104 = arith.constant 3 : index
    %c0_105 = arith.constant 0 : index
    %c0_106 = arith.constant 0 : index
    %348 = vector.load %arg3[%c3_104, %c0_105, %c0_106] : memref<4x32x256xf32, #tpu.memory_space<vmem>>, vector<1x32x256xf32>
    %349 = vector.shape_cast %348 : vector<1x32x256xf32> to vector<32x256xf32>
    %350 = vector.shape_cast %347 : vector<32x256xf32> to vector<1x32x256xf32>
    tpu.vector_store %arg3[%c3_104, %c0_105, %c0_106], %350 {strides = array<i32>} : memref<4x32x256xf32, #tpu.memory_space<vmem>>, vector<1x32x256xf32>,
    return
  }
  func.func @transform_0(%arg0: i32) -> (i32, i32, i32) {
    %c0_i32 = arith.constant 0 : i32
    %c0_i32_0 = arith.constant 0 : i32
    %c0_i32_1 = arith.constant 0 : i32
    %c0_i32_2 = arith.constant 0 : i32
    return %c0_i32, %c0_i32_0, %c0_i32_1 : i32, i32, i32
  }
  func.func @transform_1(%arg0: i32) -> (i32, i32) {
    %c0_i32 = arith.constant 0 : i32
    %c0_i32_0 = arith.constant 0 : i32
    %c0_i32_1 = arith.constant 0 : i32
    return %c0_i32, %c0_i32_0 : i32, i32
  }
  func.func @transform_2(%arg0: i32) -> (i32, i32, i32) {
    %c0_i32 = arith.constant 0 : i32
    %c0_i32_0 = arith.constant 0 : i32
    %c0_i32_1 = arith.constant 0 : i32
    %c0_i32_2 = arith.constant 0 : i32
    return %c0_i32, %c0_i32_0, %c0_i32_1 : i32, i32, i32
  }
}

</mosaic_0001>

<bundles_post_ra>
// kernel: tpu_custom_call.1
= control target key start
LH: loop header
LB: loop body
LE: loop exit
PB: predicated region body
PF: predicated region fallthrough
CT: control target
= control target key end

     0   :  { %7 = vsyncpa [#allocation3], 0  ;;  %s4892_s0 = inlined_call_operand.hbm [shape: f32[4,32,256], index: 0, kind: input, shape index: {}]   ;;  %s4893_s1 = inlined_call_operand.vmem [shape: f32[32,8], index: 1, kind: input, shape index: {}]   ;;  %s4894_s2 = inlined_call_operand.hbm [shape: f32[4,32,256], index: 2, kind: output, shape index: {}]  }
   0x1   :  { %8 = vsyncpa [#allocation4], 0  ;;  %s3141_s9 = smov [#allocation2]   ;;  %s3093_s13 = scalar_lea.hbm %s4892_s0, 4096 }
   0x2   :  { %s14_s10 = sshll.u32 %s3141_s9, 4  ;;  %p3094_p0 = scmp.ne.s32.totalorder %s4892_s0, %s3093_s13  ;;  %s15_s10 = int_to_ptr.vmem [resolvable:$true] %s14_s10 }
   0x3   :  { %p3097_p1 = scmp.lt.u32.totalorder %s3093_s13, %s4892_s0 }
   0x5   :  { %p3099_p2 = pnand %p3097_p1, %p3094_p0 }
   0x7   :  { %3102 = shalt.err (!%p3099_p2)
}
   0x8   :  { %s3103_s18 = scalar_lea.vmem %s15_s10, 4096  ;;  %p3108_p4 = scmp.lt.s32.totalorder %s15_s10, %s15_s10 }
   0x9   :  { %p3104_p3 = scmp.ne.s32.totalorder %s15_s10, %s3103_s18  ;;  %p3109_p5 = scmp.lt.s32.totalorder %s3103_s18, %s3103_s18 }
   0xb   :  { %p3110_p6 = por %p3109_p5, %p3108_p4 }
   0xd   :  { %p3111_p7 = pnand %p3110_p6, %p3104_p3 }
   0xf   :  { %3114 = shalt.err (!%p3111_p7)
}
  0x10   :  { %s3142_s19 = smov 256   ;;  %s3143_s20 = smov 16  }
  0x11   :  { %20 = dma.hbm_to_vmem [thread:$0]  %s4892_s0, 4096, %s15_s10, [#allocation3], %s3142_s19, %s3142_s19, %s3143_s20  }
  0x12   :  { %3137 = dma.done.wait [#allocation3], 4096  }
  0x13   :  { %3138 = vsyncadd [#allocation3], 4294963200  ;;  %v3144_v0 = vmov 4   ;;  %v3184_v1 = vld [vmem:[#allocation2 + $0x20] sm:$0xff]  ;;  %v3186_v2 = vld [vmem:[#allocation2 + $0x28] sm:$0xff]  ;;  %s3145_s24 = smov 126   ;;  %v372_v55 = vlaneseq }
  0x14   :  { %2980 = vset.pattern.permute.xlu1 %v3144_v0  ;;  %2979 = vset.pattern.permute.xlu0 %v3144_v0  ;;  %v3188_v3 = vld [vmem:[#allocation2] sm:$0xff]  ;;  %v44_v4 = vadd.f32 %v3186_v2, %v3184_v1  ;;  %v3192_v5 = vld [vmem:[#allocation2 + $0x8] sm:$0xff]  ;;  %v3194_v6 = vld [vmem:[#allocation2 + $0x30] sm:$0xff]  ;;  %v3146_v53 = vmov 839922192   ;;  %vm501_vm0 = vcmask 1043456  }
  0x15   :  { %v3196_v7 = vld [vmem:[#allocation2 + $0x38] sm:$0xff]  ;;  %v38_v8 = vadd.f32 %v3192_v5, %v3188_v3  ;;  %v3200_v9 = vld [vmem:[#allocation2 + $0x10] sm:$0xff]  ;;  %v3212_v15 = vld [vmem:[#allocation2 + $0x40] sm:$0xff]  ;;  %v370_v54 = vunpack.c.l.s4 %v3146_v53  ;;  %v3147_v56 = vmov 1985246804   ;;  %v373_v62 = vshrl.u32 %v372_v55, 7 }
  0x16   :  { %v3202_v10 = vld [vmem:[#allocation2 + $0x18] sm:$0xff]  ;;  %45 = vadd.xlane.f32.xlu1 %v44_v4  ;;  %v47_v11 = vadd.f32 %v3196_v7, %v3194_v6  ;;  %v3208_v13 = vld [vmem:[#allocation2 + $0x50] sm:$0xff]  ;;  %v3214_v16 = vld [vmem:[#allocation2 + $0x48] sm:$0xff]  ;;  %v377_v57 = vunpack.c.l.s4 %v3147_v56  ;;  %s3148_s3 = smov 2   ;;  %s3149_s8 = smov 1  }
  0x17   :  { %39 = vadd.xlane.f32.xlu0 %v38_v8  ;;  %v41_v12 = vadd.f32 %v3202_v10, %v3200_v9  ;;  %v3210_v14 = vld [vmem:[#allocation2 + $0x58] sm:$0xff]  ;;  %v95_v18 = vadd.f32 %v3214_v16, %v3212_v15  ;;  %v3220_v19 = vld [vmem:[#allocation2 + $0x70] sm:$0xff]  ;;  %v3224_v21 = vld [vmem:[#allocation2 + $0x60] sm:$0xff]  ;;  %v371_v61 = vunpack.c.0.s8 %v370_v54  ;;  %s3153_s13 = smov [#allocation5]  }
  0x18   :  { %v98_v17 = vadd.f32 %v3210_v14, %v3208_v13  ;;  %v3222_v20 = vld [vmem:[#allocation2 + $0x78] sm:$0xff]  ;;  %v3226_v22 = vld [vmem:[#allocation2 + $0x68] sm:$0xff]  ;;  %v3232_v25 = vld [vmem:[#allocation2 + $0x90] sm:$0xff]  ;;  %v378_v0 = vunpack.c.0.s8 %v377_v57  ;;  %s2954_s14 = sshll.u32 %s3153_s13, 4  ;;  %s2955_s14 = int_to_ptr.vmem [resolvable:$true] %s2954_s14 }
  0x19   :  { %v104_v23 = vadd.f32 %v3222_v20, %v3220_v19  ;;  %v101_v24 = vadd.f32 %v3226_v22, %v3224_v21  ;;  %v3234_v26 = vld [vmem:[#allocation2 + $0x98] sm:$0xff]  ;;  %v3236_v27 = vld [vmem:[#allocation2 + $0x80] sm:$0xff]  ;;  %v3238_v28 = vld [vmem:[#allocation2 + $0x88] sm:$0xff]  ;;  %s3115_s15 = scalar_lea.vmem %s2955_s14, 4096  ;;  %p3120_p9 = scmp.lt.s32.totalorder %s2955_s14, %s2955_s14 }
  0x1a   :  { %48 = vadd.xlane.f32.xlu1 %v47_v11  ;;  %v167_v29 = vadd.f32 %v3234_v26, %v3232_v25  ;;  %v164_v30 = vadd.f32 %v3238_v28, %v3236_v27  ;;  %v3244_v31 = vld [vmem:[#allocation2 + $0xb0] sm:$0xff]  ;;  %v3246_v32 = vld [vmem:[#allocation2 + $0xb8] sm:$0xff]  ;;  %v3248_v33 = vld [vmem:[#allocation2 + $0xa0] sm:$0xff]  ;;  %p3116_p8 = scmp.ne.s32.totalorder %s2955_s14, %s3115_s15  ;;  %p3121_p10 = scmp.lt.s32.totalorder %s3115_s15, %s3115_s15 }
  0x1b   :  { %42 = vadd.xlane.f32.xlu0 %v41_v12  ;;  %v3250_v34 = vld [vmem:[#allocation2 + $0xa8] sm:$0xff]  ;;  %v173_v35 = vadd.f32 %v3246_v32, %v3244_v31  ;;  %v3256_v37 = vld [vmem:[#allocation2 + $0xd0] sm:$0xff]  ;;  %v3258_v38 = vld [vmem:[#allocation2 + $0xd8] sm:$0xff] }
  0x1c   :  { %v170_v36 = vadd.f32 %v3250_v34, %v3248_v33  ;;  %v3260_v39 = vld [vmem:[#allocation2 + $0xc0] sm:$0xff]  ;;  %v3262_v40 = vld [vmem:[#allocation2 + $0xc8] sm:$0xff]  ;;  %v236_v41 = vadd.f32 %v3258_v38, %v3256_v37  ;;  %v3268_v43 = vld [vmem:[#allocation2 + $0xf0] sm:$0xff]  ;;  %p3122_p11 = por %p3121_p10, %p3120_p9 }
  0x1d   :  { %v233_v42 = vadd.f32 %v3262_v40, %v3260_v39  ;;  %v3270_v44 = vld [vmem:[#allocation2 + $0xf8] sm:$0xff]  ;;  %v3272_v45 = vld [vmem:[#allocation2 + $0xe0] sm:$0xff]  ;;  %v3274_v46 = vld [vmem:[#allocation2 + $0xe8] sm:$0xff] }
  0x1e   :  { %99 = vadd.xlane.f32.xlu1 %v98_v17  ;;  %v242_v47 = vadd.f32 %v3270_v44, %v3268_v43  ;;  %v239_v48 = vadd.f32 %v3274_v46, %v3272_v45  ;;  %v27_v49 = vld [vmem:[%s4893_s1 + $0x8] sm:$0xff]  ;;  %v29_v50 = vld [vmem:[%s4893_s1 + $0x18] sm:$0xff]  ;;  %v26_v51 = vld [vmem:[%s4893_s1] sm:$0xff]  ;;  %p3123_p12 = pnand %p3122_p11, %p3116_p8 }
  0x1f   :  { %96 = vadd.xlane.f32.xlu0 %v95_v18  ;;  %v28_v52 = vld [vmem:[%s4893_s1 + $0x10] sm:$0xff] }
  0x22   :  { %105 = vadd.xlane.f32.xlu1 %v104_v23 }
  0x23   :  { %102 = vadd.xlane.f32.xlu0 %v101_v24 }
  0x26   :  { %168 = vadd.xlane.f32.xlu1 %v167_v29 }
  0x27   :  { %165 = vadd.xlane.f32.xlu0 %v164_v30  ;;  %v3310_v30 = vsub.s32 %v371_v61, %v373_v62 }
  0x2a   :  { %174 = vadd.xlane.f32.xlu1 %v173_v35 }
  0x2b   :  { %171 = vadd.xlane.f32.xlu0 %v170_v36 }
  0x2e   :  { %237 = vadd.xlane.f32.xlu1 %v236_v41  ;;  %v3314_v41 = vsub.s32 %v378_v0, %v373_v62 }
  0x2f   :  { %234 = vadd.xlane.f32.xlu0 %v233_v42 }
  0x32   :  { %243 = vadd.xlane.f32.xlu1 %v242_v47 }
  0x33   :  { %240 = vadd.xlane.f32.xlu0 %v239_v48 }
  0x43   :  { %854 = vrot.lane.b32.xlu1 %v27_v49, %s3145_s24 }
  0x47   :  { %858 = vrot.lane.b32.xlu1 %v29_v50, %s3145_s24 }
  0x49   :  { %852 = vrot.lane.b32.xlu0 %v26_v51, %s3145_s24 }
  0x4b   :  { %997 = vperm.xlu1 %2980, %v27_v49  }
  0x4d   :  { %856 = vrot.lane.b32.xlu0 %v28_v52, %s3145_s24 }
  0x4f   :  { %1001 = vperm.xlu1 %2980, %v28_v52  }
  0x51   :  { %993 = vperm.xlu0 %2979, %v26_v51  }
  0x55   :  { %1005 = vperm.xlu0 %2979, %v29_v50  }
  0xa3   :  { %v46_v58 = vpop.xlane.xlu1 %45 }
  0xa4   :  { %v3296_v59 = vmul.f32 0.00390625, %v46_v58  ;;  %v40_v60 = vpop.xlane.xlu0 %39 }
  0xa5   :  { %v3298_v63 = vmul.f32 0.00390625, %v40_v60 }
  0xa6   :  { %4969 = vst [vmem:[#allocation8_spill] sm:$0xff] %v3296_v59  ;;  %v58_v4 = vsub.f32 %v3184_v1, %v3296_v59  ;;  %v59_v8 = vsub.f32 %v3186_v2, %v3296_v59  ;;  %v3344_v60 = vrot.slane %v3296_v59, %v3310_v30 }
  0xa7   :  { %v49_v11 = vpop.xlane.xlu1 %48  ;;  %v54_v12 = vsub.f32 %v3188_v3, %v3298_v63  ;;  %v55_v17 = vsub.f32 %v3192_v5, %v3298_v63 }
  0xa8   :  { %v3308_v18 = vmul.f32 0.00390625, %v49_v11  ;;  %v43_v23 = vpop.xlane.xlu0 %42  ;;  %v66_v24 = vmul.f32 %v58_v4, %v58_v4  ;;  %v67_v29 = vmul.f32 %v59_v8, %v59_v8 }
  0xa9   :  { %v3312_v35 = vmul.f32 0.00390625, %v43_v23  ;;  %v62_v1 = vmul.f32 %v54_v12, %v54_v12  ;;  %v63_v36 = vmul.f32 %v55_v17, %v55_v17 }
  0xaa   :  { %4970 = vst [vmem:[#allocation9_spill] sm:$0xff] %v3308_v18  ;;  %v76_v2 = vadd.f32 %v67_v29, %v66_v24  ;;  %v60_v3 = vsub.f32 %v3194_v6, %v3308_v18  ;;  %v61_v5 = vsub.f32 %v3196_v7, %v3308_v18 }
  0xab   :  { %4971 = vst [vmem:[#allocation10_spill] sm:$0xff] %v3312_v35  ;;  %v100_v42 = vpop.xlane.xlu1 %99  ;;  %v70_v47 = vadd.f32 %v63_v36, %v62_v1  ;;  %v56_v48 = vsub.f32 %v3200_v9, %v3312_v35  ;;  %v57_v49 = vsub.f32 %v3202_v10, %v3312_v35  ;;  %v3326_v50 = vrot.slane %v3312_v35, %v3310_v30 }
  0xac   :  { %v3328_v51 = vmul.f32 0.00390625, %v100_v42  ;;  %v97_v52 = vpop.xlane.xlu0 %96  ;;  %v68_v6 = vmul.f32 %v60_v3, %v60_v3  ;;  %v69_v53 = vmul.f32 %v61_v5, %v61_v5  ;;  %v3332_v7 = vrot.slane %v3312_v35, %v3314_v41 }
  0xad   :  { %v3334_v54 = vmul.f32 0.00390625, %v97_v52  ;;  %71 = vadd.xlane.f32.xlu0 %v70_v47  ;;  %v64_v9 = vmul.f32 %v56_v48, %v56_v48  ;;  %v65_v55 = vmul.f32 %v57_v49, %v57_v49  ;;  %v516_v10 = vsel %vm501_vm0, %v3326_v50, 0.0 }
  0xae   :  { %4972 = vst [vmem:[#allocation11_spill] sm:$0xff] %v3328_v51  ;;  %v79_v56 = vadd.f32 %v69_v53, %v68_v6  ;;  %v113_v57 = vsub.f32 %v3208_v13, %v3328_v51  ;;  %v114_v58 = vsub.f32 %v3210_v14, %v3328_v51  ;;  %v517_v8 = vrot.slane %v516_v10, 4 }
  0xaf   :  { %v106_v61 = vpop.xlane.xlu1 %105  ;;  %v73_v62 = vadd.f32 %v65_v55, %v64_v9  ;;  %v111_v0 = vsub.f32 %v3212_v15, %v3334_v54  ;;  %v112_v4 = vsub.f32 %v3214_v16, %v3334_v54  ;;  %v523_v14 = vsel %vm501_vm0, %v3332_v7, 0.0 }
  0xb0   :  { %v3350_v11 = vmul.f32 0.00390625, %v106_v61  ;;  %v103_v12 = vpop.xlane.xlu0 %102  ;;  %v121_v13 = vmul.f32 %v113_v57, %v113_v57  ;;  %v122_v17 = vmul.f32 %v114_v58, %v114_v58  ;;  %v518_v1 = vadd.f32 %v517_v8, %v516_v10 }
  0xb1   :  { %v3354_v23 = vmul.f32 0.00390625, %v103_v12  ;;  %74 = vadd.xlane.f32.xlu1 %v73_v62  ;;  %77 = vadd.xlane.f32.xlu0 %v76_v2  ;;  %v119_v24 = vmul.f32 %v111_v0, %v111_v0  ;;  %v120_v29 = vmul.f32 %v112_v4, %v112_v4  ;;  %v3362_v3 = vrot.slane %v3298_v63, %v3310_v30 }
  0xb2   :  { %4973 = vst [vmem:[#allocation12_spill] sm:$0xff] %v3350_v11  ;;  %v130_v15 = vadd.f32 %v122_v17, %v121_v13  ;;  %v117_v16 = vsub.f32 %v3220_v19, %v3350_v11  ;;  %v118_v36 = vsub.f32 %v3222_v20, %v3350_v11  ;;  %v519_v48 = vrot.slane %v518_v1, 2 }
  0xb3   :  { %4974 = vst [vmem:[#allocation13_spill] sm:$0xff] %v3354_v23  ;;  %v169_v5 = vpop.xlane.xlu1 %168  ;;  %v127_v42 = vadd.f32 %v120_v29, %v119_v24  ;;  %v115_v47 = vsub.f32 %v3224_v21, %v3354_v23  ;;  %v116_v2 = vsub.f32 %v3226_v22, %v3354_v23  ;;  %v524_v53 = vrot.slane %v523_v14, 4 }
  0xb4   :  { %v3368_v49 = vmul.f32 0.00390625, %v169_v5  ;;  %v166_v52 = vpop.xlane.xlu0 %165  ;;  %v125_v19 = vmul.f32 %v117_v16, %v117_v16  ;;  %v126_v6 = vmul.f32 %v118_v36, %v118_v36  ;;  %v520_v10 = vadd.f32 %v519_v48, %v518_v1 }
  0xb5   :  { %v3370_v20 = vmul.f32 0.00390625, %v166_v52  ;;  %80 = vadd.xlane.f32.xlu1 %v79_v56  ;;  %128 = vadd.xlane.f32.xlu0 %v127_v42  ;;  %v123_v9 = vmul.f32 %v115_v47, %v115_v47  ;;  %v124_v55 = vmul.f32 %v116_v2, %v116_v2  ;;  %v525_v58 = vadd.f32 %v524_v53, %v523_v14 }
  0xb6   :  { %4975 = vst [vmem:[#allocation14_spill] sm:$0xff] %v3368_v49  ;;  %v136_v57 = vadd.f32 %v126_v6, %v125_v19  ;;  %v182_v21 = vsub.f32 %v3232_v25, %v3368_v49  ;;  %v183_v22 = vsub.f32 %v3234_v26, %v3368_v49  ;;  %v521_v4 = vrot.slane %v520_v10, 1 }
  0xb7   :  { %4976 = vst [vmem:[#allocation15_spill] sm:$0xff] %v3370_v20  ;;  %v175_v61 = vpop.xlane.xlu1 %174  ;;  %v133_v62 = vadd.f32 %v124_v55, %v123_v9  ;;  %v180_v0 = vsub.f32 %v3236_v27, %v3370_v20  ;;  %v181_v56 = vsub.f32 %v3238_v28, %v3370_v20  ;;  %v526_v24 = vrot.slane %v525_v58, 2 }
  0xb8   :  { %v3380_v8 = vmul.f32 0.00390625, %v175_v61  ;;  %v172_v12 = vpop.xlane.xlu0 %171  ;;  %v190_v13 = vmul.f32 %v182_v21, %v182_v21  ;;  %v191_v17 = vmul.f32 %v183_v22, %v183_v22  ;;  %v522_v29 = vadd.f32 %v521_v4, %v520_v10 }
  0xb9   :  { %v3382_v25 = vmul.f32 0.00390625, %v172_v12  ;;  %131 = vadd.xlane.f32.xlu1 %v130_v15  ;;  %134 = vadd.xlane.f32.xlu0 %v133_v62  ;;  %v188_v26 = vmul.f32 %v180_v0, %v180_v0  ;;  %v189_v14 = vmul.f32 %v181_v56, %v181_v56  ;;  %v527_v16 = vadd.f32 %v526_v24, %v525_v58 }
  0xba   :  { %4977 = vst [vmem:[#allocation16_spill] sm:$0xff] %v3380_v8  ;;  %v199_v1 = vadd.f32 %v191_v17, %v190_v13  ;;  %v186_v27 = vsub.f32 %v3244_v31, %v3380_v8  ;;  %v187_v28 = vsub.f32 %v3246_v32, %v3380_v8  ;;  %v3392_v47 = vmul.f32 0.25, %v522_v29 }
  0xbb   :  { %4978 = vst [vmem:[#allocation17_spill] sm:$0xff] %v3382_v25  ;;  %v238_v36 = vpop.xlane.xlu1 %237  ;;  %v196_v5 = vadd.f32 %v189_v14, %v188_v26  ;;  %v184_v42 = vsub.f32 %v3248_v33, %v3382_v25  ;;  %v185_v15 = vsub.f32 %v3250_v34, %v3382_v25  ;;  %v528_v31 = vrot.slane %v527_v16, 1 }
  0xbc   :  { %v3394_v2 = vmul.f32 0.00390625, %v238_v36  ;;  %v235_v48 = vpop.xlane.xlu0 %234  ;;  %v194_v52 = vmul.f32 %v186_v27, %v186_v27  ;;  %v195_v19 = vmul.f32 %v187_v28, %v187_v28  ;;  %v568_v33 = vsub.f32 %v3326_v50, %v3392_v47 }
  0xbd   :  { %v3396_v6 = vmul.f32 0.00390625, %v235_v48  ;;  %137 = vadd.xlane.f32.xlu1 %v136_v57  ;;  %197 = vadd.xlane.f32.xlu0 %v196_v5  ;;  %v192_v32 = vmul.f32 %v184_v42, %v184_v42  ;;  %v193_v53 = vmul.f32 %v185_v15, %v185_v15  ;;  %v529_v55 = vadd.f32 %v528_v31, %v527_v16 }
  0xbe   :  { %4979 = vst [vmem:[#allocation18_spill] sm:$0xff] %v3394_v2  ;;  %v251_v34 = vsub.f32 %v3256_v37, %v3394_v2  ;;  %v252_v9 = vsub.f32 %v3258_v38, %v3394_v2  ;;  %v3406_v10 = vrot.slane %v3298_v63, %v3314_v41  ;;  %v502_v50 = vsel %vm501_vm0, %v3362_v3, 0.0 }
  0xbf   :  { %4980 = vst [vmem:[#allocation19_spill] sm:$0xff] %v3396_v6  ;;  %v244_v21 = vpop.xlane.xlu1 %243  ;;  %v202_v22 = vadd.f32 %v193_v53, %v192_v32  ;;  %v249_v57 = vsub.f32 %v3260_v39, %v3396_v6  ;;  %v250_v58 = vsub.f32 %v3262_v40, %v3396_v6  ;;  %v3416_v0 = vmul.f32 0.25, %v529_v55 }
  0xc0   :  { %v3414_v37 = vmul.f32 0.00390625, %v244_v21  ;;  %v241_v61 = vpop.xlane.xlu0 %240  ;;  %v259_v38 = vmul.f32 %v251_v34, %v251_v34  ;;  %v260_v62 = vmul.f32 %v252_v9, %v252_v9  ;;  %v205_v4 = vadd.f32 %v195_v19, %v194_v52 }
  0xc1   :  { %v3418_v56 = vmul.f32 0.00390625, %v241_v61  ;;  %200 = vadd.xlane.f32.xlu1 %v199_v1  ;;  %203 = vadd.xlane.f32.xlu0 %v202_v22  ;;  %v257_v12 = vmul.f32 %v249_v57, %v249_v57  ;;  %v258_v39 = vmul.f32 %v250_v58, %v250_v58  ;;  %v569_v17 = vsub.f32 %v3332_v7, %v3416_v0 }
  0xc2   :  { %4981 = vst [vmem:[#allocation20_spill] sm:$0xff] %v3414_v37  ;;  %v255_v40 = vsub.f32 %v3268_v43, %v3414_v37  ;;  %v256_v13 = vsub.f32 %v3270_v44, %v3414_v37  ;;  %v503_v24 = vrot.slane %v502_v50, 4  ;;  %v268_v1 = vadd.f32 %v260_v62, %v259_v38 }
  0xc3   :  { %4982 = vst [vmem:[#allocation21_spill] sm:$0xff] %v3418_v56  ;;  %v265_v26 = vadd.f32 %v258_v39, %v257_v12  ;;  %v253_v14 = vsub.f32 %v3272_v45, %v3418_v56  ;;  %v254_v29 = vsub.f32 %v3274_v46, %v3418_v56  ;;  %v3432_v28 = vrot.slane %v3296_v59, %v3314_v41 }
  0xc4   :  { %v263_v27 = vmul.f32 %v255_v40, %v255_v40  ;;  %v530_v43 = vsel %vm501_vm0, %v3344_v60, 0.0  ;;  %v264_v16 = vmul.f32 %v256_v13, %v256_v13  ;;  %v509_v45 = vsel %vm501_vm0, %v3406_v10, 0.0 }
  0xc5   :  { %206 = vadd.xlane.f32.xlu1 %v205_v4  ;;  %266 = vadd.xlane.f32.xlu0 %v265_v26  ;;  %v261_v44 = vmul.f32 %v253_v14, %v253_v14  ;;  %v262_v7 = vmul.f32 %v254_v29, %v254_v29  ;;  %v504_v36 = vadd.f32 %v503_v24, %v502_v50  ;;  %v510_v5 = vrot.slane %v509_v45, 4 }
  0xc6   :  { %v3440_v42 = vrot.slane %v3308_v18, %v3310_v30  ;;  %v3444_v52 = vrot.slane %v3308_v18, %v3314_v41  ;;  %v531_v19 = vrot.slane %v530_v43, 4  ;;  %v274_v31 = vadd.f32 %v264_v16, %v263_v27 }
  0xc7   :  { %v271_v46 = vadd.f32 %v262_v7, %v261_v44  ;;  %v505_v15 = vrot.slane %v504_v36, 2  ;;  %v511_v48 = vadd.f32 %v510_v5, %v509_v45  ;;  %v632_v32 = vmul.f32 %v568_v33, %v568_v33 }
  0xc8   :  { %v544_v53 = vsel %vm501_vm0, %v3440_v42, 0.0  ;;  %v537_v34 = vsel %vm501_vm0, %v3432_v28, 0.0  ;;  %v551_v22 = vsel %vm501_vm0, %v3444_v52, 0.0  ;;  %v532_v58 = vadd.f32 %v531_v19, %v530_v43 }
  0xc9   :  { %269 = vadd.xlane.f32.xlu1 %v268_v1  ;;  %272 = vadd.xlane.f32.xlu0 %v271_v46  ;;  %v506_v9 = vadd.f32 %v505_v15, %v504_v36  ;;  %v512_v55 = vrot.slane %v511_v48, 2  ;;  %v545_v21 = vrot.slane %v544_v53, 4  ;;  %v552_v57 = vrot.slane %v551_v22, 4 }
  0xca   :  { %v538_v62 = vrot.slane %v537_v34, 4  ;;  %v652_v33 = vsel %vm501_vm0, %v632_v32, 0.0  ;;  %v533_v12 = vrot.slane %v532_v58, 2  ;;  %v633_v26 = vmul.f32 %v569_v17, %v569_v17 }
  0xcb   :  { %v507_v50 = vrot.slane %v506_v9, 1  ;;  %v513_v61 = vadd.f32 %v512_v55, %v511_v48  ;;  %v546_v38 = vadd.f32 %v545_v21, %v544_v53  ;;  %v553_v4 = vadd.f32 %v552_v57, %v551_v22 }
  0xcc   :  { %v539_v24 = vadd.f32 %v538_v62, %v537_v34  ;;  %v534_v29 = vadd.f32 %v533_v12, %v532_v58  ;;  %v653_v7 = vrot.slane %v652_v33, 4  ;;  %v3455_v36 = vrot.slane %v3334_v54, %v3310_v30 }
  0xcd   :  { %275 = vadd.xlane.f32.xlu1 %v274_v31  ;;  %v508_v39 = vadd.f32 %v507_v50, %v506_v9  ;;  %v514_v40 = vrot.slane %v513_v61, 1  ;;  %v547_v13 = vrot.slane %v546_v38, 2  ;;  %v554_v14 = vrot.slane %v553_v4, 2 }
  0xce   :  { %v540_v43 = vrot.slane %v539_v24, 2  ;;  %v535_v45 = vrot.slane %v534_v29, 1  ;;  %v659_v17 = vsel %vm501_vm0, %v633_v26, 0.0  ;;  %v3462_v9 = vrot.slane %v3334_v54, %v3314_v41 }
  0xcf   :  { %v515_v1 = vadd.f32 %v514_v40, %v513_v61  ;;  %v558_v27 = vmul.f32 0.25, %v508_v39  ;;  %v548_v44 = vadd.f32 %v547_v13, %v546_v38  ;;  %v555_v16 = vadd.f32 %v554_v14, %v553_v4 }
  0xd0   :  { %v541_v48 = vadd.f32 %v540_v43, %v539_v24  ;;  %v536_v31 = vadd.f32 %v535_v45, %v534_v29  ;;  %v654_v57 = vadd.f32 %v653_v7, %v652_v33  ;;  %v660_v12 = vrot.slane %v659_v17, 4 }
  0xd1   :  { %v559_v5 = vmul.f32 0.25, %v515_v1  ;;  %v566_v46 = vsub.f32 %v3362_v3, %v558_v27  ;;  %v549_v15 = vrot.slane %v548_v44, 1  ;;  %v556_v19 = vrot.slane %v555_v16, 1 }
  0xd2   :  { %v542_v21 = vrot.slane %v541_v48, 1  ;;  %v562_v22 = vmul.f32 0.25, %v536_v31  ;;  %v1176_v3 = vsel %vm501_vm0, %v3455_v36, 0.0  ;;  %v1183_v13 = vsel %vm501_vm0, %v3462_v9, 0.0 }
  0xd3   :  { %v567_v32 = vsub.f32 %v3406_v10, %v559_v5  ;;  %v630_v53 = vmul.f32 %v566_v46, %v566_v46  ;;  %v550_v34 = vadd.f32 %v549_v15, %v548_v44  ;;  %v557_v55 = vadd.f32 %v556_v19, %v555_v16 }
  0xd4   :  { %v1177_v61 = vrot.slane %v1176_v3, 4  ;;  %v543_v10 = vadd.f32 %v542_v21, %v541_v48  ;;  %v570_v4 = vsub.f32 %v3344_v60, %v562_v22  ;;  %v655_v29 = vrot.slane %v654_v57, 2 }
  0xd5   :  { %v638_v58 = vsel %vm501_vm0, %v630_v53, 0.0  ;;  %v564_v50 = vmul.f32 0.25, %v550_v34  ;;  %v631_v38 = vmul.f32 %v567_v32, %v567_v32  ;;  %v565_v62 = vmul.f32 0.25, %v557_v55 }
  0xd6   :  { %v1178_v40 = vadd.f32 %v1177_v61, %v1176_v3  ;;  %v639_v24 = vrot.slane %v638_v58, 4  ;;  %v563_v33 = vmul.f32 0.25, %v543_v10  ;;  %v1184_v44 = vrot.slane %v1183_v13, 4 }
  0xd7   :  { %v572_v39 = vsub.f32 %v3440_v42, %v564_v50  ;;  %v573_v26 = vsub.f32 %v3444_v52, %v565_v62  ;;  %v645_v1 = vsel %vm501_vm0, %v631_v38, 0.0  ;;  %v661_v43 = vadd.f32 %v660_v12, %v659_v17 }
  0xd8   :  { %v1179_v14 = vrot.slane %v1178_v40, 2  ;;  %v877_v60 = vcombine.low %v3392_v47, %v3416_v0  ;;  %v571_v7 = vsub.f32 %v3432_v28, %v563_v33  ;;  %v640_v42 = vadd.f32 %v639_v24, %v638_v58 }
  0xd9   :  { %v876_v16 = vcombine.low %v558_v27, %v559_v5  ;;  %v646_v45 = vrot.slane %v645_v1, 4  ;;  %v656_v52 = vadd.f32 %v655_v29, %v654_v57  ;;  %v1185_v15 = vadd.f32 %v1184_v44, %v1183_v13 }
  0xda   :  { %v1180_v46 = vadd.f32 %v1179_v14, %v1178_v40  ;;  %v662_v48 = vrot.slane %v661_v43, 2  ;;  %v636_v19 = vmul.f32 %v572_v39, %v572_v39  ;;  %v879_v31 = vcombine.low %v564_v50, %v565_v62 }
  0xdb   :  { %v641_v32 = vrot.slane %v640_v42, 2  ;;  %v634_v53 = vmul.f32 %v570_v4, %v570_v4  ;;  %v878_v47 = vcombine.low %v562_v22, %v563_v33  ;;  %v647_v0 = vadd.f32 %v646_v45, %v645_v1 }
  0xdc   :  { %v1181_v17 = vrot.slane %v1180_v46, 1  ;;  %v637_v28 = vmul.f32 %v573_v26, %v573_v26  ;;  %v1186_v5 = vrot.slane %v1185_v15, 2  ;;  %v657_v34 = vrot.slane %v656_v52, 1 }
  0xdd   :  { %v3480_v55 = vadd.f32 %v662_v48, %v661_v43  ;;  %v680_v21 = vsel %vm501_vm0, %v636_v19, 0.0  ;;  %v3483_v58 = vadd.f32 %v641_v32, %v640_v42  ;;  %v666_v50 = vsel %vm501_vm0, %v634_v53, 0.0 }
  0xde   :  { %882 = vrot.lane.b32.xlu1 %v877_v60, %s3148_s3  ;;  %v1182_v27 = vadd.f32 %v1181_v17, %v1180_v46  ;;  %v1187_v3 = vadd.f32 %v1186_v5, %v1185_v15  ;;  %v3488_v22 = vrot.slane %v3328_v51, %v3310_v30  ;;  %v648_v61 = vrot.slane %v647_v0, 2 }
  0xdf   :  { %880 = vrot.lane.b32.xlu0 %v876_v16, %s3148_s3  ;;  %v687_v38 = vsel %vm501_vm0, %v637_v28, 0.0  ;;  %v3494_v4 = vadd.f32 %v3328_v51, %v3312_v35  ;;  %v681_v12 = vrot.slane %v680_v21, 4  ;;  %v3498_v39 = vrot.slane %v3328_v51, %v3314_v41 }
  0xe0   :  { %v1232_v57 = vmul.f32 0.25, %v1182_v27  ;;  %v1188_v62 = vrot.slane %v1187_v3, 1  ;;  %v1190_v40 = vsel %vm501_vm0, %v3488_v22, 0.0  ;;  %v3504_v13 = vadd.f32 %v3350_v11, %v3308_v18 }
  0xe1   :  { %4983 = vst [vmem:[#allocation22_spill] sm:$0xff] %v3494_v4  ;;  %v3506_v24 = vadd.f32 %v657_v34, %v656_v52  ;;  %v688_v33 = vrot.slane %v687_v38, 4  ;;  %v667_v14 = vrot.slane %v666_v50, 4  ;;  %v1191_v29 = vrot.slane %v1190_v40, 4 }
  0xe2   :  { %886 = vrot.lane.b32.xlu1 %v879_v31, %s3148_s3  ;;  %v1240_v10 = vsub.f32 %v3455_v36, %v1232_v57  ;;  %4984 = vst [vmem:[#allocation23_spill] sm:$0xff] %v3504_v13  ;;  %v1189_v26 = vadd.f32 %v1188_v62, %v1187_v3  ;;  %v1197_v1 = vsel %vm501_vm0, %v3498_v39, 0.0  ;;  %v3512_v43 = vadd.f32 %v648_v61, %v647_v0 }
  0xe3   :  { %884 = vrot.lane.b32.xlu0 %v878_v47, %s3148_s3  ;;  %v635_v60 = vmul.f32 %v571_v7, %v571_v7  ;;  %v682_v16 = vadd.f32 %v681_v12, %v680_v21  ;;  %v1192_v46 = vadd.f32 %v1191_v29, %v1190_v40  ;;  %v1198_v52 = vrot.slane %v1197_v1, 4 }
  0xe4   :  { %v1233_v42 = vmul.f32 0.25, %v1189_v26  ;;  %v1304_v45 = vmul.f32 %v1240_v10, %v1240_v10  ;;  %v3517_v19 = vrot.slane %v3354_v23, %v3310_v30  ;;  %v3521_v31 = vrot.slane %v3354_v23, %v3314_v41 }
  0xe5   :  { %v689_v17 = vadd.f32 %v688_v33, %v687_v38  ;;  %v668_v32 = vadd.f32 %v667_v14, %v666_v50  ;;  %v1193_v53 = vrot.slane %v1192_v46, 2  ;;  %v1199_v7 = vadd.f32 %v1198_v52, %v1197_v1 }
  0xe6   :  { %v1241_v15 = vsub.f32 %v3462_v9, %v1233_v42  ;;  %v1530_v48 = vcombine.low %v1232_v57, %v1233_v42  ;;  %v673_v47 = vsel %vm501_vm0, %v635_v60, 0.0  ;;  %v1204_v9 = vsel %vm501_vm0, %v3517_v19, 0.0 }
  0xe7   :  { %v1211_v0 = vsel %vm501_vm0, %v3521_v31, 0.0  ;;  %v3531_v28 = vrot.slane %v3350_v11, %v3310_v30  ;;  %v683_v27 = vrot.slane %v682_v16, 2  ;;  %v1194_v5 = vadd.f32 %v1193_v53, %v1192_v46 }
  0xe8   :  { %1534 = vrot.lane.b32.xlu1 %v1530_v48, %s3148_s3  ;;  %v1200_v34 = vrot.slane %v1199_v7, 2  ;;  %v1205_v21 = vrot.slane %v1204_v9, 4  ;;  %v1312_v3 = vsel %vm501_vm0, %v1304_v45, 0.0  ;;  %v1212_v57 = vrot.slane %v1211_v0, 4 }
  0xe9   :  { %v3536_v50 = vrot.slane %v3350_v11, %v3314_v41  ;;  %v1218_v61 = vsel %vm501_vm0, %v3531_v28, 0.0  ;;  %v690_v38 = vrot.slane %v689_v17, 2  ;;  %v674_v62 = vrot.slane %v673_v47, 4 }
  0xea   :  { %v1195_v10 = vrot.slane %v1194_v5, 1  ;;  %v1201_v12 = vadd.f32 %v1200_v34, %v1199_v7  ;;  %v1206_v40 = vadd.f32 %v1205_v21, %v1204_v9  ;;  %v1213_v26 = vadd.f32 %v1212_v57, %v1211_v0 }
  0xeb   :  { %v1219_v33 = vrot.slane %v1218_v61, 4  ;;  %v1225_v14 = vsel %vm501_vm0, %v3536_v50, 0.0  ;;  %v669_v29 = vrot.slane %v668_v32, 2  ;;  %v1313_v1 = vrot.slane %v1312_v3, 4 }
  0xec   :  { %v1196_v60 = vadd.f32 %v1195_v10, %v1194_v5  ;;  %v1202_v42 = vrot.slane %v1201_v12, 1  ;;  %v1207_v45 = vrot.slane %v1206_v40, 2  ;;  %v1214_v46 = vrot.slane %v1213_v26, 2 }
  0xed   :  { %v1220_v52 = vadd.f32 %v1219_v33, %v1218_v61  ;;  %v1226_v48 = vrot.slane %v1225_v14, 4  ;;  %v684_v53 = vadd.f32 %v683_v27, %v682_v16  ;;  %v675_v44 = vadd.f32 %v674_v62, %v673_v47 }
  0xee   :  { %v1203_v36 = vadd.f32 %v1202_v42, %v1201_v12  ;;  %v1234_v18 = vmul.f32 0.25, %v1196_v60  ;;  %v1208_v13 = vadd.f32 %v1207_v45, %v1206_v40  ;;  %v1215_v7 = vadd.f32 %v1214_v46, %v1213_v26 }
  0xef   :  { %v1221_v9 = vrot.slane %v1220_v52, 2  ;;  %v1227_v0 = vadd.f32 %v1226_v48, %v1225_v14  ;;  %v691_v34 = vadd.f32 %v690_v38, %v689_v17  ;;  %v1314_v21 = vadd.f32 %v1313_v1, %v1312_v3 }
  0xf0   :  { %v1235_v57 = vmul.f32 0.25, %v1203_v36  ;;  %v1242_v11 = vsub.f32 %v3488_v22, %v1234_v18  ;;  %v1209_v23 = vrot.slane %v1208_v13, 1  ;;  %v1216_v5 = vrot.slane %v1215_v7, 1 }
  0xf1   :  { %v1222_v10 = vadd.f32 %v1221_v9, %v1220_v52  ;;  %v1228_v59 = vrot.slane %v1227_v0, 2  ;;  %v1305_v35 = vmul.f32 %v1241_v15, %v1241_v15  ;;  %v650_v26 = vrot.slane %v3512_v43, 1 }
  0xf2   :  { %v1243_v61 = vsub.f32 %v3498_v39, %v1235_v57  ;;  %v1306_v16 = vmul.f32 %v1242_v11, %v1242_v11  ;;  %v1531_v47 = vcombine.low %v1234_v18, %v1235_v57  ;;  %v1210_v27 = vadd.f32 %v1209_v23, %v1208_v13 }
  0xf3   :  { %v1217_v62 = vadd.f32 %v1216_v5, %v1215_v7  ;;  %v1223_v12 = vrot.slane %v1222_v10, 1  ;;  %v1229_v40 = vadd.f32 %v1228_v59, %v1227_v0  ;;  %v670_v17 = vadd.f32 %v669_v29, %v668_v32 }
  0xf4   :  { %v676_v3 = vrot.slane %v675_v44, 2  ;;  %1536 = vrot.lane.b32.xlu0 %v1531_v47, %s3148_s3  ;;  %v3548_v22 = vrot.slane %v3370_v20, %v3310_v30  ;;  %v1315_v36 = vrot.slane %v1314_v21, 2  ;;  %v1236_v15 = vmul.f32 0.25, %v1210_v27 }
  0xf5   :  { %v1237_v38 = vmul.f32 0.25, %v1217_v62  ;;  %v1224_v39 = vadd.f32 %v1223_v12, %v1222_v10  ;;  %v685_v11 = vrot.slane %v684_v53, 1  ;;  %v692_v18 = vrot.slane %v691_v34, 1 }
  0xf6   :  { %v1319_v23 = vsel %vm501_vm0, %v1305_v35, 0.0  ;;  %v1230_v13 = vrot.slane %v1229_v40, 1  ;;  %v1307_v59 = vmul.f32 %v1243_v61, %v1243_v61  ;;  %v1326_v33 = vsel %vm501_vm0, %v1306_v16, 0.0 }
  0xf7   :  { %v1244_v32 = vsub.f32 %v3517_v19, %v1236_v15  ;;  %v1245_v14 = vsub.f32 %v3521_v31, %v1237_v38  ;;  %v1532_v29 = vcombine.low %v1236_v15, %v1237_v38  ;;  %v1238_v60 = vmul.f32 0.25, %v1224_v39 }
  0xf8   :  { %v1231_v1 = vadd.f32 %v1230_v13, %v1229_v40  ;;  %v1815_v42 = vsel %vm501_vm0, %v3548_v22, 0.0  ;;  %v4985_v45 = vrot.slane %v3480_v55, 1  ;;  %v677_v52 = vadd.f32 %v676_v3, %v675_v44 }
  0xf9   :  { %v1316_v35 = vadd.f32 %v1315_v36, %v1314_v21  ;;  %v3561_v48 = vrot.slane %v3370_v20, %v3314_v41  ;;  %v1320_v7 = vrot.slane %v1319_v23, 4  ;;  %1538 = vrot.lane.b32.xlu1 %v1532_v29, %s3148_s3  ;;  %v1246_v31 = vsub.f32 %v3531_v28, %v1238_v60 }
  0xfa   :  { %v665_v46 = vadd.f32 %v4985_v45, %v3480_v55  ;;  %v1239_v19 = vmul.f32 0.25, %v1231_v1  ;;  %v1816_v9 = vrot.slane %v1815_v42, 4  ;;  %v4986_v0 = vrot.slane %v3483_v58, 1 }
  0xfb   :  { %v651_v5 = vadd.f32 %v650_v26, %v3512_v43  ;;  %v671_v55 = vrot.slane %v670_v17, 1  ;;  %v1327_v44 = vrot.slane %v1326_v33, 4  ;;  %v686_v21 = vadd.f32 %v685_v11, %v684_v53 }
  0xfc   :  { %v644_v57 = vadd.f32 %v4986_v0, %v3483_v58  ;;  %v693_v10 = vadd.f32 %v692_v18, %v691_v34  ;;  %v1333_v61 = vsel %vm501_vm0, %v1307_v59, 0.0  ;;  %v1247_v16 = vsub.f32 %v3536_v50, %v1239_v19 }
  0xfd   :  { %v678_v47 = vrot.slane %v677_v52, 1  ;;  %v1533_v27 = vcombine.low %v1238_v60, %v1239_v19  ;;  %v1817_v62 = vadd.f32 %v1816_v9, %v1815_v42  ;;  %v1822_v28 = vsel %vm501_vm0, %v3561_v48, 0.0 }
  0xfe   :  { %v3574_v12 = vmul.f32 256.0, %v3506_v24  ;;  %v3576_v58 = vmul.f32 256.0, %v665_v46  ;;  %v1317_v43 = vrot.slane %v1316_v35, 1  ;;  %v1321_v40 = vadd.f32 %v1320_v7, %v1319_v23 }
  0xff   :  { %v672_v26 = vadd.f32 %v671_v55, %v670_v17  ;;  %v1328_v53 = vadd.f32 %v1327_v44, %v1326_v33  ;;  %v1334_v34 = vrot.slane %v1333_v61, 4  ;;  %1540 = vrot.lane.b32.xlu0 %v1533_v27, %s3148_s3  ;;  %v1818_v3 = vrot.slane %v1817_v62, 2 }
 0x100   :  { %v3579_v50 = vmul.f32 256.0, %v644_v57  ;;  %v1308_v36 = vmul.f32 %v1244_v32, %v1244_v32  ;;  %v1309_v15 = vmul.f32 %v1245_v14, %v1245_v14  ;;  %v1823_v38 = vrot.slane %v1822_v28, 4 }
 0x101   :  { %v3581_v39 = vmul.f32 256.0, %v651_v5  ;;  %v3583_v11 = vmul.f32 256.0, %v686_v21  ;;  %v3585_v24 = vmul.f32 256.0, %v693_v10  ;;  %v679_v18 = vadd.f32 %v678_v47, %v677_v52 }
 0x102   :  { %v1318_v13 = vadd.f32 %v1317_v43, %v1316_v35  ;;  %v1322_v23 = vrot.slane %v1321_v40, 2  ;;  %v1819_v17 = vadd.f32 %v1818_v3, %v1817_v62  ;;  %v1824_v59 = vadd.f32 %v1823_v38, %v1822_v28 }
 0x103   :  { %v3587_v33 = vmul.f32 256.0, %v672_v26  ;;  %v1329_v29 = vrot.slane %v1328_v53, 2  ;;  %v3589_v1 = vadd.f32 %v1334_v34, %v1333_v61  ;;  %v3593_v32 = vrot.slane %v3368_v49, %v3310_v30 }
 0x104   :  { %v1340_v14 = vsel %vm501_vm0, %v1308_v36, 0.0  ;;  %v1347_v60 = vsel %vm501_vm0, %v1309_v15, 0.0  ;;  %v1820_v42 = vrot.slane %v1819_v17, 1  ;;  %v1825_v45 = vrot.slane %v1824_v59, 2 }
 0x105   :  { %v3597_v46 = vmul.f32 256.0, %v679_v18  ;;  %v1310_v52 = vmul.f32 %v1246_v31, %v1246_v31  ;;  %v3601_v35 = vrot.slane %v3368_v49, %v3314_v41  ;;  %v1829_v7 = vsel %vm501_vm0, %v3593_v32, 0.0 }
 0x106   :  { %v3605_v19 = vadd.f32 %v1322_v23, %v1321_v40  ;;  %v3607_v9 = vmul.f32 256.0, %v1318_v13  ;;  %v1821_v0 = vadd.f32 %v1820_v42, %v1819_v17  ;;  %v1826_v57 = vadd.f32 %v1825_v45, %v1824_v59 }
 0x107   :  { %v1341_v5 = vrot.slane %v1340_v14, 4  ;;  %v1348_v55 = vrot.slane %v1347_v60, 4  ;;  %v1830_v44 = vrot.slane %v1829_v7, 4  ;;  %v1836_v21 = vsel %vm501_vm0, %v3601_v35, 0.0 }
 0x108   :  { %v3611_v31 = vadd.f32 %v1329_v29, %v1328_v53  ;;  %v1827_v61 = vrot.slane %v1826_v57, 1  ;;  %v1871_v47 = vmul.f32 0.25, %v1821_v0  ;;  %v1311_v27 = vmul.f32 %v1247_v16, %v1247_v16 }
 0x109   :  { %v1354_v62 = vsel %vm501_vm0, %v1310_v52, 0.0  ;;  %v1831_v28 = vadd.f32 %v1830_v44, %v1829_v7  ;;  %v1837_v43 = vrot.slane %v1836_v21, 4  ;;  %v3618_v34 = vrot.slane %v3382_v25, %v3310_v30 }
 0x10a   :  { %v1828_v40 = vadd.f32 %v1827_v61, %v1826_v57  ;;  %v1879_v26 = vsub.f32 %v3548_v22, %v1871_v47  ;;  %v3622_v53 = vrot.slane %v3382_v25, %v3314_v41  ;;  %v1342_v3 = vadd.f32 %v1341_v5, %v1340_v14 }
 0x10b   :  { %v3624_v36 = vadd.f32 %v1348_v55, %v1347_v60  ;;  %v1832_v15 = vrot.slane %v1831_v28, 2  ;;  %v1838_v16 = vadd.f32 %v1837_v43, %v1836_v21  ;;  %v1843_v13 = vsel %vm501_vm0, %v3618_v34, 0.0 }
 0x10c   :  { %v1872_v38 = vmul.f32 0.25, %v1828_v40  ;;  %v1943_v18 = vmul.f32 %v1879_v26, %v1879_v26  ;;  %v1850_v22 = vsel %vm501_vm0, %v3622_v53, 0.0  ;;  %v1355_v23 = vrot.slane %v1354_v62, 4 }
 0x10d   :  { %v1833_v17 = vadd.f32 %v1832_v15, %v1831_v28  ;;  %v1839_v59 = vrot.slane %v1838_v16, 2  ;;  %v1844_v29 = vrot.slane %v1843_v13, 4  ;;  %v1361_v42 = vsel %vm501_vm0, %v1311_v27, 0.0 }
 0x10e   :  { %v1880_v14 = vsub.f32 %v3561_v48, %v1872_v38  ;;  %v2169_v60 = vcombine.low %v1871_v47, %v1872_v38  ;;  %v1851_v45 = vrot.slane %v1850_v22, 4  ;;  %v1951_v52 = vsel %vm501_vm0, %v1943_v18, 0.0 }
 0x10f   :  { %v1834_v7 = vrot.slane %v1833_v17, 1  ;;  %v1840_v0 = vadd.f32 %v1839_v59, %v1838_v16  ;;  %v1845_v57 = vadd.f32 %v1844_v29, %v1843_v13  ;;  %v3636_v44 = vrot.slane %v3380_v8, %v3310_v30 }
 0x110   :  { %v1944_v5 = vmul.f32 %v1880_v14, %v1880_v14  ;;  %2173 = vrot.lane.b32.xlu1 %v2169_v60, %s3148_s3  ;;  %v1852_v55 = vadd.f32 %v1851_v45, %v1850_v22  ;;  %v3640_v21 = vrot.slane %v3380_v8, %v3314_v41  ;;  %v1362_v48 = vrot.slane %v1361_v42, 4 }
 0x111   :  { %v1835_v61 = vadd.f32 %v1834_v7, %v1833_v17  ;;  %v1841_v47 = vrot.slane %v1840_v0, 1  ;;  %v1846_v27 = vrot.slane %v1845_v57, 2  ;;  %v1857_v40 = vsel %vm501_vm0, %v3636_v44, 0.0 }
 0x112   :  { %v1958_v28 = vsel %vm501_vm0, %v1944_v5, 0.0  ;;  %v1853_v43 = vrot.slane %v1852_v55, 2  ;;  %v1864_v26 = vsel %vm501_vm0, %v3640_v21, 0.0  ;;  %v1952_v15 = vrot.slane %v1951_v52, 4 }
 0x113   :  { %v1959_v16 = vrot.slane %v1958_v28, 4  ;;  %v1842_v38 = vadd.f32 %v1841_v47, %v1840_v0  ;;  %v1873_v18 = vmul.f32 0.25, %v1835_v61  ;;  %v1847_v13 = vadd.f32 %v1846_v27, %v1845_v57 }
 0x114   :  { %v1854_v22 = vadd.f32 %v1853_v43, %v1852_v55  ;;  %v1858_v59 = vrot.slane %v1857_v40, 4  ;;  %v1865_v29 = vrot.slane %v1864_v26, 4  ;;  %v1343_v17 = vrot.slane %v1342_v3, 2 }
 0x115   :  { %v1356_v14 = vadd.f32 %v1355_v23, %v1354_v62  ;;  %v1874_v60 = vmul.f32 0.25, %v1842_v38  ;;  %v1881_v45 = vsub.f32 %v3593_v32, %v1873_v18  ;;  %v1363_v7 = vadd.f32 %v1362_v48, %v1361_v42 }
 0x116   :  { %v1848_v5 = vrot.slane %v1847_v13, 1  ;;  %v1855_v10 = vrot.slane %v1854_v22, 1  ;;  %v1859_v8 = vadd.f32 %v1858_v59, %v1857_v40  ;;  %v1953_v25 = vadd.f32 %v1952_v15, %v1951_v52 }
 0x117   :  { %v1960_v49 = vadd.f32 %v1959_v16, %v1958_v28  ;;  %v1882_v4 = vsub.f32 %v3601_v35, %v1874_v60  ;;  %v1866_v51 = vadd.f32 %v1865_v29, %v1864_v26  ;;  %v2170_v0 = vcombine.low %v1873_v18, %v1874_v60 }
 0x118   :  { %v1849_v61 = vadd.f32 %v1848_v5, %v1847_v13  ;;  %v1856_v57 = vadd.f32 %v1855_v10, %v1854_v22  ;;  %v1860_v55 = vrot.slane %v1859_v8, 2  ;;  %v1324_v47 = vrot.slane %v3605_v19, 1 }
 0x119   :  { %v4987_v62 = vrot.slane %v3589_v1, 2  ;;  %v1350_v32 = vrot.slane %v3624_v36, 2  ;;  %v1945_v42 = vmul.f32 %v1881_v45, %v1881_v45  ;;  %v1344_v48 = vadd.f32 %v1343_v17, %v1342_v3  ;;  %2175 = vrot.lane.b32.xlu0 %v2170_v0, %s3148_s3 }
 0x11a   :  { %v1875_v52 = vmul.f32 0.25, %v1849_v61  ;;  %v1876_v27 = vmul.f32 0.25, %v1856_v57  ;;  %v1861_v35 = vadd.f32 %v1860_v55, %v1859_v8  ;;  %v1331_v28 = vrot.slane %v3611_v31, 1 }
 0x11b   :  { %v1337_v23 = vadd.f32 %v4987_v62, %v3589_v1  ;;  %v1357_v43 = vrot.slane %v1356_v14, 2  ;;  %v1364_v10 = vrot.slane %v1363_v7, 2  ;;  %v1867_v40 = vrot.slane %v1866_v51, 2 }
 0x11c   :  { %v1954_v26 = vrot.slane %v1953_v25, 2  ;;  %v1961_v15 = vrot.slane %v1960_v49, 2  ;;  %v1883_v16 = vsub.f32 %v3618_v34, %v1875_v52  ;;  %v3658_v1 = vsub.f32 %v3622_v53, %v1876_v27 }
 0x11d   :  { %v1965_v38 = vsel %vm501_vm0, %v1945_v42, 0.0  ;;  %v2171_v3 = vcombine.low %v1875_v52, %v1876_v27  ;;  %v1862_v18 = vrot.slane %v1861_v35, 1  ;;  %v1868_v13 = vadd.f32 %v1867_v40, %v1866_v51 }
 0x11e   :  { %v1325_v22 = vadd.f32 %v1324_v47, %v3605_v19  ;;  %v1338_v8 = vrot.slane %v1337_v23, 1  ;;  %v1345_v59 = vrot.slane %v1344_v48, 1  ;;  %v1351_v29 = vadd.f32 %v1350_v32, %v3624_v36 }
 0x11f   :  { %v1946_v17 = vmul.f32 %v1882_v4, %v1882_v4  ;;  %2177 = vrot.lane.b32.xlu1 %v2171_v3, %s3148_s3  ;;  %v1863_v60 = vadd.f32 %v1862_v18, %v1861_v35  ;;  %v1869_v45 = vrot.slane %v1868_v13, 1  ;;  %v3666_v34 = vrot.slane %v3396_v6, %v3310_v30 }
 0x120   :  { %v1332_v53 = vadd.f32 %v1331_v28, %v3611_v31  ;;  %v1358_v5 = vadd.f32 %v1357_v43, %v1356_v14  ;;  %v1365_v0 = vadd.f32 %v1364_v10, %v1363_v7  ;;  %v1966_v51 = vrot.slane %v1965_v38, 4 }
 0x121   :  { %v1955_v61 = vadd.f32 %v1954_v26, %v1953_v25  ;;  %v1962_v19 = vadd.f32 %v1961_v15, %v1960_v49  ;;  %v1870_v57 = vadd.f32 %v1869_v45, %v1868_v13  ;;  %v1877_v55 = vmul.f32 0.25, %v1863_v60 }
 0x122   :  { %v1339_v47 = vadd.f32 %v1338_v8, %v1337_v23  ;;  %v1352_v36 = vrot.slane %v1351_v29, 1  ;;  %v3671_v4 = vrot.slane %v3396_v6, %v3314_v41  ;;  %v2454_v62 = vsel %vm501_vm0, %v3666_v34, 0.0 }
 0x123   :  { %v1346_v32 = vadd.f32 %v1345_v59, %v1344_v48  ;;  %v1972_v42 = vsel %vm501_vm0, %v1946_v17, 0.0  ;;  %v1878_v31 = vmul.f32 0.25, %v1870_v57  ;;  %v1885_v14 = vsub.f32 %v3636_v44, %v1877_v55 }
 0x124   :  { %v1359_v7 = vrot.slane %v1358_v5, 1  ;;  %v1366_v25 = vrot.slane %v1365_v0, 1  ;;  %v1967_v49 = vadd.f32 %v1966_v51, %v1965_v38  ;;  %v2455_v52 = vrot.slane %v2454_v62, 4 }
 0x125   :  { %v1956_v27 = vrot.slane %v1955_v61, 1  ;;  %v1963_v23 = vrot.slane %v1962_v19, 1  ;;  %v1886_v35 = vsub.f32 %v3640_v21, %v1878_v31  ;;  %v2461_v28 = vsel %vm501_vm0, %v3671_v4, 0.0 }
 0x126   :  { %v3680_v43 = vmul.f32 256.0, %v1325_v22  ;;  %v1973_v10 = vrot.slane %v1972_v42, 4  ;;  %v2172_v48 = vcombine.low %v1877_v55, %v1878_v31  ;;  %v2456_v40 = vadd.f32 %v2455_v52, %v2454_v62 }
 0x127   :  { %v3682_v26 = vmul.f32 256.0, %v1332_v53  ;;  %v3684_v15 = vmul.f32 256.0, %v1339_v47  ;;  %v3686_v44 = vadd.f32 %v1352_v36, %v1351_v29  ;;  %v3688_v38 = vmul.f32 256.0, %v1346_v32 }
 0x128   :  { %v3690_v3 = vadd.f32 %v1359_v7, %v1358_v5  ;;  %v1968_v18 = vrot.slane %v1967_v49, 2  ;;  %2179 = vrot.lane.b32.xlu0 %v2172_v48, %s3148_s3  ;;  %v2457_v21 = vrot.slane %v2456_v40, 2  ;;  %v2462_v13 = vrot.slane %v2461_v28, 4  ;;  %v3703_v5 = vpop.permute.xlu0 %852 }
 0x129   :  { %v3693_v22 = vadd.f32 %v1366_v25, %v1365_v0  ;;  %v3695_v8 = vadd.f32 %v1956_v27, %v1955_v61  ;;  %v3697_v59 = vadd.f32 %v1963_v23, %v1962_v19  ;;  %v3701_v17 = vrot.slane %v3394_v2, %v3310_v30  ;;  %4988 = vst [vmem:[#allocation24_spill] sm:$0xff] %v3703_v5 }
 0x12a   :  { %v1974_v29 = vadd.f32 %v1973_v10, %v1972_v42  ;;  %v1947_v60 = vmul.f32 %v1883_v16, %v1883_v16  ;;  %v2458_v45 = vadd.f32 %v2457_v21, %v2456_v40  ;;  %v2463_v53 = vadd.f32 %v2462_v13, %v2461_v28 }
 0x12b   :  { %v3707_v51 = vrot.slane %v3394_v2, %v3314_v41  ;;  %v2468_v0 = vsel %vm501_vm0, %v3701_v17, 0.0  ;;  %v3713_v61 = vrot.slane %v3418_v56, %v3310_v30  ;;  %v3717_v19 = vrot.slane %v3418_v56, %v3314_v41 }
 0x12c   :  { %v3719_v16 = vadd.f32 %v1968_v18, %v1967_v49  ;;  %v1948_v57 = vmul.f32 %v3658_v1, %v3658_v1  ;;  %v2459_v55 = vrot.slane %v2458_v45, 1  ;;  %v2464_v47 = vrot.slane %v2463_v53, 2  ;;  %v3731_v18 = vpop.permute.xlu0 %856 }
 0x12d   :  { %v2469_v36 = vrot.slane %v2468_v0, 4  ;;  %v2475_v62 = vsel %vm501_vm0, %v3707_v51, 0.0  ;;  %v2482_v32 = vsel %vm501_vm0, %v3713_v61, 0.0  ;;  %v2489_v42 = vsel %vm501_vm0, %v3717_v19, 0.0  ;;  %4989 = vst [vmem:[#allocation25_spill] sm:$0xff] %v3731_v18 }
 0x12e   :  { %v1975_v31 = vrot.slane %v1974_v29, 2  ;;  %v1979_v7 = vsel %vm501_vm0, %v1947_v60, 0.0  ;;  %v2460_v25 = vadd.f32 %v2459_v55, %v2458_v45  ;;  %v2465_v49 = vadd.f32 %v2464_v47, %v2463_v53 }
 0x12f   :  { %v2470_v52 = vadd.f32 %v2469_v36, %v2468_v0  ;;  %v2476_v27 = vrot.slane %v2475_v62, 4  ;;  %v2483_v1 = vrot.slane %v2482_v32, 4  ;;  %v2490_v23 = vrot.slane %v2489_v42, 4 }
 0x130   :  { %v1986_v28 = vsel %vm501_vm0, %v1948_v57, 0.0  ;;  %v1949_v10 = vmul.f32 %v1885_v14, %v1885_v14  ;;  %v2466_v48 = vrot.slane %v2465_v49, 1  ;;  %v2510_v40 = vmul.f32 0.25, %v2460_v25  ;;  %v3738_v18 = vpop.permute.xlu0 %993 }
 0x131   :  { %v2471_v21 = vrot.slane %v2470_v52, 2  ;;  %v2477_v13 = vadd.f32 %v2476_v27, %v2475_v62  ;;  %v2484_v5 = vadd.f32 %v2483_v1, %v2482_v32  ;;  %v2491_v56 = vadd.f32 %v2490_v23, %v2489_v42  ;;  %4990 = vst [vmem:[#allocation26_spill] sm:$0xff] %v3738_v18  ;;  %v3740_v27 = vpop.permute.xlu1 %854 }
 0x132   :  { %v1980_v2 = vrot.slane %v1979_v7, 4  ;;  %v1950_v6 = vmul.f32 %v1886_v35, %v1886_v35  ;;  %v2467_v60 = vadd.f32 %v2466_v48, %v2465_v49  ;;  %v3734_v45 = vsub.f32 %v3666_v34, %v2510_v40  ;;  %4991 = vst [vmem:[#allocation27_spill] sm:$0xff] %v3740_v27 }
 0x133   :  { %v2472_v53 = vadd.f32 %v2471_v21, %v2470_v52  ;;  %v2478_v0 = vrot.slane %v2477_v13, 2  ;;  %v2485_v55 = vrot.slane %v2484_v5, 2  ;;  %v2492_v47 = vrot.slane %v2491_v56, 2 }
 0x134   :  { %v1970_v14 = vrot.slane %v3719_v16, 1  ;;  %v1987_v57 = vrot.slane %v1986_v28, 4  ;;  %v1993_v36 = vsel %vm501_vm0, %v1949_v10, 0.0  ;;  %v2511_v25 = vmul.f32 0.25, %v2467_v60 }
 0x135   :  { %v2473_v62 = vrot.slane %v2472_v53, 1  ;;  %v2479_v32 = vadd.f32 %v2478_v0, %v2477_v13  ;;  %v2486_v42 = vadd.f32 %v2485_v55, %v2484_v5  ;;  %v2493_v35 = vadd.f32 %v2492_v47, %v2491_v56 }
 0x136   :  { %v1976_v49 = vadd.f32 %v1975_v31, %v1974_v29  ;;  %v2000_v34 = vsel %vm501_vm0, %v1950_v6, 0.0  ;;  %v3744_v52 = vsub.f32 %v3671_v4, %v2511_v25  ;;  %v2808_v1 = vcombine.low %v2510_v40, %v2511_v25 }
 0x137   :  { %v1981_v23 = vadd.f32 %v1980_v2, %v1979_v7  ;;  %v2474_v48 = vadd.f32 %v2473_v62, %v2472_v53  ;;  %v2480_v21 = vrot.slane %v2479_v32, 1  ;;  %v2487_v10 = vrot.slane %v2486_v42, 1  ;;  %v3759_v53 = vpop.permute.xlu0 %1005 }
 0x138   :  { %v1994_v60 = vrot.slane %v1993_v36, 4  ;;  %2812 = vrot.lane.b32.xlu1 %v2808_v1, %s3148_s3  ;;  %v2494_v18 = vrot.slane %v2493_v35, 1  ;;  %v3749_v56 = vrot.slane %v3414_v37, %v3310_v30  ;;  %v3753_v29 = vrot.slane %v3414_v37, %v3314_v41  ;;  %4992 = vst [vmem:[#allocation28_spill] sm:$0xff] %v3759_v53 }
 0x139   :  { %v2001_v6 = vrot.slane %v2000_v34, 4  ;;  %v2481_v4 = vadd.f32 %v2480_v21, %v2479_v32  ;;  %v2512_v5 = vmul.f32 0.25, %v2474_v48  ;;  %v2488_v31 = vadd.f32 %v2487_v10, %v2486_v42  ;;  %v3763_v32 = vpop.permute.xlu1 %858 }
 0x13a   :  { %v1988_v2 = vadd.f32 %v1987_v57, %v1986_v28  ;;  %v2495_v7 = vadd.f32 %v2494_v18, %v2493_v35  ;;  %v2496_v40 = vsel %vm501_vm0, %v3749_v56, 0.0  ;;  %v2503_v13 = vsel %vm501_vm0, %v3753_v29, 0.0  ;;  %4993 = vst [vmem:[#allocation29_spill] sm:$0xff] %v3763_v32 }
 0x13b   :  { %v1971_v0 = vadd.f32 %v1970_v14, %v3719_v16  ;;  %v1977_v55 = vrot.slane %v1976_v49, 1  ;;  %v2513_v47 = vmul.f32 0.25, %v2481_v4  ;;  %v2520_v25 = vsub.f32 %v3701_v17, %v2512_v5  ;;  %v3768_v4 = vpop.xlane.xlu0 %71 }
 0x13c   :  { %v1995_v62 = vadd.f32 %v1994_v60, %v1993_v36  ;;  %v2514_v42 = vmul.f32 0.25, %v2488_v31  ;;  %v2515_v28 = vmul.f32 0.25, %v2495_v7  ;;  %v2497_v18 = vrot.slane %v2496_v40, 4 }
 0x13d   :  { %v1982_v57 = vrot.slane %v1981_v23, 2  ;;  %v2002_v35 = vadd.f32 %v2001_v6, %v2000_v34  ;;  %v2521_v1 = vsub.f32 %v3707_v51, %v2513_v47  ;;  %v2504_v48 = vrot.slane %v2503_v13, 4 }
 0x13e   :  { %v2809_v21 = vcombine.low %v2512_v5, %v2513_v47  ;;  %v2522_v10 = vsub.f32 %v3713_v61, %v2514_v42  ;;  %v2523_v16 = vsub.f32 %v3717_v19, %v2515_v28  ;;  %v2810_v14 = vcombine.low %v2514_v42, %v2515_v28  ;;  %v3781_v19 = vpop.permute.xlu1 %997 }
 0x13f   :  { %v3771_v17 = vmul.f32 256.0, %v3686_v44  ;;  %v3774_v36 = vmul.f32 256.0, %v3690_v3  ;;  %v1978_v60 = vadd.f32 %v1977_v55, %v1976_v49  ;;  %v1989_v31 = vrot.slane %v1988_v2, 2  ;;  %4994 = vst [vmem:[#allocation30_spill] sm:$0xff] %v3781_v19 }
 0x140   :  { %v3777_v34 = vmul.f32 256.0, %v3693_v22  ;;  %v1996_v51 = vrot.slane %v1995_v62, 2  ;;  %v2584_v6 = vmul.f32 %v2520_v25, %v2520_v25  ;;  %2814 = vrot.lane.b32.xlu0 %v2809_v21, %s3148_s3  ;;  %2816 = vrot.lane.b32.xlu1 %v2810_v14, %s3148_s3  ;;  %v2498_v61 = vadd.f32 %v2497_v18, %v2496_v40 }
 0x141   :  { %v2003_v5 = vrot.slane %v2002_v35, 2  ;;  %v2585_v44 = vmul.f32 %v2521_v1, %v2521_v1  ;;  %v2505_v7 = vadd.f32 %v2504_v48, %v2503_v13  ;;  %v443_v3 = vrot.slane %v3768_v4, %v3310_v30 }
 0x142   :  { %v3786_v49 = vmul.f32 256.0, %v3695_v8  ;;  %v3789_v22 = vmul.f32 256.0, %v3697_v59  ;;  %v3791_v55 = vmul.f32 256.0, %v1971_v0  ;;  %v3793_v47 = vadd.f32 %v1982_v57, %v1981_v23 }
 0x143   :  { %v3795_v25 = vmul.f32 256.0, %v1978_v60  ;;  %v3797_v40 = vadd.f32 %v1989_v31, %v1988_v2  ;;  %v2582_v13 = vmul.f32 %v3734_v45, %v3734_v45  ;;  %v2499_v42 = vrot.slane %v2498_v61, 2  ;;  %v3808_v45 = vpop.permute.xlu1 %1001 }
 0x144   :  { %4995 = vst [vmem:[#allocation31_spill] sm:$0xff] %v3786_v49  ;;  %4996 = vst [vmem:[#allocation32_spill] sm:$0xff] %v3789_v22  ;;  %v1997_v28 = vadd.f32 %v1996_v51, %v1995_v62  ;;  %v2604_v18 = vsel %vm501_vm0, %v2584_v6, 0.0  ;;  %v2506_v8 = vrot.slane %v2505_v7, 2  ;;  %v450_v59 = vrot.slane %v3768_v4, %v3314_v41 }
 0x145   :  { %4997 = vst [vmem:[#allocation33_spill] sm:$0xff] %v3791_v55  ;;  %4998 = vst [vmem:[#allocation34_spill] sm:$0xff] %v3795_v25  ;;  %v2004_v1 = vadd.f32 %v2003_v5, %v2002_v35  ;;  %v2611_v0 = vsel %vm501_vm0, %v2585_v44, 0.0  ;;  %v2500_v23 = vadd.f32 %v2499_v42, %v2498_v61  ;;  %v574_v57 = vsel %vm501_vm0, %v443_v3, 0.0 }
 0x146   :  { %v2583_v2 = vmul.f32 %v3744_v52, %v3744_v52  ;;  %v2586_v48 = vmul.f32 %v2522_v10, %v2522_v10  ;;  %v2507_v21 = vadd.f32 %v2506_v8, %v2505_v7  ;;  %4999 = vst [vmem:[#allocation35_spill] sm:$0xff] %v3808_v45  ;;  %v575_v62 = vrot.slane %v574_v57, 4 }
 0x147   :  { %v2590_v14 = vsel %vm501_vm0, %v2582_v13, 0.0  ;;  %v2605_v60 = vrot.slane %v2604_v18, 4  ;;  %v2501_v31 = vrot.slane %v2500_v23, 1  ;;  %v581_v51 = vsel %vm501_vm0, %v450_v59, 0.0  ;;  %v3814_v45 = vpop.xlane.xlu1 %74 }
 0x148   :  { %v2612_v35 = vrot.slane %v2611_v0, 4  ;;  %v2587_v6 = vmul.f32 %v2523_v16, %v2523_v16  ;;  %v2508_v5 = vrot.slane %v2507_v21, 1  ;;  %v576_v61 = vadd.f32 %v575_v62, %v574_v57 }
 0x149   :  { %v1998_v44 = vrot.slane %v1997_v28, 1  ;;  %v2005_v3 = vrot.slane %v2004_v1, 1  ;;  %v2502_v42 = vadd.f32 %v2501_v31, %v2500_v23  ;;  %v582_v53 = vrot.slane %v581_v51, 4 }
 0x14a   :  { %v2597_v52 = vsel %vm501_vm0, %v2583_v2, 0.0  ;;  %v2618_v10 = vsel %vm501_vm0, %v2586_v48, 0.0  ;;  %v2509_v7 = vadd.f32 %v2508_v5, %v2507_v21  ;;  %v577_v8 = vrot.slane %v576_v61, 2 }
 0x14b   :  { %v2591_v13 = vrot.slane %v2590_v14, 4  ;;  %v2606_v19 = vadd.f32 %v2605_v60, %v2604_v18  ;;  %v2516_v32 = vmul.f32 0.25, %v2502_v42  ;;  %v583_v59 = vadd.f32 %v582_v53, %v581_v51  ;;  %v3825_v42 = vpop.xlane.xlu0 %77 }
 0x14c   :  { %v2613_v27 = vadd.f32 %v2612_v35, %v2611_v0  ;;  %v2625_v16 = vsel %vm501_vm0, %v2587_v6, 0.0  ;;  %v2517_v57 = vmul.f32 0.25, %v2509_v7  ;;  %v578_v62 = vadd.f32 %v577_v8, %v576_v61 }
 0x14d   :  { %v2598_v37 = vrot.slane %v2597_v52, 4  ;;  %v2619_v23 = vrot.slane %v2618_v10, 4  ;;  %v2524_v31 = vsub.f32 %v3749_v56, %v2516_v32  ;;  %v457_v2 = vrot.slane %v3814_v45, %v3310_v30 }
 0x14e   :  { %v2525_v48 = vsub.f32 %v3753_v29, %v2517_v57  ;;  %v2811_v21 = vcombine.low %v2516_v32, %v2517_v57  ;;  %v584_v5 = vrot.slane %v583_v59, 2  ;;  %v464_v18 = vrot.slane %v3814_v45, %v3314_v41 }
 0x14f   :  { %v2607_v53 = vrot.slane %v2606_v19, 2  ;;  %v2626_v0 = vrot.slane %v2625_v16, 4  ;;  %v2588_v60 = vmul.f32 %v2524_v31, %v2524_v31  ;;  %v588_v51 = vsel %vm501_vm0, %v457_v2, 0.0 }
 0x150   :  { %v2592_v35 = vadd.f32 %v2591_v13, %v2590_v14  ;;  %v2614_v6 = vrot.slane %v2613_v27, 2  ;;  %v2589_v61 = vmul.f32 %v2525_v48, %v2525_v48  ;;  %2818 = vrot.lane.b32.xlu0 %v2811_v21, %s3148_s3  ;;  %v579_v56 = vrot.slane %v578_v62, 1 }
 0x151   :  { %v1999_v32 = vadd.f32 %v1998_v44, %v1997_v28  ;;  %v2599_v7 = vadd.f32 %v2598_v37, %v2597_v52  ;;  %v2620_v8 = vadd.f32 %v2619_v23, %v2618_v10  ;;  %v2632_v57 = vsel %vm501_vm0, %v2588_v60, 0.0 }
 0x152   :  { %v585_v25 = vadd.f32 %v584_v5, %v583_v59  ;;  %v589_v55 = vrot.slane %v588_v51, 4  ;;  %v595_v31 = vsel %vm501_vm0, %v464_v18, 0.0  ;;  %v2006_v2 = vadd.f32 %v2005_v3, %v2004_v1 }
 0x153   :  { %v2608_v14 = vadd.f32 %v2607_v53, %v2606_v19  ;;  %v2627_v13 = vadd.f32 %v2626_v0, %v2625_v16  ;;  %v471_v48 = vrot.slane %v3825_v42, %v3310_v30  ;;  %v2593_v21 = vrot.slane %v2592_v35, 2  ;;  %v3836_v19 = vpop.xlane.xlu1 %80 }
 0x154   :  { %v2615_v22 = vadd.f32 %v2614_v6, %v2613_v27  ;;  %v2639_v49 = vsel %vm501_vm0, %v2589_v61, 0.0  ;;  %v580_v29 = vadd.f32 %v579_v56, %v578_v62  ;;  %v3834_v28 = vmul.f32 256.0, %v1999_v32 }
 0x155   :  { %v2633_v44 = vrot.slane %v2632_v57, 4  ;;  %v596_v52 = vrot.slane %v595_v31, 4  ;;  %v2600_v10 = vrot.slane %v2599_v7, 2  ;;  %v2621_v59 = vrot.slane %v2620_v8, 2 }
 0x156   :  { %5000 = vst [vmem:[#allocation36_spill] sm:$0xff] %v3834_v28  ;;  %v586_v23 = vrot.slane %v585_v25, 1  ;;  %v590_v1 = vadd.f32 %v589_v55, %v588_v51  ;;  %v2609_v3 = vrot.slane %v2608_v14, 1  ;;  %v2628_v16 = vrot.slane %v2627_v13, 2 }
 0x157   :  { %v2640_v5 = vrot.slane %v2639_v49, 4  ;;  %v602_v27 = vsel %vm501_vm0, %v471_v48, 0.0  ;;  %v3839_v18 = vmul.f32 256.0, %v2006_v2  ;;  %v3841_v62 = vadd.f32 %v2593_v21, %v2592_v35 }
 0x158   :  { %v2616_v53 = vrot.slane %v2615_v22, 1  ;;  %v702_v0 = vadd.f32 %v3579_v50, %v580_v29  ;;  %v2634_v60 = vadd.f32 %v2633_v44, %v2632_v57  ;;  %v597_v6 = vadd.f32 %v596_v52, %v595_v31 }
 0x159   :  { %5001 = vst [vmem:[#allocation37_spill] sm:$0xff] %v3839_v18  ;;  %5002 = vst [vmem:[#allocation38_spill] sm:$0xff] %v3841_v62  ;;  %v478_v61 = vrot.slane %v3825_v42, %v3314_v41  ;;  %v485_v55 = vrot.slane %v3836_v19, %v3310_v30  ;;  %v3848_v51 = vadd.f32 %v2600_v10, %v2599_v7  ;;  %v591_v32 = vrot.slane %v590_v1, 2 }
 0x15a   :  { %v587_v56 = vadd.f32 %v586_v23, %v585_v25  ;;  %v603_v48 = vrot.slane %v602_v27, 4  ;;  %v2610_v2 = vadd.f32 %v2609_v3, %v2608_v14  ;;  %v3850_v37 = vadd.f32 %v2621_v59, %v2620_v8  ;;  %v3861_v14 = vpop.xlane.xlu0 %128 }
 0x15b   :  { %5003 = vst [vmem:[#allocation39_spill] sm:$0xff] %v3848_v51  ;;  %v3852_v35 = vadd.f32 %v2628_v16, %v2627_v13  ;;  %v2641_v21 = vadd.f32 %v2640_v5, %v2639_v49  ;;  %v2617_v29 = vadd.f32 %v2616_v53, %v2615_v22  ;;  %v3855_v57 = vmul.f32 0.0009765625, %v702_v0 }
 0x15c   :  { %5004 = vst [vmem:[#allocation40_spill] sm:$0xff] %v3850_v37  ;;  %v492_v31 = vrot.slane %v3836_v19, %v3314_v41  ;;  %v2635_v44 = vrot.slane %v2634_v60, 2  ;;  %v598_v7 = vrot.slane %v597_v6, 2  ;;  %v609_v25 = vsel %vm501_vm0, %v478_v61, 0.0  ;;  %v3872_v61 = vpop.xlane.xlu1 %131 }
 0x15d   :  { %5005 = vst [vmem:[#allocation41_spill] sm:$0xff] %v3852_v35  ;;  %5006 = vst [vmem:[#allocation42_spill] sm:$0xff] %v3855_v57  ;;  %v616_v52 = vsel %vm501_vm0, %v485_v55, 0.0  ;;  %v703_v49 = vadd.f32 %v3581_v39, %v587_v56  ;;  %v592_v13 = vadd.f32 %v591_v32, %v590_v1  ;;  %v604_v10 = vadd.f32 %v603_v48, %v602_v27 }
 0x15e   :  { %v3865_v22 = vmul.f32 256.0, %v2610_v2  ;;  %v2642_v3 = vrot.slane %v2641_v21, 2  ;;  %v3869_v16 = vmul.f32 256.0, %v2617_v29  ;;  %v610_v5 = vrot.slane %v609_v25, 4 }
 0x15f   :  { %v617_v53 = vrot.slane %v616_v52, 4  ;;  %v623_v0 = vsel %vm501_vm0, %v492_v31, 0.0  ;;  %v2636_v55 = vadd.f32 %v2635_v44, %v2634_v60  ;;  %v599_v1 = vadd.f32 %v598_v7, %v597_v6  ;;  %v3884_v44 = vpop.xlane.xlu0 %134 }
 0x160   :  { %5007 = vst [vmem:[#allocation43_spill] sm:$0xff] %v3865_v22  ;;  %5008 = vst [vmem:[#allocation44_spill] sm:$0xff] %v3869_v16  ;;  %v1118_v27 = vrot.slane %v3861_v14, %v3310_v30  ;;  %v3877_v56 = vmul.f32 0.0009765625, %v703_v49  ;;  %v593_v32 = vrot.slane %v592_v13, 1  ;;  %v605_v48 = vrot.slane %v604_v10, 2 }
 0x161   :  { %v1125_v2 = vrot.slane %v3861_v14, %v3314_v41  ;;  %v2643_v29 = vadd.f32 %v2642_v3, %v2641_v21  ;;  %v624_v23 = vrot.slane %v623_v0, 4  ;;  %v1132_v60 = vrot.slane %v3872_v61, %v3310_v30 }
 0x162   :  { %v1248_v31 = vsel %vm501_vm0, %v1118_v27, 0.0  ;;  %v611_v6 = vadd.f32 %v610_v5, %v609_v25  ;;  %v618_v7 = vadd.f32 %v617_v53, %v616_v52  ;;  %v2637_v59 = vrot.slane %v2636_v55, 1 }
 0x163   :  { %v1249_v39 = vrot.slane %v1248_v31, 4  ;;  %v1255_v49 = vsel %vm501_vm0, %v1125_v2, 0.0  ;;  %v600_v8 = vrot.slane %v599_v1, 1  ;;  %v1139_v16 = vrot.slane %v3872_v61, %v3314_v41 }
 0x164   :  { %v1256_v50 = vrot.slane %v1255_v49, 4  ;;  %v594_v21 = vadd.f32 %v593_v32, %v592_v13  ;;  %v606_v3 = vadd.f32 %v605_v48, %v604_v10  ;;  %v1262_v27 = vsel %vm501_vm0, %v1132_v60, 0.0 }
 0x165   :  { %v1146_v22 = vrot.slane %v3884_v44, %v3310_v30  ;;  %v625_v18 = vadd.f32 %v624_v23, %v623_v0  ;;  %v1250_v57 = vadd.f32 %v1249_v39, %v1248_v31  ;;  %v1263_v52 = vrot.slane %v1262_v27, 4 }
 0x166   :  { %v1257_v25 = vadd.f32 %v1256_v50, %v1255_v49  ;;  %v612_v5 = vrot.slane %v611_v6, 2  ;;  %v619_v53 = vrot.slane %v618_v7, 2  ;;  %v1269_v2 = vsel %vm501_vm0, %v1139_v16, 0.0 }
 0x167   :  { %v1153_v28 = vrot.slane %v3884_v44, %v3314_v41  ;;  %v2638_v35 = vadd.f32 %v2637_v59, %v2636_v55  ;;  %v2644_v37 = vrot.slane %v2643_v29, 1  ;;  %v601_v13 = vadd.f32 %v600_v8, %v599_v1 }
 0x168   :  { %v1270_v10 = vrot.slane %v1269_v2, 4  ;;  %v704_v32 = vadd.f32 %v3574_v12, %v594_v21  ;;  %v1264_v48 = vadd.f32 %v1263_v52, %v1262_v27  ;;  %v1276_v60 = vsel %vm501_vm0, %v1146_v22, 0.0  ;;  %v3900_v12 = vpop.xlane.xlu1 %137 }
 0x169   :  { %v1283_v23 = vsel %vm501_vm0, %v1153_v28, 0.0  ;;  %v607_v50 = vrot.slane %v606_v3, 1  ;;  %v626_v0 = vrot.slane %v625_v18, 2  ;;  %v1251_v39 = vrot.slane %v1250_v57, 2 }
 0x16a   :  { %v1258_v31 = vrot.slane %v1257_v25, 2  ;;  %v613_v49 = vadd.f32 %v612_v5, %v611_v6  ;;  %v620_v16 = vadd.f32 %v619_v53, %v618_v7  ;;  %v1277_v51 = vrot.slane %v1276_v60, 4 }
 0x16b   :  { %v1284_v62 = vrot.slane %v1283_v23, 4  ;;  %v2645_v20 = vadd.f32 %v2644_v37, %v2643_v29  ;;  %v705_v8 = vadd.f32 %v3576_v58, %v601_v13  ;;  %v1271_v55 = vadd.f32 %v1270_v10, %v1269_v2 }
 0x16c   :  { %v3902_v1 = vmul.f32 256.0, %v2638_v35  ;;  %v3904_v22 = vmul.f32 0.0009765625, %v704_v32  ;;  %v1265_v28 = vrot.slane %v1264_v48, 2  ;;  %v1278_v21 = vadd.f32 %v1277_v51, %v1276_v60  ;;  %v3916_v60 = vpop.xlane.xlu0 %197 }
 0x16d   :  { %v608_v27 = vadd.f32 %v607_v50, %v606_v3  ;;  %v627_v52 = vadd.f32 %v626_v0, %v625_v18  ;;  %v1252_v6 = vadd.f32 %v1251_v39, %v1250_v57  ;;  %v1259_v7 = vadd.f32 %v1258_v31, %v1257_v25 }
 0x16e   :  { %v614_v5 = vrot.slane %v613_v49, 1  ;;  %v621_v53 = vrot.slane %v620_v16, 1  ;;  %v1285_v37 = vadd.f32 %v1284_v62, %v1283_v23  ;;  %v1160_v29 = vrot.slane %v3900_v12, %v3310_v30 }
 0x16f   :  { %v3908_v58 = vmul.f32 256.0, %v2645_v20  ;;  %v3910_v2 = vmul.f32 0.0009765625, %v705_v8  ;;  %v1272_v35 = vrot.slane %v1271_v55, 2  ;;  %v1167_v13 = vrot.slane %v3900_v12, %v3314_v41 }
 0x170   :  { %v1266_v3 = vadd.f32 %v1265_v28, %v1264_v48  ;;  %v1279_v18 = vrot.slane %v1278_v21, 2  ;;  %v1290_v57 = vsel %vm501_vm0, %v1160_v29, 0.0  ;;  %v628_v25 = vrot.slane %v627_v52, 1 }
 0x171   :  { %v1253_v10 = vrot.slane %v1252_v6, 1  ;;  %v1260_v62 = vrot.slane %v1259_v7, 1  ;;  %v1291_v32 = vrot.slane %v1290_v57, 4  ;;  %v615_v20 = vadd.f32 %v614_v5, %v613_v49 }
 0x172   :  { %v622_v23 = vadd.f32 %v621_v53, %v620_v16  ;;  %v1286_v50 = vrot.slane %v1285_v37, 2  ;;  %v1297_v0 = vsel %vm501_vm0, %v1167_v13, 0.0  ;;  %v706_v39 = vadd.f32 %v3587_v33, %v608_v27 }
 0x173   :  { %v3922_v31 = vadd.f32 %v3861_v14, %v3768_v4  ;;  %v1273_v48 = vadd.f32 %v1272_v35, %v1271_v55  ;;  %v1292_v8 = vadd.f32 %v1291_v32, %v1290_v57  ;;  %v1267_v28 = vrot.slane %v1266_v3, 1  ;;  %v3929_v14 = vpop.xlane.xlu1 %200 }
 0x174   :  { %v1280_v29 = vadd.f32 %v1279_v18, %v1278_v21  ;;  %v1298_v51 = vrot.slane %v1297_v0, 4  ;;  %v1757_v59 = vrot.slane %v3916_v60, %v3310_v30  ;;  %v629_v16 = vadd.f32 %v628_v25, %v627_v52 }
 0x175   :  { %v1254_v5 = vadd.f32 %v1253_v10, %v1252_v6  ;;  %v1261_v53 = vadd.f32 %v1260_v62, %v1259_v7  ;;  %v707_v13 = vadd.f32 %v3597_v46, %v615_v20  ;;  %v708_v33 = vadd.f32 %v3583_v11, %v622_v23 }
 0x176   :  { %v1287_v27 = vadd.f32 %v1286_v50, %v1285_v37  ;;  %v1293_v4 = vrot.slane %v1292_v8, 2  ;;  %v3931_v55 = vmul.f32 0.0009765625, %v706_v39  ;;  %v3935_v21 = vadd.f32 %v3872_v61, %v3814_v45 }
 0x177   :  { %v1274_v35 = vrot.slane %v1273_v48, 1  ;;  %v1764_v52 = vrot.slane %v3916_v60, %v3314_v41  ;;  %v1268_v6 = vadd.f32 %v1267_v28, %v1266_v3  ;;  %v1281_v7 = vrot.slane %v1280_v29, 1 }
 0x178   :  { %v1299_v18 = vadd.f32 %v1298_v51, %v1297_v0  ;;  %v1887_v46 = vsel %vm501_vm0, %v1757_v59, 0.0  ;;  %v709_v11 = vadd.f32 %v3585_v24, %v629_v16  ;;  %v1376_v37 = vadd.f32 %v3607_v9, %v1254_v5 }
 0x179   :  { %v1377_v57 = vadd.f32 %v3680_v43, %v1261_v53  ;;  %v1771_v25 = vrot.slane %v3929_v14, %v3310_v30  ;;  %v3945_v45 = vmul.f32 0.0009765625, %v707_v13  ;;  %v3947_v61 = vmul.f32 0.0009765625, %v708_v33 }
 0x17a   :  { %v1288_v10 = vrot.slane %v1287_v27, 1  ;;  %v1294_v62 = vadd.f32 %v1293_v4, %v1292_v8  ;;  %v1275_v3 = vadd.f32 %v1274_v35, %v1273_v48  ;;  %v1888_v32 = vrot.slane %v1887_v46, 4 }
 0x17b   :  { %v1894_v51 = vsel %vm501_vm0, %v1764_v52, 0.0  ;;  %v1778_v24 = vrot.slane %v3929_v14, %v3314_v41  ;;  %v1378_v43 = vadd.f32 %v3682_v26, %v1268_v6  ;;  %v1282_v59 = vadd.f32 %v1281_v7, %v1280_v29  ;;  %v3968_v52 = vpop.xlane.xlu0 %203 }
 0x17c   :  { %v1300_v20 = vrot.slane %v1299_v18, 2  ;;  %v3954_v23 = vmul.f32 0.0009765625, %v709_v11  ;;  %v3956_v50 = vmul.f32 0.0009765625, %v1376_v37  ;;  %v3958_v0 = vmul.f32 0.0009765625, %v1377_v57 }
 0x17d   :  { %v1901_v39 = vsel %vm501_vm0, %v1771_v25, 0.0  ;;  %v1289_v48 = vadd.f32 %v1288_v10, %v1287_v27  ;;  %v1295_v8 = vrot.slane %v1294_v62, 1  ;;  %v1895_v28 = vrot.slane %v1894_v51, 4 }
 0x17e   :  { %v1908_v16 = vsel %vm501_vm0, %v1778_v24, 0.0  ;;  %v1379_v26 = vadd.f32 %v3684_v15, %v1275_v3  ;;  %v1889_v29 = vadd.f32 %v1888_v32, %v1887_v46  ;;  %v3965_v13 = vmul.f32 0.0009765625, %v1378_v43 }
 0x17f   :  { %v1380_v33 = vadd.f32 %v3688_v38, %v1282_v59  ;;  %v1301_v4 = vadd.f32 %v1300_v20, %v1299_v18  ;;  %v1902_v35 = vrot.slane %v1901_v39, 4  ;;  %v3974_v7 = vadd.f32 %v3900_v12, %v3836_v19  ;;  %v3978_v38 = vpop.xlane.xlu1 %206 }
 0x180   :  { %v1909_v11 = vrot.slane %v1908_v16, 4  ;;  %v1381_v46 = vadd.f32 %v3771_v17, %v1289_v48  ;;  %v1296_v37 = vadd.f32 %v1295_v8, %v1294_v62  ;;  %v1896_v57 = vadd.f32 %v1895_v28, %v1894_v51 }
 0x181   :  { %v3980_v18 = vmul.f32 0.0009765625, %v1379_v26  ;;  %v1890_v25 = vrot.slane %v1889_v29, 2  ;;  %v1785_v10 = vrot.slane %v3968_v52, %v3310_v30  ;;  %v1792_v3 = vrot.slane %v3968_v52, %v3314_v41 }
 0x182   :  { %v3987_v12 = vmul.f32 0.0009765625, %v1380_v33  ;;  %v1302_v32 = vrot.slane %v1301_v4, 1  ;;  %v1903_v24 = vadd.f32 %v1902_v35, %v1901_v39  ;;  %v1910_v17 = vadd.f32 %v1909_v11, %v1908_v16 }
 0x183   :  { %v1915_v62 = vsel %vm501_vm0, %v1785_v10, 0.0  ;;  %v1922_v51 = vsel %vm501_vm0, %v1792_v3, 0.0  ;;  %v1799_v43 = vrot.slane %v3978_v38, %v3310_v30  ;;  %v3993_v59 = vmul.f32 0.0009765625, %v1381_v46 }
 0x184   :  { %v1382_v20 = vadd.f32 %v3774_v36, %v1296_v37  ;;  %v1897_v48 = vrot.slane %v1896_v57, 2  ;;  %v1916_v8 = vrot.slane %v1915_v62, 4  ;;  %v1891_v26 = vadd.f32 %v1890_v25, %v1889_v29 }
 0x185   :  { %5009 = vst [vmem:[#allocation45_spill] sm:$0xff] %v3993_v59  ;;  %v1923_v33 = vrot.slane %v1922_v51, 4  ;;  %v1806_v39 = vrot.slane %v3978_v38, %v3314_v41  ;;  %v4001_v16 = vadd.f32 %v3929_v14, %v3935_v21  ;;  %v5010_v35 = vrot.slane %v3793_v47, 1 }
 0x186   :  { %v1917_v46 = vadd.f32 %v1916_v8, %v1915_v62  ;;  %v1929_v36 = vsel %vm501_vm0, %v1799_v43, 0.0  ;;  %v1303_v10 = vadd.f32 %v1302_v32, %v1301_v4  ;;  %v1904_v3 = vrot.slane %v1903_v24, 2  ;;  %v5012_v8 = vld [vmem:[#allocation15_spill] sm:$0xff] }
 0x187   :  { %v1985_v11 = vadd.f32 %v5010_v35, %v3793_v47  ;;  %v1911_v29 = vrot.slane %v1910_v17, 2  ;;  %v4009_v15 = vmul.f32 0.0009765625, %v1382_v20  ;;  %v1898_v6 = vadd.f32 %v1897_v48, %v1896_v57 }
 0x188   :  { %v1924_v27 = vadd.f32 %v1923_v33, %v1922_v51  ;;  %v1892_v14 = vrot.slane %v1891_v26, 1  ;;  %v1930_v21 = vrot.slane %v1929_v36, 4  ;;  %v1936_v53 = vsel %vm501_vm0, %v1806_v39, 0.0 }
 0x189   :  { %v139_v47 = vadd.f32 %v3334_v54, %v3298_v63  ;;  %v153_v62 = vadd.f32 %v3884_v44, %v3825_v42  ;;  %v5011_v4 = vrot.slane %v3797_v40, 1  ;;  %v4019_v43 = vmul.f32 256.0, %v1985_v11 }
 0x18a   :  { %v1918_v20 = vrot.slane %v1917_v46, 2  ;;  %v1383_v57 = vadd.f32 %v3777_v34, %v1303_v10  ;;  %v1905_v51 = vadd.f32 %v1904_v3, %v1903_v24  ;;  %v1912_v48 = vadd.f32 %v1911_v29, %v1910_v17 }
 0x18b   :  { %v1992_v32 = vadd.f32 %v5011_v4, %v3797_v40  ;;  %v208_v33 = vadd.f32 %v5012_v8, %v139_v47  ;;  %v1899_v39 = vrot.slane %v1898_v6, 1  ;;  %v1925_v35 = vrot.slane %v1924_v27, 2  ;;  %v5013_v40 = vld [vmem:[#allocation19_spill] sm:$0xff] }
 0x18c   :  { %v1937_v25 = vrot.slane %v1936_v53, 4  ;;  %v143_v37 = vmul.f32 %v3334_v54, %v3334_v54  ;;  %v1893_v44 = vadd.f32 %v1892_v14, %v1891_v26  ;;  %v1931_v49 = vadd.f32 %v1930_v21, %v1929_v36 }
 0x18d   :  { %v277_v11 = vadd.f32 %v5013_v40, %v208_v33  ;;  %v4027_v4 = vmul.f32 256.0, %v1992_v32  ;;  %v1919_v28 = vadd.f32 %v1918_v20, %v1917_v46  ;;  %v82_v34 = vmul.f32 %v3298_v63, %v3298_v63  ;;  %v267_v46 = vpop.xlane.xlu0 %266  ;;  %v5014_v20 = vld [vmem:[#allocation31_spill] sm:$0xff] }
 0x18e   :  { %v212_v24 = vmul.f32 %v5012_v8, %v5012_v8  ;;  %v1906_v17 = vrot.slane %v1905_v51, 1  ;;  %v1913_v10 = vrot.slane %v1912_v48, 1  ;;  %v4034_v3 = vadd.f32 %v3968_v52, %v153_v62 }
 0x18f   :  { %v4036_v54 = vmul.f32 0.25, %v277_v11  ;;  %v1926_v26 = vadd.f32 %v1925_v35, %v1924_v27  ;;  %v1938_v36 = vadd.f32 %v1937_v25, %v1936_v53  ;;  %v147_v29 = vadd.f32 %v143_v37, %v82_v34 }
 0x190   :  { %v281_v14 = vmul.f32 %v5013_v40, %v5013_v40  ;;  %v4040_v21 = vmul.f32 0.0009765625, %v1383_v57  ;;  %v1900_v63 = vadd.f32 %v1899_v39, %v1898_v6  ;;  %v1932_v47 = vrot.slane %v1931_v49, 2 }
 0x191   :  { %v297_v32 = vmul.f32 4.0, %v4036_v54  ;;  %v2015_v8 = vadd.f32 %v5014_v20, %v1893_v44  ;;  %v1920_v33 = vrot.slane %v1919_v28, 1  ;;  %v4046_v52 = vadd.f32 %v3978_v38, %v3974_v7  ;;  %v5015_v44 = vld [vmem:[#allocation32_spill] sm:$0xff] }
 0x192   :  { %v216_v27 = vadd.f32 %v212_v24, %v147_v29  ;;  %v1907_v53 = vadd.f32 %v1906_v17, %v1905_v51  ;;  %v1914_v37 = vadd.f32 %v1913_v10, %v1912_v48  ;;  %v2396_v62 = vrot.slane %v267_v46, %v3310_v30  ;;  %v5016_v10 = vld [vmem:[#allocation33_spill] sm:$0xff] }
 0x193   :  { %v301_v25 = vmul.f32 %v297_v32, %v4036_v54  ;;  %v1927_v57 = vrot.slane %v1926_v26, 1  ;;  %v1939_v35 = vrot.slane %v1938_v36, 2  ;;  %v2403_v39 = vrot.slane %v267_v46, %v3314_v41 }
 0x194   :  { %v285_v6 = vadd.f32 %v281_v14, %v216_v27  ;;  %v4053_v11 = vadd.f32 %v5015_v44, %v1900_v63  ;;  %v4055_v34 = vadd.f32 %v1932_v47, %v1931_v49  ;;  %v2526_v7 = vsel %vm501_vm0, %v2396_v62, 0.0  ;;  %v5017_v14 = vld [vmem:[#allocation34_spill] sm:$0xff] }
 0x195   :  { %v1921_v38 = vadd.f32 %v1920_v33, %v1919_v28  ;;  %v2527_v48 = vrot.slane %v2526_v7, 4  ;;  %v2533_v24 = vsel %vm501_vm0, %v2403_v39, 0.0  ;;  %v4059_v17 = vmul.f32 0.0009765625, %v2015_v8  ;;  %v5019_v62 = vld [vmem:[#allocation22_spill] sm:$0xff]  ;;  %v270_v39 = vpop.xlane.xlu1 %269 }
 0x196   :  { %v305_v51 = vsub.f32 %v285_v6, %v301_v25  ;;  %v4062_v29 = vadd.f32 %v5016_v10, %v1907_v53  ;;  %v4065_v32 = vadd.f32 %v5017_v14, %v1914_v37  ;;  %v2534_v20 = vrot.slane %v2533_v24, 4  ;;  %v5018_v25 = vld [vmem:[#allocation11_spill] sm:$0xff]  ;;  %v5020_v53 = vld [vmem:[#allocation14_spill] sm:$0xff] }
 0x197   :  { %v1928_v63 = vadd.f32 %v1927_v57, %v1926_v26  ;;  %v4067_v27 = vadd.f32 %v1939_v35, %v1938_v36  ;;  %v220_v49 = vadd.f32 %v3916_v60, %v3922_v31  ;;  %v2528_v28 = vadd.f32 %v2527_v48, %v2526_v7  ;;  %v5021_v26 = vld [vmem:[#allocation38_spill] sm:$0xff] }
 0x198   :  { %v2535_v33 = vadd.f32 %v2534_v20, %v2533_v24  ;;  %v144_v8 = vmul.f32 %v5018_v25, %v5018_v25  ;;  %v209_v6 = vadd.f32 %v5020_v53, %v5019_v62  ;;  %v2019_v37 = vadd.f32 %v4019_v43, %v1921_v38  ;;  %v5023_v31 = vld [vmem:[#allocation10_spill] sm:$0xff] }
 0x199   :  { %v309_v44 = vmax.f32 %v305_v51, 0.0  ;;  %v5022_v36 = vrot.slane %v5021_v26, 1  ;;  %v2529_v35 = vrot.slane %v2528_v28, 2  ;;  %v83_v7 = vmul.f32 %v5023_v31, %v5023_v31  ;;  %v5024_v24 = vld [vmem:[#allocation18_spill] sm:$0xff] }
 0x19a   :  { %v2536_v60 = vrot.slane %v2535_v33, 2  ;;  %v213_v48 = vmul.f32 %v5020_v53, %v5020_v53  ;;  %v278_v10 = vadd.f32 %v5024_v24, %v209_v6  ;;  %v1941_v14 = vrot.slane %v4067_v27, 1 }
 0x19b   :  { %v2596_v57 = vadd.f32 %v5022_v36, %v5021_v26  ;;  %v289_v20 = vadd.f32 %v267_v46, %v220_v49  ;;  %v2530_v25 = vadd.f32 %v2529_v35, %v2528_v28  ;;  %v2410_v43 = vrot.slane %v270_v39, %v3310_v30  ;;  %v5025_v28 = vld [vmem:[#allocation39_spill] sm:$0xff] }
 0x19c   :  { %v2537_v38 = vadd.f32 %v2536_v60, %v2535_v33  ;;  %v148_v51 = vadd.f32 %v144_v8, %v83_v7  ;;  %v282_v62 = vmul.f32 %v5024_v24, %v5024_v24  ;;  %v4089_v26 = vmul.f32 0.25, %v278_v10  ;;  %v5027_v7 = vld [vmem:[#allocation8_spill] sm:$0xff]  ;;  %v5028_v24 = vld [vmem:[#allocation13_spill] sm:$0xff] }
 0x19d   :  { %v2020_v36 = vadd.f32 %v4027_v4, %v1928_v63  ;;  %v313_v31 = vmul.f32 256.0, %v309_v44  ;;  %v2417_v53 = vrot.slane %v270_v39, %v3314_v41  ;;  %v2540_v6 = vsel %vm501_vm0, %v2410_v43, 0.0 }
 0x19e   :  { %v2027_v40 = vmul.f32 0.0009765625, %v2019_v37  ;;  %v2531_v42 = vrot.slane %v2530_v25, 1  ;;  %v217_v46 = vadd.f32 %v213_v48, %v148_v51  ;;  %v298_v49 = vmul.f32 4.0, %v4089_v26  ;;  %v5029_v51 = vld [vmem:[#allocation17_spill] sm:$0xff] }
 0x19f   :  { %v5026_v33 = vrot.slane %v5025_v28, 1  ;;  %v2646_v35 = vmul.f32 256.0, %v2596_v57  ;;  %v317_v60 = vadd.f32 %v313_v31, %v289_v20  ;;  %v141_v10 = vadd.f32 %v5028_v24, %v5027_v7 }
 0x1a0   :  { %v2538_v4 = vrot.slane %v2537_v38, 1  ;;  %v286_v63 = vadd.f32 %v282_v62, %v217_v46  ;;  %v302_v44 = vmul.f32 %v298_v49, %v4089_v26  ;;  %v2541_v19 = vrot.slane %v2540_v6, 4 }
 0x1a1   :  { %v2603_v8 = vadd.f32 %v5026_v33, %v5025_v28  ;;  %v2028_v43 = vmul.f32 0.0009765625, %v2020_v36  ;;  %v2547_v37 = vsel %vm501_vm0, %v2417_v53, 0.0  ;;  %v145_v48 = vmul.f32 %v5028_v24, %v5028_v24  ;;  %v5030_v36 = vld [vmem:[#allocation21_spill] sm:$0xff] }
 0x1a2   :  { %v210_v5 = vadd.f32 %v5029_v51, %v141_v10  ;;  %v2035_v9 = vmax.f32 %v2027_v40, 0.0  ;;  %v2532_v28 = vadd.f32 %v2531_v42, %v2530_v25  ;;  %v306_v57 = vsub.f32 %v286_v63, %v302_v44  ;;  %v273_v44 = vpop.xlane.xlu0 %272 }
 0x1a3   :  { %v290_v20 = vadd.f32 %v270_v39, %v4001_v16  ;;  %v321_v31 = vmul.f32 0.0009765625, %v317_v60  ;;  %v84_v62 = vmul.f32 %v5027_v7, %v5027_v7  ;;  %v214_v46 = vmul.f32 %v5029_v51, %v5029_v51 }
 0x1a4   :  { %v279_v49 = vadd.f32 %v5030_v36, %v210_v5  ;;  %v2539_v53 = vadd.f32 %v2538_v4, %v2537_v38  ;;  %v310_v33 = vmax.f32 %v306_v57, 0.0  ;;  %v2542_v47 = vadd.f32 %v2541_v19, %v2540_v6 }
 0x1a5   :  { %v2548_v24 = vrot.slane %v2547_v37, 4  ;;  %v2647_v59 = vmul.f32 256.0, %v2603_v8  ;;  %v149_v10 = vadd.f32 %v145_v48, %v84_v62  ;;  %v283_v42 = vmul.f32 %v5030_v36, %v5030_v36 }
 0x1a6   :  { %v4113_v40 = vmul.f32 0.25, %v279_v49  ;;  %v2036_v16 = vmax.f32 %v2028_v43, 0.0  ;;  %v2043_v39 = vadd.f32 1e-05, %v2035_v9  ;;  %v2654_v25 = vadd.f32 %v2646_v35, %v2532_v28 }
 0x1a7   :  { %v314_v60 = vmul.f32 256.0, %v310_v33  ;;  %v4116_v7 = vmul.f32 0.0009765625, %v4062_v29  ;;  %v325_v63 = vadd.f32 1e-05, %v321_v31  ;;  %v218_v5 = vadd.f32 %v214_v46, %v149_v10  ;;  %v5032_v10 = vld [vmem:[#allocation12_spill] sm:$0xff] }
 0x1a8   :  { %v299_v38 = vmul.f32 4.0, %v4113_v40  ;;  %v2655_v19 = vadd.f32 %v2647_v59, %v2539_v53  ;;  %v2543_v8 = vrot.slane %v2542_v47, 2  ;;  %v4119_v4 = vadd.f32 %v2548_v24, %v2547_v37 }
 0x1a9   :  { %v318_v6 = vadd.f32 %v314_v60, %v290_v20  ;;  %v5031_v48 = vrot.slane %v4055_v34, 1  ;;  %v4127_v9 = vadd.f32 %v1941_v14, %v4067_v27  ;;  %v287_v29 = vadd.f32 %v283_v42, %v218_v5 }
 0x1aa   :  { %v303_v35 = vmul.f32 %v299_v38, %v4113_v40  ;;  %v4130_v51 = vadd.f32 1e-05, %v2036_v16  ;;  %2993 = vrsqrt.f32 %v2043_v39  ;;  %v4132_v59 = vmul.f32 0.0009765625, %v2654_v25  ;;  %v276_v16 = vpop.xlane.xlu1 %275  ;;  %v5037_v38 = vld [vmem:[#allocation23_spill] sm:$0xff] }
 0x1ab   :  { %v4124_v43 = vadd.f32 %v5031_v48, %v4055_v34  ;;  %v322_v28 = vmul.f32 0.0009765625, %v318_v6  ;;  %2995 = vrsqrt.f32 %v325_v63  ;;  %v2424_v57 = vrot.slane %v273_v44, %v3310_v30  ;;  %v5035_v63 = vld [vmem:[#allocation41_spill] sm:$0xff] }
 0x1ac   :  { %v307_v37 = vsub.f32 %v287_v29, %v303_v35  ;;  %v2431_v20 = vrot.slane %v273_v44, %v3314_v41  ;;  %v4136_v34 = vmul.f32 0.0009765625, %v2655_v19  ;;  %v4138_v27 = vadd.f32 %v2543_v8, %v2542_v47  ;;  %v5033_v47 = vld [vmem:[#allocation40_spill] sm:$0xff]  ;;  %v5039_v48 = vld [vmem:[#allocation9_spill] sm:$0xff] }
 0x1ad   :  { %v326_v31 = vadd.f32 1e-05, %v322_v28  ;;  %v2550_v14 = vrot.slane %v4119_v4, 2  ;;  %v291_v46 = vadd.f32 %v273_v44, %v4034_v3  ;;  %v2554_v36 = vsel %vm501_vm0, %v2424_v57, 0.0  ;;  %v5038_v19 = vld [vmem:[#allocation16_spill] sm:$0xff] }
 0x1ae   :  { %v311_v62 = vmax.f32 %v307_v37, 0.0  ;;  %v2561_v49 = vsel %vm501_vm0, %v2431_v20, 0.0  ;;  %v2670_v53 = vmax.f32 %v4132_v59, 0.0  ;;  %v2555_v33 = vrot.slane %v2554_v36, 4  ;;  %v5040_v28 = vld [vmem:[#allocation20_spill] sm:$0xff] }
 0x1af   :  { %v2562_v24 = vrot.slane %v2561_v49, 4  ;;  %v146_v42 = vmul.f32 %v5032_v10, %v5032_v10  ;;  %v5034_v25 = vrot.slane %v5033_v47, 1  ;;  %v5036_v3 = vrot.slane %v5035_v63, 1 }
 0x1b0   :  { %v315_v39 = vmul.f32 256.0, %v311_v62  ;;  %v211_v6 = vadd.f32 %v5038_v19, %v5037_v38  ;;  %2997 = vrsqrt.f32 %v326_v31  ;;  %v2556_v8 = vadd.f32 %v2555_v33, %v2554_v36 }
 0x1b1   :  { %v2624_v60 = vadd.f32 %v5034_v25, %v5033_v47  ;;  %v2631_v5 = vadd.f32 %v5036_v3, %v5035_v63  ;;  %v2563_v44 = vadd.f32 %v2562_v24, %v2561_v49  ;;  %v85_v29 = vmul.f32 %v5039_v48, %v5039_v48 }
 0x1b2   :  { %v319_v35 = vadd.f32 %v315_v39, %v291_v46  ;;  %v215_v59 = vmul.f32 %v5038_v19, %v5038_v19  ;;  %v280_v37 = vadd.f32 %v5040_v28, %v211_v6  ;;  %v2438_v57 = vrot.slane %v276_v16, %v3310_v30 }
 0x1b3   :  { %v2557_v20 = vrot.slane %v2556_v8, 2  ;;  %v2564_v62 = vrot.slane %v2563_v44, 2  ;;  %v150_v10 = vadd.f32 %v146_v42, %v85_v29  ;;  %v2445_v47 = vrot.slane %v276_v16, %v3314_v41 }
 0x1b4   :  { %v323_v25 = vmul.f32 0.0009765625, %v319_v35  ;;  %v284_v31 = vmul.f32 %v5040_v28, %v5040_v28  ;;  %v4164_v36 = vmul.f32 0.25, %v280_v37  ;;  %v2568_v46 = vsel %vm501_vm0, %v2438_v57, 0.0  ;;  %v4167_v49 = vpop.eup %2993 }
 0x1b5   :  { %v2671_v33 = vmax.f32 %v4136_v34, 0.0  ;;  %v2558_v24 = vadd.f32 %v2557_v20, %v2556_v8  ;;  %v2565_v39 = vadd.f32 %v2564_v62, %v2563_v44  ;;  %v2569_v30 = vrot.slane %v2568_v46, 4  ;;  %v4170_v63 = vpop.eup %2995 }
 0x1b6   :  { %v327_v42 = vadd.f32 1e-05, %v323_v25  ;;  %v219_v3 = vadd.f32 %v215_v59, %v150_v10  ;;  %v300_v41 = vmul.f32 4.0, %v4164_v36  ;;  %v2575_v38 = vsel %vm501_vm0, %v2445_v47, 0.0  ;;  %v5041_v59 = vld [vmem:[#allocation36_spill] sm:$0xff] }
 0x1b7   :  { %v2650_v19 = vmul.f32 256.0, %v2624_v60  ;;  %v2559_v6 = vrot.slane %v2558_v24, 1  ;;  %v2566_v48 = vrot.slane %v2565_v39, 1  ;;  %v2576_v29 = vrot.slane %v2575_v38, 4 }
 0x1b8   :  { %v2651_v35 = vmul.f32 256.0, %v2631_v5  ;;  %2999 = vrsqrt.f32 %v327_v42  ;;  %v288_v28 = vadd.f32 %v284_v31, %v219_v3  ;;  %v304_v34 = vmul.f32 %v300_v41, %v4164_v36 }
 0x1b9   :  { %v2560_v8 = vadd.f32 %v2559_v6, %v2558_v24  ;;  %v2567_v44 = vadd.f32 %v2566_v48, %v2565_v39  ;;  %v2570_v37 = vadd.f32 %v2569_v30, %v2568_v46  ;;  %v2577_v57 = vadd.f32 %v2576_v29, %v2575_v38 }
 0x1ba   :  { %3001 = vrsqrt.f32 %v4130_v51  ;;  %v2021_v20 = vadd.f32 %v5041_v59, %v4124_v43  ;;  %v2551_v62 = vadd.f32 %v2550_v14, %v4119_v4  ;;  %v308_v60 = vsub.f32 %v288_v28, %v304_v34  ;;  %v4179_v10 = vpop.eup %2997  ;;  %v4186_v51 = vld [vmem:[%s4893_s1] sm:$0xff] }
 0x1bb   :  { %v2678_v47 = vadd.f32 1e-05, %v2670_v53  ;;  %v2545_v5 = vrot.slane %v4138_v27, 1  ;;  %v2658_v25 = vadd.f32 %v2650_v19, %v2560_v8  ;;  %v2659_v31 = vadd.f32 %v2651_v35, %v2567_v44 }
 0x1bc   :  { %v2679_v42 = vadd.f32 1e-05, %v2671_v33  ;;  %v312_v24 = vmax.f32 %v308_v60, 0.0  ;;  %v292_v46 = vadd.f32 %v276_v16, %v4046_v52  ;;  %v337_v4 = vmul.f32 %v4186_v51, %v4036_v54  ;;  %v4194_v33 = vld [vmem:[%s4893_s1 + $0x8] sm:$0xff]  ;;  %v5042_v16 = vld [vmem:[#allocation42_spill] sm:$0xff] }
 0x1bd   :  { %v2666_v43 = vmul.f32 0.0009765625, %v2658_v25  ;;  %v2667_v14 = vmul.f32 0.0009765625, %v2659_v31  ;;  %v2571_v39 = vrot.slane %v2570_v37, 2  ;;  %v2578_v53 = vrot.slane %v2577_v57, 2  ;;  %v5045_v25 = vld [vmem:[#allocation37_spill] sm:$0xff] }
 0x1be   :  { %v316_v30 = vmul.f32 256.0, %v312_v24  ;;  %v341_v3 = vmul.f32 %v4170_v63, %v337_v4  ;;  %v338_v52 = vmul.f32 %v4194_v33, %v4089_v26  ;;  %v5043_v41 = vmax.f32 %v5042_v16, 0.0  ;;  %v5051_v16 = vld [vmem:[#allocation44_spill] sm:$0xff] }
 0x1bf   :  { %3003 = vrsqrt.f32 %v2678_v47  ;;  %v2552_v54 = vrot.slane %v2551_v62, 1  ;;  %v2674_v19 = vmax.f32 %v2666_v43, 0.0  ;;  %v2675_v6 = vmax.f32 %v2667_v14, 0.0 }
 0x1c0   :  { %v726_v38 = vadd.f32 1e-05, %v5043_v41  ;;  %v320_v48 = vadd.f32 %v316_v30, %v292_v46  ;;  %349 = vrot.lane.b32.xlu0 %v341_v3, %s3149_s8  ;;  %v342_v29 = vmul.f32 %v4179_v10, %v338_v52  ;;  %v5044_v35 = vmax.f32 %v3877_v56, 0.0  ;;  %v4213_v56 = vld [vmem:[%s4893_s1 + $0x10] sm:$0xff] }
 0x1c1   :  { %v2682_v34 = vadd.f32 1e-05, %v2674_v19  ;;  %v2683_v26 = vadd.f32 1e-05, %v2675_v6  ;;  %v2572_v8 = vadd.f32 %v2571_v39, %v2570_v37  ;;  %v2546_v59 = vadd.f32 %v2545_v5, %v4138_v27  ;;  %v5048_v39 = vld [vmem:[#allocation43_spill] sm:$0xff] }
 0x1c2   :  { %v727_v28 = vadd.f32 1e-05, %v5044_v35  ;;  %3005 = vrsqrt.f32 %v726_v38  ;;  %v4204_v44 = vpop.eup %2999  ;;  %v324_v60 = vmul.f32 0.0009765625, %v320_v48  ;;  %v2579_v47 = vadd.f32 %v2578_v53, %v2577_v57  ;;  %351 = vrot.lane.b32.xlu1 %v342_v29, %s3149_s8 }
 0x1c3   :  { %3007 = vrsqrt.f32 %v2679_v42  ;;  %v2022_v31 = vadd.f32 %v5045_v25, %v4127_v9  ;;  %v2553_v24 = vadd.f32 %v2552_v54, %v2551_v62  ;;  %v339_v37 = vmul.f32 %v4213_v56, %v4113_v40 }
 0x1c4   :  { %3009 = vrsqrt.f32 %v727_v28  ;;  %v4217_v42 = vpop.eup %3001  ;;  %v328_v27 = vadd.f32 1e-05, %v324_v60  ;;  %v5046_v57 = vmax.f32 %v3931_v55, 0.0  ;;  %v5047_v46 = vmax.f32 %v3945_v45, 0.0 }
 0x1c5   :  { %3011 = vrsqrt.f32 %v2682_v34  ;;  %v2026_v62 = vmul.f32 0.0009765625, %v4065_v32  ;;  %v2033_v4 = vmax.f32 %v4116_v7, 0.0  ;;  %v2573_v43 = vrot.slane %v2572_v8, 1 }
 0x1c6   :  { %3013 = vrsqrt.f32 %v2683_v26  ;;  %v730_v5 = vadd.f32 1e-05, %v5046_v57  ;;  %v731_v9 = vadd.f32 1e-05, %v5047_v46  ;;  %v343_v14 = vmul.f32 %v4204_v44, %v339_v37 }
 0x1c7   :  { %v2656_v53 = vadd.f32 %v5048_v39, %v2546_v59  ;;  %3015 = vrsqrt.f32 %v328_v27  ;;  %v2580_v40 = vrot.slane %v2579_v47, 1  ;;  %v5049_v30 = vmax.f32 %v3965_v13, 0.0 }
 0x1c8   :  { %v2029_v52 = vmul.f32 0.0009765625, %v2021_v20  ;;  %v2030_v55 = vmul.f32 0.0009765625, %v2022_v31  ;;  %353 = vrot.lane.b32.xlu1 %v343_v14, %s3149_s8  ;;  %3017 = vrsqrt.f32 %v730_v5  ;;  %v5050_v45 = vmax.f32 %v3980_v18, 0.0 }
 0x1c9   :  { %v1402_v3 = vadd.f32 1e-05, %v5049_v30  ;;  %v2657_v7 = vadd.f32 %v5051_v16, %v2553_v24  ;;  %3019 = vrsqrt.f32 %v731_v9  ;;  %v5052_v41 = vmax.f32 %v3904_v22, 0.0  ;;  %v4237_v6 = vpop.eup %3003 }
 0x1ca   :  { %v1403_v32 = vadd.f32 1e-05, %v5050_v45  ;;  %v5053_v54 = vmax.f32 %v3910_v2, 0.0  ;;  %v2034_v13 = vmax.f32 %v2026_v62, 0.0  ;;  %v2574_v20 = vadd.f32 %v2573_v43, %v2572_v8 }
 0x1cb   :  { %v728_v38 = vadd.f32 1e-05, %v5052_v41  ;;  %3021 = vrsqrt.f32 %v1402_v3  ;;  %v5054_v48 = vmax.f32 %v4009_v15, 0.0  ;;  %v2664_v18 = vmul.f32 0.0009765625, %v2656_v53 }
 0x1cc   :  { %v729_v19 = vadd.f32 1e-05, %v5053_v54  ;;  %v3006_v35 = vpop.eup %3005  ;;  %v2581_v28 = vadd.f32 %v2580_v40, %v2579_v47  ;;  %3023 = vrsqrt.f32 %v1403_v32  ;;  %v5055_v34 = vmax.f32 %v4040_v21, 0.0 }
 0x1cd   :  { %v1406_v29 = vadd.f32 1e-05, %v5054_v48  ;;  %v4243_v22 = vpop.eup %3007  ;;  %v4246_v2 = vmul.f32 0.0009765625, %v4053_v11  ;;  %v2037_v59 = vmax.f32 %v2029_v52, 0.0  ;;  %3025 = vrsqrt.f32 %v728_v38 }
 0x1ce   :  { %v1407_v26 = vadd.f32 1e-05, %v5055_v34  ;;  %v5056_v8 = vmax.f32 %v3947_v61, 0.0  ;;  %v3010_v25 = vpop.eup %3009  ;;  %v2038_v15 = vmax.f32 %v2030_v55, 0.0  ;;  %v2665_v31 = vmul.f32 0.0009765625, %v2657_v7 }
 0x1cf   :  { %3027 = vrsqrt.f32 %v729_v19  ;;  %v5057_v47 = vmax.f32 %v3954_v23, 0.0  ;;  %v4252_v37 = vpop.eup %3011  ;;  %v2660_v21 = vadd.f32 %v3902_v1, %v2574_v20  ;;  %v808_v27 = vcombine.low %v3006_v35, %v3010_v25  ;;  %v4262_v23 = vld [vmem:[%s4893_s1 + $0x18] sm:$0xff]  ;;  %v5061_v19 = vld [vmem:[#allocation45_spill] sm:$0xff]  ;;  %s3151_s1 = smov 127  }
 0x1d0   :  { %v732_v60 = vadd.f32 1e-05, %v5056_v8  ;;  %3029 = vrsqrt.f32 %v1406_v29  ;;  %v2041_v11 = vadd.f32 1e-05, %v2033_v4  ;;  %v4255_v57 = vpop.eup %3013  ;;  %v2672_v5 = vmax.f32 %v2664_v18, 0.0 }
 0x1d1   :  { %v733_v24 = vadd.f32 1e-05, %v5057_v47  ;;  %v2661_v61 = vadd.f32 %v3908_v58, %v2581_v28  ;;  %3031 = vrsqrt.f32 %v1407_v26  ;;  %v2042_v46 = vadd.f32 1e-05, %v2034_v13  ;;  %812 = vrot.lane.b32.xlu0 %v808_v27, %s3148_s3  ;;  %v4270_v58 = vpop.eup %3015 }
 0x1d2   :  { %v340_v1 = vmul.f32 %v4262_v23, %v4164_v36  ;;  %3033 = vrsqrt.f32 %v732_v60  ;;  %v5058_v9 = vmax.f32 %v3956_v50, 0.0  ;;  %v2123_v4 = vcombine.low %v4167_v49, %v4217_v42  ;;  %v3018_v36 = vpop.eup %3017 }
 0x1d3   :  { %3035 = vrsqrt.f32 %v733_v24  ;;  %v5059_v43 = vmax.f32 %v3958_v0, 0.0  ;;  %v2760_v39 = vcombine.low %v4237_v6, %v4243_v22  ;;  %v2762_v53 = vcombine.low %v4252_v37, %v4255_v57  ;;  %v3020_v3 = vpop.eup %3019 }
 0x1d4   :  { %v1400_v62 = vadd.f32 1e-05, %v5058_v9  ;;  %v2668_v40 = vmul.f32 0.0009765625, %v2660_v21  ;;  %v344_v50 = vmul.f32 %v4270_v58, %v340_v1  ;;  %3037 = vrsqrt.f32 %v2041_v11 }
 0x1d5   :  { %v1401_v14 = vadd.f32 1e-05, %v5059_v43  ;;  %v2045_v30 = vadd.f32 1e-05, %v2037_v59  ;;  %v2673_v52 = vmax.f32 %v2665_v31, 0.0  ;;  %v2669_v55 = vmul.f32 0.0009765625, %v2661_v61  ;;  %v3022_v32 = vpop.eup %3021 }
 0x1d6   :  { %3039 = vrsqrt.f32 %v2042_v46  ;;  %v2046_v45 = vadd.f32 1e-05, %v2038_v15  ;;  %v2031_v0 = vmax.f32 %v4059_v17, 0.0  ;;  %v810_v16 = vcombine.low %v3018_v36, %v3020_v3  ;;  %355 = vrot.lane.b32.xlu1 %v344_v50, %s3149_s8  ;;  %v3024_v38 = vpop.eup %3023 }
 0x1d7   :  { %3041 = vrsqrt.f32 %v1400_v62  ;;  %v5060_v7 = vmax.f32 %v3987_v12, 0.0  ;;  %v2032_v54 = vmax.f32 %v4246_v2, 0.0  ;;  %v5062_v13 = vmax.f32 %v5061_v19, 0.0  ;;  %v3026_v48 = vpop.eup %3025 }
 0x1d8   :  { %3043 = vrsqrt.f32 %v1401_v14  ;;  %v2676_v29 = vmax.f32 %v2668_v40, 0.0  ;;  %816 = vrot.lane.b32.xlu0 %v810_v16, %s3148_s3  ;;  %v1483_v35 = vcombine.low %v3022_v32, %v3024_v38  ;;  %v2680_v17 = vadd.f32 1e-05, %v2672_v5  ;;  %v883_v16 = vpop.permute.xlu1 %882 }
 0x1d9   :  { %v1404_v41 = vadd.f32 1e-05, %v5060_v7  ;;  %v1405_v20 = vadd.f32 1e-05, %v5062_v13  ;;  %3045 = vrsqrt.f32 %v2045_v30  ;;  %v3028_v18 = vpop.eup %3027  ;;  %v2677_v28 = vmax.f32 %v2669_v55, 0.0  ;;  %v881_v7 = vpop.permute.xlu0 %880 }
 0x1da   :  { %3047 = vrsqrt.f32 %v2046_v45  ;;  %v2681_v34 = vadd.f32 1e-05, %v2673_v52  ;;  %v3030_v12 = vpop.eup %3029  ;;  %v809_v26 = vcombine.low %v3026_v48, %v3028_v18  ;;  %v2039_v59 = vadd.f32 1e-05, %v2031_v0 }
 0x1db   :  { %3049 = vrsqrt.f32 %v1404_v41  ;;  %v3032_v2 = vpop.eup %3031  ;;  %v2040_v8 = vadd.f32 1e-05, %v2032_v54  ;;  %v2684_v15 = vadd.f32 1e-05, %v2676_v29  ;;  %v2685_v47 = vadd.f32 1e-05, %v2677_v28 }
 0x1dc   :  { %3051 = vrsqrt.f32 %v1405_v20  ;;  %v3034_v60 = vpop.eup %3033  ;;  %1488 = vrot.lane.b32.xlu0 %v1483_v35, %s3148_s3  ;;  %814 = vrot.lane.b32.xlu1 %v809_v26, %s3148_s3  ;;  %v1485_v25 = vcombine.low %v3030_v12, %v3032_v2  ;;  %v887_v41 = vpop.permute.xlu1 %886  ;;  %v3150_v20 = vmov 0   ;;  %v892_v26 = vmul.f32 %v4186_v51, %v881_v7 }
 0x1dd   :  { %3053 = vrsqrt.f32 %v2680_v17  ;;  %v3036_v31 = vpop.eup %3035  ;;  %v885_v38 = vpop.permute.xlu0 %884  ;;  %2981 = vset.pattern.permute.xlu0 %v3150_v20  ;;  %2982 = vset.pattern.permute.xlu1 %v3150_v20 }
 0x1de   :  { %3055 = vrsqrt.f32 %v2681_v34  ;;  %v3038_v24 = vpop.eup %3037  ;;  %v811_v21 = vcombine.low %v3034_v60, %v3036_v31 }
 0x1df   :  { %3057 = vrsqrt.f32 %v2039_v59 }
 0x1e0   :  { %v3040_v27 = vpop.eup %3039  ;;  %3059 = vrsqrt.f32 %v2040_v8  ;;  %1492 = vrot.lane.b32.xlu0 %v1485_v25, %s3148_s3  ;;  %818 = vrot.lane.b32.xlu1 %v811_v21, %s3148_s3  ;;  %v1535_v54 = vpop.permute.xlu1 %1534  ;;  %v894_v25 = vmul.f32 %v4213_v56, %v885_v38  ;;  %v893_v21 = vmul.f32 %v4194_v33, %v883_v16 }
 0x1e1   :  { %v3042_v11 = vpop.eup %3041  ;;  %v2122_v5 = vcombine.low %v3038_v24, %v3040_v27  ;;  %3061 = vrsqrt.f32 %v2684_v15  ;;  %v1537_v19 = vpop.permute.xlu0 %1536 }
 0x1e2   :  { %v3044_v61 = vpop.eup %3043  ;;  %3063 = vrsqrt.f32 %v2685_v47 }
 0x1e3   :  { %v3046_v46 = vpop.eup %3045  ;;  %v1482_v1 = vcombine.low %v3042_v11, %v3044_v61  ;;  %v895_v61 = vmul.f32 %v4262_v23, %v887_v41 }
 0x1e4   :  { %v3048_v9 = vpop.eup %3047  ;;  %2127 = vrot.lane.b32.xlu0 %v2122_v5, %s3148_s3  ;;  %v4310_v13 = vpop.permute.xlu1 %1538 }
 0x1e5   :  { %v3050_v62 = vpop.eup %3049  ;;  %1486 = vrot.lane.b32.xlu1 %v1482_v1, %s3148_s3  ;;  %v2124_v43 = vcombine.low %v3046_v46, %v3048_v9  ;;  %v4312_v49 = vpop.permute.xlu0 %1540 }
 0x1e6   :  { %v3052_v14 = vpop.eup %3051 }
 0x1e7   :  { %v3054_v36 = vpop.eup %3053  ;;  %v1484_v40 = vcombine.low %v3050_v62, %v3052_v14 }
 0x1e8   :  { %v3056_v50 = vpop.eup %3055  ;;  %2131 = vrot.lane.b32.xlu0 %v2124_v43, %s3148_s3  ;;  %v4314_v42 = vpop.permute.xlu1 %2173  ;;  %v1547_v43 = vmul.f32 %v4194_v33, %v1537_v19 }
 0x1e9   :  { %v3058_v30 = vpop.eup %3057  ;;  %1490 = vrot.lane.b32.xlu1 %v1484_v40, %s3148_s3  ;;  %v2761_v3 = vcombine.low %v3054_v36, %v3056_v50 }
 0x1ea   :  { %v3060_v52 = vpop.eup %3059 }
 0x1eb   :  { %v3062_v55 = vpop.eup %3061  ;;  %v2121_v45 = vcombine.low %v3058_v30, %v3060_v52  ;;  %v1546_v52 = vmul.f32 %v4186_v51, %v1535_v54 }
 0x1ec   :  { %v3064_v32 = vpop.eup %3063  ;;  %2766 = vrot.lane.b32.xlu0 %v2761_v3, %s3148_s3  ;;  %v4318_v6 = vpop.permute.xlu1 %2177 }
 0x1ed   :  { %2125 = vrot.lane.b32.xlu1 %v2121_v45, %s3148_s3  ;;  %v2763_v0 = vcombine.low %v3062_v55, %v3064_v32 }
 0x1f0   :  { %2770 = vrot.lane.b32.xlu0 %v2763_v0, %s3148_s3  ;;  %v4322_v37 = vpop.permute.xlu1 %2812 }
 0x1f1   :  { %2129 = vrot.lane.b32.xlu1 %v2123_v4, %s3148_s3  ;;  %v4316_v4 = vpop.permute.xlu0 %2175 }
 0x1f5   :  { %2764 = vrot.lane.b32.xlu1 %v2760_v39, %s3148_s3  ;;  %v4320_v22 = vpop.permute.xlu0 %2179  ;;  %v4326_v39 = vpop.permute.xlu1 %2816 }
 0x1f9   :  { %2768 = vrot.lane.b32.xlu1 %v2762_v53, %s3148_s3  ;;  %v4324_v57 = vpop.permute.xlu0 %2814 }
 0x1fd   :  { %v4328_v53 = vpop.permute.xlu0 %2818 }
 0x232   :  { %v4334_v29 = vpop.permute.xlu0 %349 }
 0x234   :  { %v4332_v48 = vpop.permute.xlu1 %351 }
 0x23a   :  { %v4336_v35 = vpop.permute.xlu1 %353 }
 0x243   :  { %v813_v17 = vpop.permute.xlu0 %812 }
 0x244   :  { %v824_v18 = vmul.f32 %v4186_v51, %v813_v17  ;;  %v896_v8 = vmul.f32 %v892_v26, %v813_v17  ;;  %v1549_v17 = vmul.f32 %v4262_v23, %v4312_v49  ;;  %v2186_v26 = vmul.f32 %v4194_v33, %v4316_v4 }
 0x245   :  { %v1548_v49 = vmul.f32 %v4213_v56, %v4310_v13  ;;  %v2185_v4 = vmul.f32 %v4186_v51, %v4314_v42 }
 0x246   :  { %832 = vrot.lane.b32.xlu0 %v824_v18, %s3145_s24 }
 0x248   :  { %v4340_v28 = vpop.permute.xlu1 %355 }
 0x24a   :  { %v817_v34 = vpop.permute.xlu0 %816 }
 0x24b   :  { %v826_v12 = vmul.f32 %v4213_v56, %v817_v34  ;;  %v898_v31 = vmul.f32 %v894_v25, %v817_v34 }
 0x24d   :  { %836 = vrot.lane.b32.xlu0 %v826_v12, %s3145_s24 }
 0x24e   :  { %v1489_v59 = vpop.permute.xlu0 %1488  ;;  %v815_v2 = vpop.permute.xlu1 %814 }
 0x24f   :  { %v825_v60 = vmul.f32 %v4194_v33, %v815_v2  ;;  %v1499_v11 = vmul.f32 %v4194_v33, %v1489_v59  ;;  %v897_v5 = vmul.f32 %v893_v21, %v815_v2  ;;  %v1551_v14 = vmul.f32 %v1547_v43, %v1489_v59 }
 0x251   :  { %904 = vrot.lane.b32.xlu0 %v896_v8, %s3151_s1  ;;  %834 = vrot.lane.b32.xlu1 %v825_v60, %s3145_s24  ;;  %v2188_v8 = vmul.f32 %v4262_v23, %v4320_v22  ;;  %v2187_v22 = vmul.f32 %v4213_v56, %v4318_v6  ;;  %v2826_v6 = vmul.f32 %v4213_v56, %v4326_v39 }
 0x252   :  { %v819_v15 = vpop.permute.xlu1 %818  ;;  %v1493_v24 = vpop.permute.xlu0 %1492 }
 0x253   :  { %v827_v47 = vmul.f32 %v4262_v23, %v819_v15  ;;  %v1501_v1 = vmul.f32 %v4262_v23, %v1493_v24  ;;  %v899_v9 = vmul.f32 %v895_v61, %v819_v15  ;;  %v1553_v18 = vmul.f32 %v1549_v17, %v1493_v24 }
 0x254   :  { %v2825_v15 = vmul.f32 %v4194_v33, %v4324_v57  ;;  %v2824_v57 = vmul.f32 %v4186_v51, %v4322_v37  ;;  %v4421_v61 = vmul.f32 %v4194_v33, %v4179_v10  ;;  %v361_v10 = vsub.f32 %v4186_v51, %v4334_v29 }
 0x255   :  { %908 = vrot.lane.b32.xlu0 %v898_v31, %s3151_s1  ;;  %838 = vrot.lane.b32.xlu1 %v827_v47, %s3145_s24  ;;  %v2827_v47 = vmul.f32 %v4262_v23, %v4328_v53 }
 0x256   :  { %v2128_v46 = vpop.permute.xlu0 %2127 }
 0x257   :  { %v1487_v27 = vpop.permute.xlu1 %1486  ;;  %v2138_v30 = vmul.f32 %v4194_v33, %v2128_v46  ;;  %v2190_v59 = vmul.f32 %v2186_v26, %v2128_v46 }
 0x258   :  { %v1498_v36 = vmul.f32 %v4186_v51, %v1487_v27  ;;  %v1550_v45 = vmul.f32 %v1546_v52, %v1487_v27  ;;  %v4416_v27 = vmul.f32 %v4186_v51, %v4170_v63  ;;  %v4428_v63 = vmul.f32 %v4213_v56, %v4204_v44  ;;  %v5064_v44 = vld [vmem:[#allocation24_spill] sm:$0xff] }
 0x259   :  { %1508 = vrot.lane.b32.xlu0 %v1499_v11, %s3145_s24  ;;  %906 = vrot.lane.b32.xlu1 %v897_v5, %s3151_s1  ;;  %v3152_v52 = vmov 1  }
 0x25a   :  { %v2132_v40 = vpop.permute.xlu0 %2131 }
 0x25b   :  { %v1491_v62 = vpop.permute.xlu1 %1490  ;;  %v2140_v32 = vmul.f32 %v4262_v23, %v2132_v40  ;;  %v2192_v60 = vmul.f32 %v2188_v8, %v2132_v40 }
 0x25c   :  { %v1500_v3 = vmul.f32 %v4213_v56, %v1491_v62  ;;  %v1552_v25 = vmul.f32 %v1548_v49, %v1491_v62  ;;  %v4432_v62 = vmul.f32 %v4262_v23, %v4270_v58  ;;  %v363_v58 = vsub.f32 %v4213_v56, %v4336_v35 }
 0x25d   :  { %1512 = vrot.lane.b32.xlu0 %v1501_v1, %s3145_s24  ;;  %910 = vrot.lane.b32.xlu1 %v899_v9, %s3151_s1  ;;  %v362_v9 = vsub.f32 %v4194_v33, %v4332_v48  ;;  %v4442_v48 = vadd.f32 %v5064_v44, %v361_v10 }
 0x25e   :  { %v2767_v55 = vpop.permute.xlu0 %2766 }
 0x25f   :  { %v2126_v50 = vpop.permute.xlu1 %2125  ;;  %v2777_v16 = vmul.f32 %v4194_v33, %v2767_v55  ;;  %v2829_v13 = vmul.f32 %v2825_v15, %v2767_v55  ;;  %v5065_v55 = vld [vmem:[#allocation25_spill] sm:$0xff] }
 0x260   :  { %v2137_v7 = vmul.f32 %v4186_v51, %v2126_v50  ;;  %v2189_v31 = vmul.f32 %v2185_v4, %v2126_v50  ;;  %v5063_v50 = vld [vmem:[#allocation27_spill] sm:$0xff] }
 0x261   :  { %1560 = vrot.lane.b32.xlu0 %v1551_v14, %s3151_s1  ;;  %1506 = vrot.lane.b32.xlu1 %v1498_v36, %s3145_s24  ;;  %v4439_v33 = vadd.f32 %v5063_v50, %v362_v9 }
 0x262   :  { %v2771_v41 = vpop.permute.xlu0 %2770 }
 0x263   :  { %v2130_v0 = vpop.permute.xlu1 %2129  ;;  %v2779_v54 = vmul.f32 %v4262_v23, %v2771_v41  ;;  %v2831_v42 = vmul.f32 %v2827_v47, %v2771_v41 }
 0x264   :  { %v2139_v19 = vmul.f32 %v4213_v56, %v2130_v0  ;;  %v2191_v24 = vmul.f32 %v2187_v22, %v2130_v0 }
 0x265   :  { %2147 = vrot.lane.b32.xlu0 %v2138_v30, %s3145_s24  ;;  %1510 = vrot.lane.b32.xlu1 %v1500_v3, %s3145_s24 }
 0x267   :  { %v2765_v38 = vpop.permute.xlu1 %2764 }
 0x268   :  { %v2776_v34 = vmul.f32 %v4186_v51, %v2765_v38  ;;  %v2828_v21 = vmul.f32 %v2824_v57, %v2765_v38 }
 0x269   :  { %2151 = vrot.lane.b32.xlu0 %v2140_v32, %s3145_s24  ;;  %1558 = vrot.lane.b32.xlu1 %v1550_v45, %s3151_s1  ;;  %v4451_v45 = vadd.f32 %v5065_v55, %v363_v58  ;;  %v364_v32 = vsub.f32 %v4262_v23, %v4340_v28  ;;  %v4512_v55 = vld [vmem:[#allocation2 + $0x28] sm:$0xff] }
 0x26b   :  { %v2769_v12 = vpop.permute.xlu1 %2768 }
 0x26c   :  { %v2778_v2 = vmul.f32 %v4213_v56, %v2769_v12  ;;  %v2830_v53 = vmul.f32 %v2826_v6, %v2769_v12 }
 0x26d   :  { %2786 = vrot.lane.b32.xlu0 %v2777_v16, %s3145_s24  ;;  %2145 = vrot.lane.b32.xlu1 %v2137_v7, %s3145_s24  ;;  %v5066_v7 = vld [vmem:[#allocation29_spill] sm:$0xff] }
 0x26e   :  { %v4458_v41 = vadd.f32 %v5066_v7, %v364_v32  ;;  %v765_v32 = vmul.f32 %v4512_v55, %v4512_v55 }
 0x271   :  { %2790 = vrot.lane.b32.xlu0 %v2779_v54, %s3145_s24  ;;  %2149 = vrot.lane.b32.xlu1 %v2139_v19, %s3145_s24 }
 0x275   :  { %1564 = vrot.lane.b32.xlu0 %v1553_v18, %s3151_s1  ;;  %2784 = vrot.lane.b32.xlu1 %v2776_v34, %s3145_s24 }
 0x279   :  { %2199 = vrot.lane.b32.xlu0 %v2190_v59, %s3151_s1  ;;  %2788 = vrot.lane.b32.xlu1 %v2778_v2, %s3145_s24 }
 0x27d   :  { %2203 = vrot.lane.b32.xlu0 %v2192_v60, %s3151_s1  ;;  %1562 = vrot.lane.b32.xlu1 %v1552_v25, %s3151_s1 }
 0x281   :  { %2838 = vrot.lane.b32.xlu0 %v2829_v13, %s3151_s1  ;;  %2197 = vrot.lane.b32.xlu1 %v2189_v31, %s3151_s1 }
 0x285   :  { %2842 = vrot.lane.b32.xlu0 %v2831_v42, %s3151_s1  ;;  %2201 = vrot.lane.b32.xlu1 %v2191_v24, %s3151_s1 }
 0x289   :  { %2836 = vrot.lane.b32.xlu1 %v2828_v21, %s3151_s1 }
 0x28d   :  { %2840 = vrot.lane.b32.xlu1 %v2830_v53, %s3151_s1 }
 0x2b8   :  { %v833_v11 = vpop.permute.xlu0 %832 }
 0x2b9   :  { %v844_v37 = vadd.f32 %v833_v11, %v4416_v27 }
 0x2bb   :  { %922 = vperm.xlu0 %2981, %v844_v37  }
 0x2bf   :  { %v837_v5 = vpop.permute.xlu0 %836 }
 0x2c0   :  { %v846_v36 = vadd.f32 %v837_v5, %v4428_v63 }
 0x2c3   :  { %v905_v46 = vpop.permute.xlu0 %904  ;;  %v835_v39 = vpop.permute.xlu1 %834 }
 0x2c4   :  { %v845_v1 = vadd.f32 %v835_v39, %v4421_v61  ;;  %v916_v29 = vsub.f32 %v4442_v48, %v905_v46  ;;  %v4483_v46 = vld [vmem:[#allocation2] sm:$0xff] }
 0x2c5   :  { %v760_v39 = vmul.f32 %v4483_v46, %v4483_v46 }
 0x2c6   :  { %927 = vperm.xlu1 %2982, %v845_v1   ;;  %v4487_v1 = vld [vmem:[#allocation2 + $0x10] sm:$0xff] }
 0x2c7   :  { %v909_v43 = vpop.permute.xlu0 %908  ;;  %v839_v14 = vpop.permute.xlu1 %838  ;;  %v742_v9 = vadd.f32 %v4487_v1, %v4483_v46 }
 0x2c8   :  { %v847_v40 = vadd.f32 %v839_v14, %v4432_v62  ;;  %v918_v56 = vsub.f32 %v4451_v45, %v909_v43  ;;  %v4495_v14 = vld [vmem:[#allocation2 + $0x8] sm:$0xff] }
 0x2ca   :  { %937 = vperm.xlu0 %2981, %v847_v40   ;;  %932 = vperm.xlu1 %2982, %v846_v36   ;;  %v761_v36 = vmul.f32 %v4495_v14, %v4495_v14  ;;  %v4499_v40 = vld [vmem:[#allocation2 + $0x18] sm:$0xff] }
 0x2cb   :  { %v1509_v30 = vpop.permute.xlu0 %1508  ;;  %v907_v3 = vpop.permute.xlu1 %906  ;;  %v763_v50 = vmul.f32 %v4499_v40, %v4499_v40  ;;  %v751_v58 = vadd.f32 %v4499_v40, %v4495_v14 }
 0x2cc   :  { %v917_v51 = vsub.f32 %v4439_v33, %v907_v3  ;;  %v1519_v35 = vadd.f32 %v1509_v30, %v4421_v61 }
 0x2ce   :  { %2984 = vset.pattern.permute.xlu0 %v3152_v52  ;;  %2983 = vset.pattern.permute.xlu1 %v3152_v52 }
 0x2cf   :  { %v1513_v0 = vpop.permute.xlu0 %1512  ;;  %v911_v16 = vpop.permute.xlu1 %910  ;;  %955 = vperm.xlu0 %2984, %v917_v51   ;;  %950 = vperm.xlu1 %2983, %v916_v29  }
 0x2d0   :  { %v919_v19 = vsub.f32 %v4458_v41, %v911_v16  ;;  %v1521_v8 = vadd.f32 %v1513_v0, %v4432_v62  ;;  %v777_v0 = vadd.f32 %v763_v50, %v761_v36 }
 0x2d3   :  { %v1561_v38 = vpop.permute.xlu0 %1560  ;;  %v1507_v54 = vpop.permute.xlu1 %1506  ;;  %2986 = vset.pattern.permute.xlu0 %v3150_v20  ;;  %960 = vperm.xlu1 %2983, %v918_v56   ;;  %v752_v56 = vadd.f32 %v4512_v55, %v751_v58 }
 0x2d4   :  { %1581 = vperm.xlu0 %2986, %v1519_v35   ;;  %v1518_v17 = vadd.f32 %v1507_v54, %v4416_v27  ;;  %v1571_v4 = vsub.f32 %v4439_v33, %v1561_v38  ;;  %v4518_v35 = vld [vmem:[#allocation2 + $0x30] sm:$0xff] }
 0x2d5   :  { %v766_v7 = vmul.f32 %v4518_v35, %v4518_v35 }
 0x2d7   :  { %v2148_v23 = vpop.permute.xlu0 %2147  ;;  %v1511_v28 = vpop.permute.xlu1 %1510  ;;  %965 = vperm.xlu1 %2983, %v919_v19   ;;  %v4524_v19 = vld [vmem:[#allocation2 + $0x38] sm:$0xff] }
 0x2d8   :  { %2987 = vset.pattern.permute.xlu0 %v3152_v52  ;;  %v1520_v26 = vadd.f32 %v1511_v28, %v4428_v63  ;;  %v2158_v49 = vadd.f32 %v2148_v23, %v4421_v61  ;;  %v767_v23 = vmul.f32 %v4524_v19, %v4524_v19  ;;  %v753_v28 = vadd.f32 %v4524_v19, %v752_v56 }
 0x2db   :  { %v2152_v18 = vpop.permute.xlu0 %2151  ;;  %v1559_v34 = vpop.permute.xlu1 %1558  ;;  %2985 = vset.pattern.permute.xlu1 %v3150_v20 }
 0x2dc   :  { %v1570_v12 = vsub.f32 %v4442_v48, %v1559_v34  ;;  %1576 = vperm.xlu1 %2985, %v1518_v17   ;;  %v2160_v11 = vadd.f32 %v2152_v18, %v4432_v62 }
 0x2de   :  { %1604 = vperm.xlu0 %2987, %v1570_v12  }
 0x2df   :  { %v2787_v59 = vpop.permute.xlu0 %2786  ;;  %v2146_v2 = vpop.permute.xlu1 %2145 }
 0x2e0   :  { %1586 = vperm.xlu1 %2985, %v1520_v26   ;;  %v2157_v47 = vadd.f32 %v2146_v2, %v4416_v27 }
 0x2e2   :  { %2990 = vset.pattern.permute.xlu0 %v3150_v20 }
 0x2e3   :  { %v2791_v60 = vpop.permute.xlu0 %2790  ;;  %v2150_v25 = vpop.permute.xlu1 %2149  ;;  %2220 = vperm.xlu0 %2990, %v2158_v49  }
 0x2e4   :  { %1591 = vperm.xlu1 %2985, %v1521_v8   ;;  %v2159_v21 = vadd.f32 %v2150_v25, %v4428_v63 }
 0x2e7   :  { %v1565_v15 = vpop.permute.xlu0 %1564  ;;  %v2785_v13 = vpop.permute.xlu1 %2784 }
 0x2e8   :  { %v2796_v31 = vadd.f32 %v2785_v13, %v4416_v27  ;;  %2988 = vset.pattern.permute.xlu1 %v3152_v52  ;;  %v1573_v51 = vsub.f32 %v4458_v41, %v1565_v15  ;;  %v4533_v15 = vld [vmem:[#allocation2 + $0x40] sm:$0xff] }
 0x2e9   :  { %1609 = vperm.xlu1 %2988, %v1571_v4   ;;  %v4531_v4 = vld [vmem:[#allocation2 + $0x50] sm:$0xff] }
 0x2ea   :  { %2854 = vperm.xlu0 %2990, %v2796_v31  }
 0x2eb   :  { %v2789_v22 = vpop.permute.xlu1 %2788  ;;  %v2200_v42 = vpop.permute.xlu0 %2199 }
 0x2ec   :  { %v2798_v24 = vadd.f32 %v2789_v22, %v4428_v63  ;;  %v2210_v27 = vsub.f32 %v4439_v33, %v2200_v42  ;;  %v762_v63 = vmul.f32 %v4487_v1, %v4487_v1  ;;  %v4537_v42 = vld [vmem:[#allocation2 + $0x48] sm:$0xff] }
 0x2ed   :  { %2989 = vset.pattern.permute.xlu1 %v3150_v20  ;;  %v2797_v20 = vadd.f32 %v2787_v59, %v4421_v61  ;;  %v2799_v61 = vadd.f32 %v2791_v60, %v4432_v62  ;;  %v4505_v62 = vld [vmem:[#allocation2 + $0x20] sm:$0xff]  ;;  %v754_v59 = vrot.slane %v753_v28, 4 }
 0x2ee   :  { %2215 = vperm.xlu1 %2989, %v2157_v47   ;;  %2864 = vperm.xlu0 %2990, %v2798_v24   ;;  %v743_v30 = vadd.f32 %v4505_v62, %v742_v9  ;;  %v768_v3 = vadd.f32 %v762_v63, %v760_v39  ;;  %v4535_v47 = vld [vmem:[#allocation2 + $0x58] sm:$0xff]  ;;  %v4554_v39 = vld [vmem:[#allocation2 + $0x68] sm:$0xff] }
 0x2ef   :  { %v1563_v57 = vpop.permute.xlu1 %1562  ;;  %v2204_v53 = vpop.permute.xlu0 %2203  ;;  %v755_v13 = vadd.f32 %v754_v59, %v753_v28  ;;  %v1439_v58 = vmul.f32 %v4554_v39, %v4554_v39 }
 0x2f0   :  { %v1572_v6 = vsub.f32 %v4451_v45, %v1563_v57  ;;  %v2212_v5 = vsub.f32 %v4458_v41, %v2204_v53  ;;  %v1436_v57 = vmul.f32 %v4531_v4, %v4531_v4  ;;  %v4546_v53 = vld [vmem:[#allocation2 + $0x60] sm:$0xff] }
 0x2f2   :  { %2225 = vperm.xlu1 %2989, %v2159_v21   ;;  %2991 = vset.pattern.permute.xlu0 %v3152_v52  ;;  %v1434_v21 = vmul.f32 %v4533_v15, %v4533_v15 }
 0x2f3   :  { %1614 = vperm.xlu0 %2991, %v1572_v6   ;;  %v2839_v37 = vpop.permute.xlu0 %2838  ;;  %v2198_v10 = vpop.permute.xlu1 %2197 }
 0x2f4   :  { %v2849_v43 = vsub.f32 %v4439_v33, %v2839_v37  ;;  %v764_v33 = vmul.f32 %v4505_v62, %v4505_v62  ;;  %v2209_v54 = vsub.f32 %v4442_v48, %v2198_v10  ;;  %v1442_v9 = vadd.f32 %v1436_v57, %v1434_v21  ;;  %v4582_v21 = vld [vmem:[#allocation2 + $0x98] sm:$0xff] }
 0x2f5   :  { %5071 = vst [vmem:[#allocation33_spill] sm:$0xff] %v4582_v21 }
 0x2f6   :  { %2230 = vperm.xlu1 %2989, %v2160_v11   ;;  %v769_v38 = vadd.f32 %v768_v3, %v764_v33  ;;  %v756_v11 = vrot.slane %v755_v13, 2  ;;  %v4564_v3 = vld [vmem:[#allocation2 + $0x78] sm:$0xff] }
 0x2f7   :  { %2248 = vperm.xlu0 %2991, %v2210_v27   ;;  %v2843_v44 = vpop.permute.xlu0 %2842  ;;  %v2202_v16 = vpop.permute.xlu1 %2201  ;;  %v1437_v27 = vmul.f32 %v4535_v47, %v4535_v47  ;;  %5068 = vst [vmem:[#allocation19_spill] sm:$0xff] %v4564_v3 }
 0x2f8   :  { %v2851_v29 = vsub.f32 %v4458_v41, %v2843_v44  ;;  %v744_v41 = vadd.f32 %v4518_v35, %v743_v30  ;;  %v770_v18 = vadd.f32 %v769_v38, %v766_v7  ;;  %v2211_v12 = vsub.f32 %v4451_v45, %v2202_v16 }
 0x2f9   :  { %v757_v36 = vadd.f32 %v756_v11, %v755_v13  ;;  %v1441_v7 = vmul.f32 %v4564_v3, %v4564_v3 }
 0x2fa   :  { %2859 = vperm.xlu1 %2989, %v2797_v20   ;;  %v745_v17 = vrot.slane %v744_v41, 4  ;;  %v771_v49 = vrot.slane %v770_v18, 4  ;;  %v1435_v20 = vmul.f32 %v4537_v42, %v4537_v42 }
 0x2fb   :  { %2258 = vperm.xlu0 %2991, %v2212_v5   ;;  %v2837_v34 = vpop.permute.xlu1 %2836  ;;  %v758_v16 = vrot.slane %v757_v36, 1 }
 0x2fc   :  { %v746_v2 = vadd.f32 %v745_v17, %v744_v41  ;;  %v2848_v8 = vsub.f32 %v4442_v48, %v2837_v34  ;;  %v772_v31 = vadd.f32 %v771_v49, %v770_v18  ;;  %v1416_v48 = vadd.f32 %v4531_v4, %v4533_v15 }
 0x2fd   :  { %v1451_v50 = vadd.f32 %v1437_v27, %v1435_v20  ;;  %v759_v17 = vadd.f32 %v758_v16, %v757_v36 }
 0x2fe   :  { %2869 = vperm.xlu1 %2989, %v2799_v61   ;;  %v747_v22 = vrot.slane %v746_v2, 2  ;;  %v773_v37 = vrot.slane %v772_v31, 2  ;;  %v1417_v63 = vadd.f32 %v1416_v48, %v4546_v53  ;;  %v1438_v61 = vmul.f32 %v4546_v53, %v4546_v53 }
 0x2ff   :  { %2887 = vperm.xlu0 %2991, %v2849_v43   ;;  %v2841_v25 = vpop.permute.xlu1 %2840  ;;  %v4559_v43 = vld [vmem:[#allocation2 + $0x70] sm:$0xff]  ;;  %v1452_v41 = vadd.f32 %v1451_v50, %v1439_v58  ;;  %v2076_v58 = vmul.f32 %v4582_v21, %v4582_v21 }
 0x300   :  { %v2850_v24 = vsub.f32 %v4451_v45, %v2841_v25  ;;  %v1425_v45 = vadd.f32 %v4535_v47, %v4537_v42  ;;  %v748_v5 = vadd.f32 %v747_v22, %v746_v2  ;;  %5067 = vst [vmem:[#allocation15_spill] sm:$0xff] %v4559_v43  ;;  %v774_v33 = vadd.f32 %v773_v37, %v772_v31  ;;  %v4578_v22 = vld [vmem:[#allocation2 + $0x90] sm:$0xff] }
 0x301   :  { %v1453_v34 = vadd.f32 %v1452_v41, %v1441_v7  ;;  %5069 = vst [vmem:[#allocation31_spill] sm:$0xff] %v4578_v22  ;;  %v2075_v36 = vmul.f32 %v4578_v22, %v4578_v22 }
 0x302   :  { %2992 = vset.pattern.permute.xlu1 %v3152_v52  ;;  %v778_v52 = vadd.f32 %v777_v0, %v765_v32  ;;  %v1426_v44 = vadd.f32 %v1425_v45, %v4554_v39  ;;  %v749_v30 = vrot.slane %v748_v5, 1  ;;  %v1443_v32 = vadd.f32 %v1442_v9, %v1438_v61 }
 0x303   :  { %1619 = vperm.xlu1 %2992, %v1573_v51   ;;  %2897 = vperm.xlu0 %2991, %v2851_v29   ;;  %v1418_v51 = vadd.f32 %v1417_v63, %v4559_v43  ;;  %v1440_v29 = vmul.f32 %v4559_v43, %v4559_v43  ;;  %v775_v38 = vrot.slane %v774_v33, 1  ;;  %v1454_v25 = vrot.slane %v1453_v34, 4  ;;  %v4592_v63 = vld [vmem:[#allocation2 + $0xa0] sm:$0xff] }
 0x304   :  { %v779_v26 = vadd.f32 %v778_v52, %v767_v23  ;;  %v1427_v56 = vadd.f32 %v1426_v44, %v4564_v3  ;;  %5073 = vst [vmem:[#allocation11_spill] sm:$0xff] %v4592_v63  ;;  %v4598_v44 = vld [vmem:[#allocation2 + $0xa8] sm:$0xff] }
 0x305   :  { %v1419_v23 = vrot.slane %v1418_v51, 4  ;;  %v1444_v52 = vadd.f32 %v1443_v32, %v1440_v29  ;;  %v1455_v20 = vadd.f32 %v1454_v25, %v1453_v34  ;;  %5074 = vst [vmem:[#allocation22_spill] sm:$0xff] %v4598_v44  ;;  %v4616_v25 = vld [vmem:[#allocation2 + $0xc0] sm:$0xff] }
 0x306   :  { %v780_v60 = vrot.slane %v779_v26, 4  ;;  %v1428_v18 = vrot.slane %v1427_v56, 4  ;;  %5077 = vst [vmem:[#allocation10_spill] sm:$0xff] %v4616_v25 }
 0x307   :  { %2243 = vperm.xlu1 %2992, %v2209_v54   ;;  %v750_v54 = vadd.f32 %v749_v30, %v748_v5  ;;  %v1420_v59 = vadd.f32 %v1419_v23, %v1418_v51  ;;  %v1445_v2 = vrot.slane %v1444_v52, 4  ;;  %v1456_v29 = vrot.slane %v1455_v20, 2  ;;  %v4610_v23 = vld [vmem:[#allocation2 + $0xb8] sm:$0xff] }
 0x308   :  { %v781_v6 = vadd.f32 %v780_v60, %v779_v26  ;;  %v1429_v60 = vadd.f32 %v1428_v18, %v1427_v56  ;;  %v4606_v56 = vld [vmem:[#allocation2 + $0xb0] sm:$0xff]  ;;  %5076 = vst [vmem:[#allocation38_spill] sm:$0xff] %v4610_v23 }
 0x309   :  { %v4572_v26 = vmul.f32 0.03125, %v750_v54  ;;  %v1421_v57 = vrot.slane %v1420_v59, 2  ;;  %v1446_v48 = vadd.f32 %v1445_v2, %v1444_v52  ;;  %5075 = vst [vmem:[#allocation14_spill] sm:$0xff] %v4606_v56  ;;  %v2077_v54 = vmul.f32 %v4592_v63, %v4592_v63 }
 0x30a   :  { %v782_v10 = vrot.slane %v781_v6, 2  ;;  %v1430_v45 = vrot.slane %v1429_v60, 2  ;;  %v1457_v34 = vadd.f32 %v1456_v29, %v1455_v20 }
 0x30b   :  { %2253 = vperm.xlu1 %2992, %v2211_v12   ;;  %v776_v12 = vadd.f32 %v775_v38, %v774_v33  ;;  %v790_v31 = vmul.f32 %v4572_v26, %v4572_v26  ;;  %v1422_v61 = vadd.f32 %v1421_v57, %v1420_v59  ;;  %v4620_v57 = vld [vmem:[#allocation2 + $0xd0] sm:$0xff] }
 0x30c   :  { %v783_v0 = vadd.f32 %v782_v10, %v781_v6  ;;  %v4584_v6 = vld [vmem:[#allocation2 + $0x88] sm:$0xff]  ;;  %v1447_v10 = vrot.slane %v1446_v48, 2  ;;  %v1431_v51 = vadd.f32 %v1430_v45, %v1429_v60  ;;  %5078 = vst [vmem:[#allocation18_spill] sm:$0xff] %v4620_v57  ;;  %v1458_v20 = vrot.slane %v1457_v34, 1 }
 0x30d   :  { %v788_v13 = vmul.f32 0.03125, %v776_v12  ;;  %5072 = vst [vmem:[#allocation34_spill] sm:$0xff] %v4584_v6  ;;  %v2064_v9 = vadd.f32 %v4582_v21, %v4584_v6  ;;  %v2074_v33 = vmul.f32 %v4584_v6, %v4584_v6  ;;  %v1423_v7 = vrot.slane %v1422_v61, 1 }
 0x30e   :  { %v784_v28 = vrot.slane %v783_v0, 1  ;;  %v1448_v41 = vadd.f32 %v1447_v10, %v1446_v48  ;;  %v1432_v18 = vrot.slane %v1431_v51, 1 }
 0x30f   :  { %2882 = vperm.xlu1 %2992, %v2848_v8   ;;  %v4574_v8 = vmul.f32 0.03125, %v759_v17  ;;  %v792_v5 = vsub.f32 %v788_v13, %v790_v31  ;;  %v2065_v16 = vadd.f32 %v2064_v9, %v4598_v44  ;;  %v2090_v52 = vadd.f32 %v2076_v58, %v2074_v33  ;;  %v4626_v9 = vld [vmem:[#allocation2 + $0xd8] sm:$0xff] }
 0x310   :  { %v785_v49 = vadd.f32 %v784_v28, %v783_v0  ;;  %v2078_v28 = vmul.f32 %v4598_v44, %v4598_v44  ;;  %v1449_v60 = vrot.slane %v1448_v41, 1  ;;  %v2079_v31 = vmul.f32 %v4606_v56, %v4606_v56  ;;  %5080 = vst [vmem:[#allocation8_spill] sm:$0xff] %v4626_v9 }
 0x311   :  { %v791_v27 = vmul.f32 %v4574_v8, %v4574_v8  ;;  %v794_v0 = vmax.f32 %v792_v5, 0.0  ;;  %v2066_v2 = vadd.f32 %v2065_v16, %v4610_v23  ;;  %v1433_v45 = vadd.f32 %v1432_v18, %v1431_v51 }
 0x312   :  { %v789_v11 = vmul.f32 0.03125, %v785_v49  ;;  %v1424_v49 = vadd.f32 %v1423_v7, %v1422_v61  ;;  %v2091_v48 = vadd.f32 %v2090_v52, %v2078_v28  ;;  %v2712_v61 = vmul.f32 %v4616_v25, %v4616_v25 }
 0x313   :  { %2892 = vperm.xlu1 %2992, %v2850_v24   ;;  %v4580_v24 = vld [vmem:[#allocation2 + $0x80] sm:$0xff]  ;;  %v796_v59 = vadd.f32 1e-05, %v794_v0  ;;  %v2067_v10 = vrot.slane %v2066_v2, 4  ;;  %v1450_v58 = vadd.f32 %v1449_v60, %v1448_v41  ;;  %v2715_v16 = vmul.f32 %v4626_v9, %v4626_v9  ;;  %v4646_v41 = vld [vmem:[#allocation2 + $0xe8] sm:$0xff] }
 0x314   :  { %5070 = vst [vmem:[#allocation32_spill] sm:$0xff] %v4580_v24  ;;  %v2055_v37 = vadd.f32 %v4578_v22, %v4580_v24  ;;  %v2073_v50 = vmul.f32 %v4580_v24, %v4580_v24  ;;  %v793_v30 = vsub.f32 %v789_v11, %v791_v27  ;;  %v2080_v11 = vmul.f32 %v4610_v23, %v4610_v23  ;;  %v5086_v22 = vld [vmem:[#allocation30_spill] sm:$0xff] }
 0x315   :  { %3065 = vrsqrt.f32 %v796_v59  ;;  %v4634_v33 = vmul.f32 0.03125, %v1424_v49  ;;  %v1459_v7 = vadd.f32 %v1458_v20, %v1457_v34  ;;  %5082 = vst [vmem:[#allocation17_spill] sm:$0xff] %v4646_v41  ;;  %v2068_v28 = vadd.f32 %v2067_v10, %v2066_v2 }
 0x316   :  { %v2056_v32 = vadd.f32 %v2055_v37, %v4592_v63  ;;  %v2081_v38 = vadd.f32 %v2075_v36, %v2073_v50  ;;  %v795_v17 = vmax.f32 %v793_v30, 0.0  ;;  %v4624_v37 = vld [vmem:[#allocation2 + $0xc8] sm:$0xff]  ;;  %v2694_v36 = vadd.f32 %v4620_v57, %v4616_v25  ;;  %v4636_v30 = vld [vmem:[#allocation2 + $0xe0] sm:$0xff] }
 0x317   :  { %5079 = vst [vmem:[#allocation39_spill] sm:$0xff] %v4624_v37  ;;  %v2714_v50 = vmul.f32 %v4620_v57, %v4620_v57  ;;  %5081 = vst [vmem:[#allocation13_spill] sm:$0xff] %v4636_v30  ;;  %v2713_v29 = vmul.f32 %v4624_v37, %v4624_v37  ;;  %v2703_v0 = vadd.f32 %v4626_v9, %v4624_v37  ;;  %v1462_v59 = vmul.f32 0.03125, %v1450_v58  ;;  %v5085_v57 = vld [vmem:[#allocation26_spill] sm:$0xff] }
 0x318   :  { %v2057_v12 = vadd.f32 %v2056_v32, %v4606_v56  ;;  %v2082_v13 = vadd.f32 %v2081_v38, %v2077_v54  ;;  %v797_v27 = vadd.f32 1e-05, %v795_v17  ;;  %v2092_v32 = vadd.f32 %v2091_v48, %v2080_v11 }
 0x319   :  { %v4644_v38 = vmul.f32 0.03125, %v1433_v45  ;;  %v2716_v52 = vmul.f32 %v4636_v30, %v4636_v30  ;;  %v2720_v17 = vadd.f32 %v2714_v50, %v2712_v61  ;;  %v2695_v18 = vadd.f32 %v2694_v36, %v4636_v30  ;;  %v4660_v45 = vld [vmem:[#allocation2 + $0xf8] sm:$0xff] }
 0x31a   :  { %v2058_v5 = vrot.slane %v2057_v12, 4  ;;  %v2083_v51 = vadd.f32 %v2082_v13, %v2079_v31  ;;  %3067 = vrsqrt.f32 %v797_v27  ;;  %v1464_v49 = vmul.f32 %v4634_v33, %v4634_v33  ;;  %v4653_v13 = vld [vmem:[#allocation2 + $0xf0] sm:$0xff]  ;;  %5084 = vst [vmem:[#allocation12_spill] sm:$0xff] %v4660_v45 }
 0x31b   :  { %5083 = vst [vmem:[#allocation21_spill] sm:$0xff] %v4653_v13  ;;  %v2717_v34 = vmul.f32 %v4646_v41, %v4646_v41  ;;  %v2093_v31 = vrot.slane %v2092_v32, 4  ;;  %v2729_v48 = vadd.f32 %v2715_v16, %v2713_v29  ;;  %v1463_v11 = vmul.f32 0.03125, %v1459_v7 }
 0x31c   :  { %v2059_v54 = vadd.f32 %v2058_v5, %v2057_v12  ;;  %v2084_v60 = vrot.slane %v2083_v51, 4  ;;  %v2704_v12 = vadd.f32 %v2703_v0, %v4646_v41  ;;  %v1465_v2 = vmul.f32 %v4644_v38, %v4644_v38 }
 0x31d   :  { %v2069_v20 = vrot.slane %v2068_v28, 2  ;;  %v2696_v5 = vadd.f32 %v2695_v18, %v4653_v13  ;;  %v2718_v61 = vmul.f32 %v4653_v13, %v4653_v13  ;;  %v2721_v10 = vadd.f32 %v2720_v17, %v2716_v52 }
 0x31e   :  { %v2060_v27 = vrot.slane %v2059_v54, 2  ;;  %v976_v36 = vsub.f32 %v4483_v46, %v4572_v26  ;;  %v1466_v50 = vsub.f32 %v1462_v59, %v1464_v49  ;;  %v2085_v58 = vadd.f32 %v2084_v60, %v2083_v51 }
 0x31f   :  { %v2094_v29 = vadd.f32 %v2093_v31, %v2092_v32  ;;  %v2705_v0 = vadd.f32 %v2704_v12, %v4660_v45  ;;  %v2719_v16 = vmul.f32 %v4660_v45, %v4660_v45  ;;  %v2730_v7 = vadd.f32 %v2729_v48, %v2717_v34  ;;  %v3066_v41 = vpop.eup %3065 }
 0x320   :  { %v977_v18 = vsub.f32 %v4495_v14, %v4574_v8  ;;  %v978_v30 = vsub.f32 %v4487_v1, %v4572_v26  ;;  %v979_v52 = vsub.f32 %v4499_v40, %v4574_v8  ;;  %v1467_v17 = vsub.f32 %v1463_v11, %v1465_v2 }
 0x321   :  { %v2061_v59 = vadd.f32 %v2060_v27, %v2059_v54  ;;  %v2070_v51 = vadd.f32 %v2069_v20, %v2068_v28  ;;  %v2697_v32 = vrot.slane %v2696_v5, 4  ;;  %v2722_v49 = vadd.f32 %v2721_v10, %v2718_v61 }
 0x322   :  { %v980_v31 = vsub.f32 %v4505_v62, %v4572_v26  ;;  %v981_v34 = vsub.f32 %v4512_v55, %v4574_v8  ;;  %v982_v48 = vsub.f32 %v4518_v35, %v4572_v26  ;;  %v1468_v12 = vmax.f32 %v1466_v50, 0.0 }
 0x323   :  { %v2086_v37 = vrot.slane %v2085_v58, 2  ;;  %v2095_v25 = vrot.slane %v2094_v29, 2  ;;  %v2706_v44 = vrot.slane %v2705_v0, 4  ;;  %v2731_v63 = vadd.f32 %v2730_v7, %v2719_v16 }
 0x324   :  { %v3068_v60 = vpop.eup %3067  ;;  %v984_v11 = vmul.f32 %v3066_v41, %v976_v36  ;;  %v983_v54 = vsub.f32 %v4524_v19, %v4574_v8  ;;  %v1469_v28 = vmax.f32 %v1467_v17, 0.0  ;;  %v2062_v27 = vrot.slane %v2061_v59, 1 }
 0x325   :  { %v2071_v20 = vrot.slane %v2070_v51, 1  ;;  %v2698_v61 = vadd.f32 %v2697_v32, %v2696_v5  ;;  %v2723_v10 = vrot.slane %v2722_v49, 4  ;;  %v985_v26 = vmul.f32 %v3068_v60, %v977_v18 }
 0x326   :  { %v986_v50 = vmul.f32 %v3066_v41, %v978_v30  ;;  %v987_v45 = vmul.f32 %v3068_v60, %v979_v52  ;;  %v1470_v13 = vadd.f32 1e-05, %v1468_v12  ;;  %v2087_v9 = vadd.f32 %v2086_v37, %v2085_v58 }
 0x327   :  { %v2096_v16 = vadd.f32 %v2095_v25, %v2094_v29  ;;  %v2707_v36 = vadd.f32 %v2706_v44, %v2705_v0  ;;  %v2732_v7 = vrot.slane %v2731_v63, 4  ;;  %v1008_v8 = vmul.f32 %v5085_v57, %v984_v11 }
 0x328   :  { %v988_v17 = vmul.f32 %v3066_v41, %v980_v31  ;;  %v989_v3 = vmul.f32 %v3068_v60, %v981_v34  ;;  %v1471_v43 = vadd.f32 1e-05, %v1469_v28  ;;  %v2063_v2 = vadd.f32 %v2062_v27, %v2061_v59  ;;  %v5087_v59 = vld [vmem:[#allocation35_spill] sm:$0xff] }
 0x329   :  { %v2072_v23 = vadd.f32 %v2071_v20, %v2070_v51  ;;  %v2699_v56 = vrot.slane %v2698_v61, 2  ;;  %v2724_v5 = vadd.f32 %v2723_v10, %v2722_v49  ;;  %v1010_v18 = vmul.f32 %v5086_v22, %v986_v50 }
 0x32a   :  { %v4688_v30 = vmul.f32 %v3066_v41, %v982_v48  ;;  %v4690_v52 = vmul.f32 %v3068_v60, %v983_v54  ;;  %3069 = vrsqrt.f32 %v1470_v13  ;;  %v2088_v44 = vrot.slane %v2087_v9, 1 }
 0x32b   :  { %v2097_v25 = vrot.slane %v2096_v16, 1  ;;  %v2708_v37 = vrot.slane %v2707_v36, 2  ;;  %v2733_v58 = vadd.f32 %v2732_v7, %v2731_v63  ;;  %v1009_v29 = vmul.f32 %v5085_v57, %v985_v26 }
 0x32c   :  { %v1011_v0 = vmul.f32 %v5086_v22, %v987_v45  ;;  %v1012_v51 = vmul.f32 %v5087_v59, %v988_v17  ;;  %3071 = vrsqrt.f32 %v1471_v43  ;;  %v4695_v49 = vmul.f32 0.03125, %v2063_v2 }
 0x32d   :  { %v4697_v31 = vmul.f32 0.03125, %v2072_v23  ;;  %v2700_v41 = vadd.f32 %v2699_v56, %v2698_v61  ;;  %v2725_v34 = vrot.slane %v2724_v5, 2  ;;  %v2089_v45 = vadd.f32 %v2088_v44, %v2087_v9 }
 0x32e   :  { %v2098_v54 = vadd.f32 %v2097_v25, %v2096_v16  ;;  %v2709_v28 = vadd.f32 %v2708_v37, %v2707_v36  ;;  %v2734_v43 = vrot.slane %v2733_v58, 2  ;;  %v1631_v26 = vsub.f32 %v4537_v42, %v4644_v38 }
 0x32f   :  { %v2701_v61 = vrot.slane %v2700_v41, 1  ;;  %v2103_v7 = vmul.f32 %v4695_v49, %v4695_v49 }
 0x330   :  { %v2710_v50 = vrot.slane %v2709_v28, 1  ;;  %v2735_v16 = vadd.f32 %v2734_v43, %v2733_v58  ;;  %v2102_v17 = vmul.f32 0.03125, %v2098_v54 }
 0x334   :  { %v4708_v36 = vpop.eup %3069 }
 0x33a   :  { %v923_v6 = vpop.permute.xlu0 %922 }
 0x33b   :  { %v940_v60 = vmul.f32 %v4483_v46, %v923_v6  ;;  %v941_v13 = vmul.f32 %v4495_v14, %v923_v6  ;;  %v2726_v14 = vadd.f32 %v2725_v34, %v2724_v5  ;;  %v2702_v5 = vadd.f32 %v2701_v61, %v2700_v41 }
 0x33c   :  { %v2736_v34 = vrot.slane %v2735_v16, 1 }
 0x33d   :  { %v4727_v43 = vmul.f32 0.03125, %v2702_v5 }
 0x345   :  { %v928_v24 = vpop.permute.xlu1 %927 }
 0x346   :  { %v942_v48 = vmul.f32 %v4487_v1, %v928_v24  ;;  %v943_v63 = vmul.f32 %v4499_v40, %v928_v24  ;;  %v1013_v24 = vmul.f32 %v5087_v59, %v989_v3  ;;  %v2104_v3 = vmul.f32 %v4697_v31, %v4697_v31 }
 0x349   :  { %v933_v32 = vpop.permute.xlu1 %932  ;;  %v938_v21 = vpop.permute.xlu0 %937 }
 0x34a   :  { %v944_v56 = vmul.f32 %v4505_v62, %v933_v32  ;;  %v945_v46 = vmul.f32 %v4512_v55, %v933_v32  ;;  %v2727_v32 = vrot.slane %v2726_v14, 1  ;;  %v946_v44 = vmul.f32 %v4518_v35, %v938_v21 }
 0x34b   :  { %v947_v25 = vmul.f32 %v4524_v19, %v938_v21  ;;  %v5089_v35 = vsub.f32 %v4533_v15, %v4634_v33 }
 0x34d   :  { %v1638_v19 = vmul.f32 %v4708_v36, %v5089_v35  ;;  %v1634_v35 = vsub.f32 %v4546_v53, %v4634_v33 }
 0x34e   :  { %v951_v12 = vpop.permute.xlu1 %950  ;;  %v956_v11 = vpop.permute.xlu0 %955 }
 0x34f   :  { %v968_v2 = vadd.f32 %v951_v12, %v940_v60  ;;  %v969_v27 = vadd.f32 %v951_v12, %v941_v13  ;;  %v970_v23 = vadd.f32 %v956_v11, %v942_v48  ;;  %v971_v20 = vadd.f32 %v956_v11, %v943_v63  ;;  %v5088_v60 = vld [vmem:[#allocation28_spill] sm:$0xff] }
 0x350   :  { %v1014_v13 = vmul.f32 %v5088_v60, %v4688_v30  ;;  %v1015_v41 = vmul.f32 %v5088_v60, %v4690_v52  ;;  %v2106_v12 = vsub.f32 %v2102_v17, %v2104_v3  ;;  %v2737_v30 = vadd.f32 %v2736_v34, %v2735_v16 }
 0x351   :  { %v1016_v6 = vadd.f32 %v1008_v8, %v968_v2  ;;  %v1017_v1 = vadd.f32 %v1009_v29, %v969_v27  ;;  %v1018_v10 = vadd.f32 %v1010_v18, %v970_v23  ;;  %v1019_v40 = vadd.f32 %v1011_v0, %v971_v20  ;;  %v4714_v18 = vpop.eup %3071 }
 0x352   :  { %v961_v9 = vpop.permute.xlu1 %960  ;;  %v2101_v8 = vmul.f32 0.03125, %v2089_v45  ;;  %v2711_v0 = vadd.f32 %v2710_v50, %v2709_v28  ;;  %v1639_v21 = vmul.f32 %v4714_v18, %v1631_v26  ;;  %v2728_v28 = vadd.f32 %v2727_v32, %v2726_v14 }
 0x353   :  { %1024 = vst [vmem:[#allocation5] sm:$0xff] %v1016_v6  ;;  %1025 = vst [vmem:[#allocation5 + $0x8] sm:$0xff] %v1017_v1  ;;  %v972_v62 = vadd.f32 %v961_v9, %v944_v56  ;;  %v973_v55 = vadd.f32 %v961_v9, %v945_v46  ;;  %v1582_v11 = vpop.permute.xlu0 %1581  ;;  %v1646_v20 = vmul.f32 %v1638_v19, %v5085_v57  ;;  %v2108_v6 = vmax.f32 %v2106_v12, 0.0 }
 0x354   :  { %1026 = vst [vmem:[#allocation5 + $0x10] sm:$0xff] %v1018_v10  ;;  %1027 = vst [vmem:[#allocation5 + $0x18] sm:$0xff] %v1019_v40  ;;  %v4729_v2 = vmul.f32 0.03125, %v2711_v0  ;;  %v1647_v46 = vmul.f32 %v1639_v21, %v5085_v57  ;;  %v2740_v14 = vmul.f32 0.03125, %v2728_v28  ;;  %v2742_v1 = vmul.f32 %v4727_v43, %v4727_v43  ;;  %v5090_v28 = vld [vmem:[#allocation31_spill] sm:$0xff] }
 0x355   :  { %v1020_v37 = vadd.f32 %v1012_v51, %v972_v62  ;;  %v1021_v58 = vadd.f32 %v1013_v24, %v973_v55  ;;  %v2105_v51 = vsub.f32 %v2101_v8, %v2103_v7  ;;  %v2741_v24 = vmul.f32 0.03125, %v2737_v30 }
 0x356   :  { %v966_v29 = vpop.permute.xlu1 %965  ;;  %v2743_v9 = vmul.f32 %v4729_v2, %v4729_v2  ;;  %v1632_v50 = vsub.f32 %v4531_v4, %v4634_v33  ;;  %v1633_v16 = vsub.f32 %v4535_v47, %v4644_v38  ;;  %v2744_v55 = vsub.f32 %v2740_v14, %v2742_v1  ;;  %v5092_v1 = vld [vmem:[#allocation14_spill] sm:$0xff] }
 0x357   :  { %1028 = vst [vmem:[#allocation5 + $0x20] sm:$0xff] %v1020_v37  ;;  %1029 = vst [vmem:[#allocation5 + $0x28] sm:$0xff] %v1021_v58  ;;  %v974_v48 = vadd.f32 %v966_v29, %v946_v44  ;;  %v975_v63 = vadd.f32 %v966_v29, %v947_v25  ;;  %v2107_v56 = vmax.f32 %v2105_v51, 0.0  ;;  %v2110_v7 = vadd.f32 1e-05, %v2108_v6 }
 0x358   :  { %v2745_v3 = vsub.f32 %v2741_v24, %v2743_v9  ;;  %v1640_v17 = vmul.f32 %v4708_v36, %v1632_v50  ;;  %v1641_v32 = vmul.f32 %v4714_v18, %v1633_v16  ;;  %v2746_v44 = vmax.f32 %v2744_v55, 0.0  ;;  %v5095_v50 = vld [vmem:[#allocation19_spill] sm:$0xff] }
 0x359   :  { %v1022_v45 = vadd.f32 %v1014_v13, %v974_v48  ;;  %v1023_v54 = vadd.f32 %v1015_v41, %v975_v63  ;;  %v2109_v62 = vadd.f32 1e-05, %v2107_v56  ;;  %v1596_v37 = vmul.f32 %v1582_v11, %v4531_v4 }
 0x35a   :  { %v2747_v25 = vmax.f32 %v2745_v3, 0.0  ;;  %v1597_v58 = vmul.f32 %v1582_v11, %v4535_v47  ;;  %v1648_v29 = vmul.f32 %v1640_v17, %v5086_v22  ;;  %v1649_v34 = vmul.f32 %v1641_v32, %v5086_v22 }
 0x35b   :  { %1030 = vst [vmem:[#allocation5 + $0x30] sm:$0xff] %v1022_v45  ;;  %1031 = vst [vmem:[#allocation5 + $0x38] sm:$0xff] %v1023_v54  ;;  %v1577_v52 = vpop.permute.xlu1 %1576  ;;  %3073 = vrsqrt.f32 %v2109_v62  ;;  %v2748_v63 = vadd.f32 1e-05, %v2746_v44  ;;  %v1635_v19 = vsub.f32 %v4554_v39, %v4644_v38  ;;  %v1642_v11 = vmul.f32 %v4708_v36, %v1634_v35 }
 0x35c   :  { %v1594_v27 = vmul.f32 %v1577_v52, %v4533_v15  ;;  %v1595_v23 = vmul.f32 %v1577_v52, %v4537_v42  ;;  %3075 = vrsqrt.f32 %v2110_v7  ;;  %v2749_v21 = vadd.f32 1e-05, %v2747_v25  ;;  %v5091_v52 = vld [vmem:[#allocation33_spill] sm:$0xff] }
 0x35d   :  { %v1605_v61 = vpop.permute.xlu0 %1604  ;;  %3077 = vrsqrt.f32 %v2748_v63  ;;  %v1643_v45 = vmul.f32 %v4714_v18, %v1635_v19  ;;  %v2271_v30 = vsub.f32 %v5090_v28, %v4695_v49  ;;  %v1637_v16 = vsub.f32 %v5095_v50, %v4644_v38 }
 0x35e   :  { %v1622_v10 = vadd.f32 %v1605_v61, %v1594_v27  ;;  %v1623_v40 = vadd.f32 %v1605_v61, %v1595_v23  ;;  %3079 = vrsqrt.f32 %v2749_v21  ;;  %v2272_v27 = vsub.f32 %v5091_v52, %v4697_v31 }
 0x35f   :  { %v1587_v15 = vpop.permute.xlu1 %1586  ;;  %v1650_v61 = vmul.f32 %v1642_v11, %v5087_v59  ;;  %v1651_v6 = vmul.f32 %v1643_v45, %v5087_v59  ;;  %v1645_v35 = vmul.f32 %v4714_v18, %v1637_v16 }
 0x360   :  { %v1654_v26 = vadd.f32 %v1646_v20, %v1622_v10  ;;  %v1655_v42 = vadd.f32 %v1647_v46, %v1623_v40  ;;  %v1598_v20 = vmul.f32 %v1587_v15, %v4546_v53  ;;  %v1599_v56 = vmul.f32 %v1587_v15, %v4554_v39  ;;  %v5093_v40 = vld [vmem:[#allocation38_spill] sm:$0xff]  ;;  %v5094_v39 = vld [vmem:[#allocation15_spill] sm:$0xff] }
 0x361   :  { %v2275_v10 = vsub.f32 %v5092_v1, %v4695_v49  ;;  %v2276_v24 = vsub.f32 %v5093_v40, %v4697_v31  ;;  %v1636_v15 = vsub.f32 %v5094_v39, %v4634_v33  ;;  %v5097_v33 = vld [vmem:[#allocation8_spill] sm:$0xff] }
 0x362   :  { %1663 = vst [vmem:[#allocation5 + $0x40] sm:$0xff] %v1654_v26  ;;  %1664 = vst [vmem:[#allocation5 + $0x48] sm:$0xff] %v1655_v42  ;;  %v2221_v5 = vpop.permute.xlu0 %2220 }
 0x363   :  { %v4743_v8 = vpop.permute.xlu1 %1591  ;;  %v2235_v62 = vmul.f32 %v2221_v5, %v5090_v28  ;;  %v2236_v55 = vmul.f32 %v2221_v5, %v5091_v52  ;;  %v1644_v63 = vmul.f32 %v4708_v36, %v1636_v15  ;;  %v5098_v52 = vld [vmem:[#allocation21_spill] sm:$0xff]  ;;  %v1653_v15 = vmul.f32 %v1645_v35, %v5088_v60 }
 0x365   :  { %v4763_v54 = vpop.eup %3073 }
 0x366   :  { %v4769_v23 = vpop.eup %3075  ;;  %v2279_v42 = vmul.f32 %v4763_v54, %v2271_v30  ;;  %v2283_v44 = vmul.f32 %v4763_v54, %v2275_v10 }
 0x367   :  { %v2280_v53 = vmul.f32 %v4769_v23, %v2272_v27  ;;  %v2284_v25 = vmul.f32 %v4769_v23, %v2276_v24  ;;  %v2914_v27 = vsub.f32 %v5098_v52, %v4727_v43 }
 0x368   :  { %v1610_v0 = vpop.permute.xlu1 %1609  ;;  %v2287_v38 = vmul.f32 %v2279_v42, %v5086_v22  ;;  %v2291_v45 = vmul.f32 %v2283_v44, %v5088_v60 }
 0x369   :  { %v1624_v13 = vadd.f32 %v1610_v0, %v1596_v37  ;;  %v1625_v41 = vadd.f32 %v1610_v0, %v1597_v58  ;;  %v4751_v48 = vpop.permute.xlu0 %2854  ;;  %v5096_v37 = vld [vmem:[#allocation18_spill] sm:$0xff]  ;;  %v4795_v0 = vpop.eup %3077  ;;  %v2288_v5 = vmul.f32 %v2280_v53, %v5086_v22  ;;  %v2292_v28 = vmul.f32 %v2284_v25, %v5088_v60 }
 0x36a   :  { %v2910_v58 = vsub.f32 %v5096_v37, %v4727_v43  ;;  %v2922_v16 = vmul.f32 %v4795_v0, %v2914_v27  ;;  %v1600_v25 = vmul.f32 %v4743_v8, %v5094_v39 }
 0x36b   :  { %v1656_v4 = vadd.f32 %v1648_v29, %v1624_v13  ;;  %v1657_v51 = vadd.f32 %v1649_v34, %v1625_v41  ;;  %v2911_v29 = vsub.f32 %v5097_v33, %v4729_v2  ;;  %v4799_v41 = vpop.eup %3079 }
 0x36c   :  { %v2930_v35 = vmul.f32 %v2922_v16, %v5088_v60 }
 0x36d   :  { %1665 = vst [vmem:[#allocation5 + $0x50] sm:$0xff] %v1656_v4  ;;  %1666 = vst [vmem:[#allocation5 + $0x58] sm:$0xff] %v1657_v51  ;;  %v4757_v47 = vpop.permute.xlu1 %2215  ;;  %v4759_v12 = vpop.permute.xlu0 %2864 }
 0x371   :  { %v4773_v46 = vpop.permute.xlu1 %2225 }
 0x372   :  { %v1615_v14 = vpop.permute.xlu0 %1614 }
 0x373   :  { %v1626_v9 = vadd.f32 %v1615_v14, %v1598_v20  ;;  %v1627_v26 = vadd.f32 %v1615_v14, %v1599_v56  ;;  %v5099_v20 = vld [vmem:[#allocation12_spill] sm:$0xff]  ;;  %v1652_v14 = vmul.f32 %v1644_v63, %v5088_v60 }
 0x374   :  { %v2915_v36 = vsub.f32 %v5099_v20, %v4729_v2 }
 0x375   :  { %v1658_v7 = vadd.f32 %v1650_v61, %v1626_v9  ;;  %v1659_v3 = vadd.f32 %v1651_v6, %v1627_v26  ;;  %v2231_v17 = vpop.permute.xlu1 %2230  ;;  %v2918_v61 = vmul.f32 %v4795_v0, %v2910_v58  ;;  %v2919_v6 = vmul.f32 %v4799_v41, %v2911_v29  ;;  %v5102_v58 = vld [vmem:[#allocation11_spill] sm:$0xff]  ;;  %v5103_v29 = vld [vmem:[#allocation22_spill] sm:$0xff] }
 0x376   :  { %v2249_v32 = vpop.permute.xlu0 %2248  ;;  %v2239_v19 = vmul.f32 %v2231_v17, %v5092_v1  ;;  %v2240_v21 = vmul.f32 %v2231_v17, %v5093_v40  ;;  %v5100_v1 = vld [vmem:[#allocation32_spill] sm:$0xff] }
 0x377   :  { %1667 = vst [vmem:[#allocation5 + $0x60] sm:$0xff] %v1658_v7  ;;  %1668 = vst [vmem:[#allocation5 + $0x68] sm:$0xff] %v1659_v3  ;;  %v2263_v34 = vadd.f32 %v2249_v32, %v2235_v62  ;;  %v2264_v13 = vadd.f32 %v2249_v32, %v2236_v55  ;;  %v2269_v10 = vsub.f32 %v5100_v1, %v4695_v49  ;;  %v5101_v55 = vld [vmem:[#allocation34_spill] sm:$0xff] }
 0x378   :  { %v2923_v62 = vmul.f32 %v4799_v41, %v2915_v36  ;;  %v2270_v7 = vsub.f32 %v5101_v55, %v4697_v31  ;;  %v2926_v3 = vmul.f32 %v2918_v61, %v5086_v22  ;;  %v2927_v17 = vmul.f32 %v2919_v6, %v5086_v22  ;;  %v5104_v36 = vld [vmem:[#allocation10_spill] sm:$0xff] }
 0x379   :  { %v2295_v4 = vadd.f32 %v2287_v38, %v2263_v34  ;;  %v2296_v51 = vadd.f32 %v2288_v5, %v2264_v13  ;;  %v2860_v11 = vpop.permute.xlu1 %2859  ;;  %v2274_v38 = vsub.f32 %v5103_v29, %v4697_v31 }
 0x37a   :  { %v2259_v30 = vpop.permute.xlu0 %2258  ;;  %v2874_v40 = vmul.f32 %v2860_v11, %v5096_v37  ;;  %v2875_v24 = vmul.f32 %v2860_v11, %v5097_v33  ;;  %v1601_v37 = vmul.f32 %v4743_v8, %v5095_v50  ;;  %v2273_v33 = vsub.f32 %v5102_v58, %v4695_v49 }
 0x37b   :  { %2304 = vst [vmem:[#allocation5 + $0x90] sm:$0xff] %v2295_v4  ;;  %2305 = vst [vmem:[#allocation5 + $0x98] sm:$0xff] %v2296_v51  ;;  %v2267_v18 = vadd.f32 %v2259_v30, %v2239_v19  ;;  %v2268_v56 = vadd.f32 %v2259_v30, %v2240_v21  ;;  %v2931_v39 = vmul.f32 %v2923_v62, %v5088_v60 }
 0x37c   :  { %v2277_v8 = vmul.f32 %v4763_v54, %v2269_v10  ;;  %v2278_v50 = vmul.f32 %v4769_v23, %v2270_v7  ;;  %v2233_v51 = vmul.f32 %v4757_v47, %v5100_v1  ;;  %v2234_v11 = vmul.f32 %v4757_v47, %v5101_v55 }
 0x37d   :  { %v2299_v9 = vadd.f32 %v2291_v45, %v2267_v18  ;;  %v2300_v26 = vadd.f32 %v2292_v28, %v2268_v56  ;;  %v2870_v42 = vpop.permute.xlu1 %2869  ;;  %v2281_v27 = vmul.f32 %v4763_v54, %v2273_v33  ;;  %v2908_v18 = vsub.f32 %v5104_v36, %v4727_v43  ;;  %v5105_v56 = vld [vmem:[#allocation39_spill] sm:$0xff] }
 0x37e   :  { %v2888_v53 = vpop.permute.xlu0 %2887  ;;  %v2878_v5 = vmul.f32 %v2870_v42, %v5098_v52  ;;  %v2879_v34 = vmul.f32 %v2870_v42, %v5099_v20  ;;  %v2282_v20 = vmul.f32 %v4769_v23, %v2274_v38  ;;  %v2909_v61 = vsub.f32 %v5105_v56, %v4729_v2  ;;  %v5106_v42 = vld [vmem:[#allocation13_spill] sm:$0xff] }
 0x37f   :  { %2308 = vst [vmem:[#allocation5 + $0xb0] sm:$0xff] %v2299_v9  ;;  %2309 = vst [vmem:[#allocation5 + $0xb8] sm:$0xff] %v2300_v26  ;;  %v2902_v32 = vadd.f32 %v2888_v53, %v2874_v40  ;;  %v2903_v44 = vadd.f32 %v2888_v53, %v2875_v24  ;;  %v2285_v47 = vmul.f32 %v2277_v8, %v5085_v57 }
 0x380   :  { %v2286_v6 = vmul.f32 %v2278_v50, %v5085_v57  ;;  %v2237_v54 = vmul.f32 %v4773_v46, %v5102_v58  ;;  %v2238_v23 = vmul.f32 %v4773_v46, %v5103_v29  ;;  %v2289_v24 = vmul.f32 %v2281_v27, %v5087_v59 }
 0x381   :  { %v2934_v13 = vadd.f32 %v2926_v3, %v2902_v32  ;;  %v2935_v22 = vadd.f32 %v2927_v17, %v2903_v44  ;;  %v2290_v9 = vmul.f32 %v2282_v20, %v5087_v59  ;;  %v2912_v53 = vsub.f32 %v5106_v42, %v4727_v43 }
 0x382   :  { %v1620_v63 = vpop.permute.xlu1 %1619  ;;  %v2898_v19 = vpop.permute.xlu0 %2897  ;;  %v2916_v7 = vmul.f32 %v4795_v0, %v2908_v18  ;;  %v2917_v46 = vmul.f32 %v4799_v41, %v2909_v61  ;;  %v2872_v3 = vmul.f32 %v4751_v48, %v5104_v36  ;;  %v2873_v17 = vmul.f32 %v4751_v48, %v5105_v56 }
 0x383   :  { %2943 = vst [vmem:[#allocation5 + $0xd0] sm:$0xff] %v2934_v13  ;;  %2944 = vst [vmem:[#allocation5 + $0xd8] sm:$0xff] %v2935_v22  ;;  %v1628_v49 = vadd.f32 %v1620_v63, %v1600_v25  ;;  %v1629_v31 = vadd.f32 %v1620_v63, %v1601_v37  ;;  %v2906_v21 = vadd.f32 %v2898_v19, %v2878_v5 }
 0x384   :  { %v2907_v4 = vadd.f32 %v2898_v19, %v2879_v34  ;;  %v2920_v25 = vmul.f32 %v4795_v0, %v2912_v53  ;;  %v2924_v37 = vmul.f32 %v2916_v7, %v5085_v57  ;;  %v2925_v58 = vmul.f32 %v2917_v46, %v5085_v57 }
 0x385   :  { %v1660_v45 = vadd.f32 %v1652_v14, %v1628_v49  ;;  %v1661_v28 = vadd.f32 %v1653_v15, %v1629_v31  ;;  %v2938_v60 = vadd.f32 %v2930_v35, %v2906_v21  ;;  %v5107_v15 = vld [vmem:[#allocation17_spill] sm:$0xff]  ;;  %v2876_v38 = vmul.f32 %v4759_v12, %v5106_v42 }
 0x386   :  { %v2939_v30 = vadd.f32 %v2931_v39, %v2907_v4  ;;  %v2244_v52 = vpop.permute.xlu1 %2243  ;;  %v2913_v16 = vsub.f32 %v5107_v15, %v4729_v2  ;;  %v2877_v48 = vmul.f32 %v4759_v12, %v5107_v15  ;;  %v2928_v0 = vmul.f32 %v2920_v25, %v5087_v59 }
 0x387   :  { %1669 = vst [vmem:[#allocation5 + $0x70] sm:$0xff] %v1660_v45  ;;  %1670 = vst [vmem:[#allocation5 + $0x78] sm:$0xff] %v1661_v28  ;;  %v2261_v14 = vadd.f32 %v2244_v52, %v2233_v51  ;;  %v2262_v1 = vadd.f32 %v2244_v52, %v2234_v11 }
 0x388   :  { %2947 = vst [vmem:[#allocation5 + $0xf0] sm:$0xff] %v2938_v60  ;;  %2948 = vst [vmem:[#allocation5 + $0xf8] sm:$0xff] %v2939_v30  ;;  %v2921_v2 = vmul.f32 %v4799_v41, %v2913_v16 }
 0x389   :  { %v2293_v10 = vadd.f32 %v2285_v47, %v2261_v14  ;;  %v2294_v40 = vadd.f32 %v2286_v6, %v2262_v1 }
 0x38a   :  { %v2254_v26 = vpop.permute.xlu1 %2253  ;;  %v2929_v41 = vmul.f32 %v2921_v2, %v5087_v59 }
 0x38b   :  { %2302 = vst [vmem:[#allocation5 + $0x80] sm:$0xff] %v2293_v10  ;;  %2303 = vst [vmem:[#allocation5 + $0x88] sm:$0xff] %v2294_v40  ;;  %v2265_v62 = vadd.f32 %v2254_v26, %v2237_v54  ;;  %v2266_v55 = vadd.f32 %v2254_v26, %v2238_v23 }
 0x38d   :  { %v2297_v32 = vadd.f32 %v2289_v24, %v2265_v62  ;;  %v2298_v44 = vadd.f32 %v2290_v9, %v2266_v55 }
 0x38e   :  { %v2883_v43 = vpop.permute.xlu1 %2882 }
 0x38f   :  { %2306 = vst [vmem:[#allocation5 + $0xa0] sm:$0xff] %v2297_v32  ;;  %2307 = vst [vmem:[#allocation5 + $0xa8] sm:$0xff] %v2298_v44  ;;  %v2900_v33 = vadd.f32 %v2883_v43, %v2872_v3  ;;  %v2901_v29 = vadd.f32 %v2883_v43, %v2873_v17 }
 0x391   :  { %v2932_v5 = vadd.f32 %v2924_v37, %v2900_v33  ;;  %v2933_v34 = vadd.f32 %v2925_v58, %v2901_v29 }
 0x392   :  { %v2893_v13 = vpop.permute.xlu1 %2892 }
 0x393   :  { %2941 = vst [vmem:[#allocation5 + $0xc0] sm:$0xff] %v2932_v5  ;;  %2942 = vst [vmem:[#allocation5 + $0xc8] sm:$0xff] %v2933_v34  ;;  %v2904_v57 = vadd.f32 %v2893_v13, %v2876_v38  ;;  %v2905_v22 = vadd.f32 %v2893_v13, %v2877_v48 }
 0x395   :  { %v2936_v63 = vadd.f32 %v2928_v0, %v2904_v57  ;;  %v2937_v35 = vadd.f32 %v2929_v41, %v2905_v22 }
 0x397   :  { %2945 = vst [vmem:[#allocation5 + $0xe0] sm:$0xff] %v2936_v63  ;;  %2946 = vst [vmem:[#allocation5 + $0xe8] sm:$0xff] %v2937_v35 }
 0x398   :  { %3126 = shalt.err (!%p3123_p12)
}
 0x399   :  { %s3127_s18 = scalar_lea.hbm %s4894_s2, 4096 }
 0x39a   :  { %p3128_p13 = scmp.ne.s32.totalorder %s4894_s2, %s3127_s18  ;;  %p3131_p0 = scmp.lt.u32.totalorder %s3127_s18, %s4894_s2 }
 0x39c   :  { %p3133_p1 = pnand %p3131_p0, %p3128_p13 }
 0x39e   :  { %3136 = shalt.err (!%p3133_p1)
}
 0x39f   :  { %2960 = dma.vmem_to_hbm [thread:$0]  %s2955_s14, 4096, %s4894_s2, [#allocation4], %s3142_s19, %s3142_s19, %s3143_s20  }
 0x3a0   :  { %3139 = dma.done.wait [#allocation4], 4096  }
 0x3a1   :  { %3140 = vsyncadd [#allocation4], 4294963200 }
 0x3a2   :  { %2964 = vsyncpa [#allocation3], 1 }
 0x3a3   :  { %2965 = vsyncpa [#allocation4], 1 }

</bundles_post_ra>
